<compile_context>
chip_gen: v7x
topology: tpu7x:2x2x1
jax: 0.10.0
libtpu: 0.0.40
codegen_flags: <defaults>
</compile_context>

<pallas_src>
import jax
import jax.numpy as jnp
from jax.experimental import pallas as pl
from jax.experimental.pallas import tpu as pltpu


_MASK_NEG = -1e30      # finite large-negative mask (softmax-equivalent, NaN-safe)
_LN_EPS = 1e-5

# Ordered parameter names (must match the kernel signatures below).
_ENC_KEYS = ("wq", "bq", "wk", "bk", "wv", "bv", "wo", "bo",
             "g1", "be1", "w1", "b1", "w2", "b2", "g2", "be2")
_DEC_KEYS = ("wq1", "bq1", "wk1", "bk1", "wv1", "bv1", "wo1", "bo1", "g1", "be1",
             "wq2", "bq2", "wk2", "bk2", "wv2", "bv2", "wo2", "bo2", "g2", "be2",
             "w1", "b1", "w2", "b2", "g3", "be3")


# ------------------------------ compiler params ------------------------------

def _vmem_limit_bytes():
    """Generation-dependent scoped-VMEM limit (~3/4 of physical, capped)."""
    try:
        cap = getattr(pltpu.get_tpu_info(), "vmem_capacity_bytes", None)
    except Exception:
        cap = None
    if not cap:
        return 32 * 1024 * 1024            # conservative fallback
    return int(min(int(cap) * 3 // 4, 100 * 1024 * 1024))


def _compiler_params(dimension_semantics):
    return pltpu.CompilerParams(dimension_semantics=dimension_semantics,
                                vmem_limit_bytes=_vmem_limit_bytes())


# ------------------------------ in-kernel helpers ----------------------------

def _layer_norm(x, gamma, beta):
    mean = jnp.mean(x, axis=-1, keepdims=True)
    c = x - mean
    var = jnp.mean(c * c, axis=-1, keepdims=True)
    return c * jax.lax.rsqrt(var + _LN_EPS) * gamma + beta


def _mha_batched(xq, xkv, wq, bq, wk, bk, wv, bv, wo, bo, *, causal):
    """Multi-head attention with ALL heads batched in single contractions.

    xq: (Lq, D) f32 query source; xkv: (Lk, D) key/value source (f32 or bf16).
    wq/wk/wv: (H, D, Da) bf16 (softmax scale pre-folded into wq);
    bq/bk/bv: (H, 1, Da) f32; wo: (H, Da, D) bf16; bo: (1, D) f32.
    Returns (Lq, D) f32.  No per-head loop, lane slicing or concatenate.
    """
    Lq, D = xq.shape
    Lk = xkv.shape[0]
    H = wq.shape[0]

    xb = jnp.broadcast_to(xq.astype(jnp.bfloat16)[None], (H, Lq, D))
    zb = jnp.broadcast_to(xkv.astype(jnp.bfloat16)[None], (H, Lk, D))

    # One batched MXU contraction per projection (batch dim = heads).
    q = jnp.einsum("hld,hdk->hlk", xb, wq, preferred_element_type=jnp.float32) + bq
    k = jnp.einsum("hld,hdk->hlk", zb, wk, preferred_element_type=jnp.float32) + bk
    v = jnp.einsum("hld,hdk->hlk", zb, wv, preferred_element_type=jnp.float32) + bv

    # Scores for all heads at once; 1/sqrt(Da) already folded into wq.
    s = jnp.einsum("hqd,hkd->hqk", q.astype(jnp.bfloat16), k.astype(jnp.bfloat16),
                   preferred_element_type=jnp.float32)
    if causal:
        row = jax.lax.broadcasted_iota(jnp.int32, (1, Lq, Lk), 1)
        col = jax.lax.broadcasted_iota(jnp.int32, (1, Lq, Lk), 2)
        s = jnp.where(row >= col, s, jnp.float32(_MASK_NEG))

    s = s - jnp.max(s, axis=-1, keepdims=True)
    p = jnp.exp(s)
    # EUP reciprocal (separate issue slot); ~1e-4 rel error, fine for inference.
    p = p * pl.reciprocal(jnp.sum(p, axis=-1, keepdims=True), approx=True)

    ctx = jnp.einsum("hqk,hkd->hqd", p.astype(jnp.bfloat16), v.astype(jnp.bfloat16),
                     preferred_element_type=jnp.float32)
    # Per-head output projection + reduction over heads == concat + wide proj.
    out = jnp.einsum("hqd,hdo->hqo", ctx.astype(jnp.bfloat16), wo,
                     preferred_element_type=jnp.float32)
    return jnp.sum(out, axis=0) + bo


def _mlp(x, w1, b1, w2, b2):
    h = jnp.dot(x.astype(jnp.bfloat16), w1, preferred_element_type=jnp.float32) + b1
    h = jnp.maximum(h, 0.0)
    return jnp.dot(h.astype(jnp.bfloat16), w2, preferred_element_type=jnp.float32) + b2


# -------------------------------- kernels ------------------------------------

def _enc_stack_kernel(x_ref,
                      wq, bq, wk, bk, wv, bv, wo, bo,
                      g1, be1, w1, b1, w2, b2, g2, be2,
                      o_ref, resid):
    """All encoder layers: grid=(B, L_enc); layer weights stream per l-step."""
    l = pl.program_id(1)

    @pl.when(l == 0)
    def _():
        resid[...] = x_ref[0].astype(jnp.float32)

    x = resid[...]
    a = _mha_batched(x, x, wq[0], bq[0], wk[0], bk[0], wv[0], bv[0], wo[0], bo[0],
                     causal=False)
    y = _layer_norm(a + x, g1[0], be1[0])
    m = _mlp(y, w1[0], b1[0], w2[0], b2[0])
    y = _layer_norm(m + y, g2[0], be2[0])
    resid[...] = y

    @pl.when(l == pl.num_programs(1) - 1)
    def _():
        o_ref[0] = y.astype(o_ref.dtype)


def _dec_stack_kernel(x_ref, z_ref,
                      wq1, bq1, wk1, bk1, wv1, bv1, wo1, bo1, g1, be1,
                      wq2, bq2, wk2, bk2, wv2, bv2, wo2, bo2, g2, be2,
                      w1, b1, w2, b2, g3, be3,
                      o_ref, resid):
    """All decoder layers: masked self-MHA -> LN -> cross-MHA -> LN -> MLP -> LN."""
    l = pl.program_id(1)

    @pl.when(l == 0)
    def _():
        resid[...] = x_ref[0].astype(jnp.float32)

    x = resid[...]
    z = z_ref[0]                                              # (Lz, D) bf16
    a1 = _mha_batched(x, x, wq1[0], bq1[0], wk1[0], bk1[0], wv1[0], bv1[0],
                      wo1[0], bo1[0], causal=True)
    x = _layer_norm(a1 + x, g1[0], be1[0])
    a2 = _mha_batched(x, z, wq2[0], bq2[0], wk2[0], bk2[0], wv2[0], bv2[0],
                      wo2[0], bo2[0], causal=False)
    x = _layer_norm(a2 + x, g2[0], be2[0])
    m = _mlp(x, w1[0], b1[0], w2[0], b2[0])
    x = _layer_norm(m + x, g3[0], be3[0])
    resid[...] = x

    @pl.when(l == pl.num_programs(1) - 1)
    def _():
        o_ref[0] = x.astype(o_ref.dtype)


def _unembed_kernel(x_ref, wu, bu, o_ref):
    # TODO(synk): at realistic vocab sizes, tile over a vocab grid axis with an
    # online softmax (and single-buffer or stream wu) instead of a resident block.
    x = x_ref[0].astype(jnp.bfloat16)                         # (L, D)
    logits = jnp.dot(x, wu[...], preferred_element_type=jnp.float32) + bu[...]
    logits = logits - jnp.max(logits, axis=-1, keepdims=True)
    p = jnp.exp(logits)
    o_ref[0] = p / jnp.sum(p, axis=-1, keepdims=True)         # exact normalization


# ------------------------------ pallas_call wrappers -------------------------

def _batch_spec(shape):
    """(B, L, D) activation block: selected by batch index, constant over layers."""
    zeros = (0,) * (len(shape) - 1)
    return pl.BlockSpec((1,) + tuple(shape[1:]), lambda b, l: (b,) + zeros)


def _layer_spec(a):
    """Weight stacked over layers (leading axis): stream one layer per l-step."""
    zeros = (0,) * (a.ndim - 1)
    return pl.BlockSpec((1,) + tuple(a.shape[1:]), lambda b, l: (l,) + zeros)


def _rep_spec(a):
    """Full-array block replicated across the batch grid (unembed weights)."""
    zeros = (0,) * a.ndim
    return pl.BlockSpec(a.shape, lambda b: zeros)


def _weight_bytes(ws):
    return sum(int(w.size) * int(w.dtype.itemsize) for w in ws)


def _attn_cost(lq, lk, d, h, da):
    flops = (2 * h * lq * d * da + 2 * 2 * h * lk * d * da   # Q and K,V projections
             + 4 * h * lq * lk * da                          # scores + P@V
             + 2 * h * lq * da * d)                          # output projection
    transc = h * lq * lk + h * lq
    return flops, transc


def encoder_stack(x, p):
    B, L, D = x.shape
    Lc, H, _, Da = p["wq"].shape
    M = p["w1"].shape[-1]
    weights = tuple(p[k] for k in _ENC_KEYS)
    af, at = _attn_cost(L, L, D, H, Da)
    flops = B * Lc * (af + 4 * L * D * M)
    transc = B * Lc * (at + 2 * L)
    bytes_accessed = 2 * B * L * D * x.dtype.itemsize + _weight_bytes(weights)
    return pl.pallas_call(
        _enc_stack_kernel,
        out_shape=jax.ShapeDtypeStruct((B, L, D), x.dtype),
        grid=(B, Lc),
        in_specs=[_batch_spec(x.shape)] + [_layer_spec(w) for w in weights],
        out_specs=_batch_spec(x.shape),
        scratch_shapes=[pltpu.VMEM((L, D), jnp.float32)],
        input_output_aliases={0: 0},
        compiler_params=_compiler_params(("parallel", "arbitrary")),
        cost_estimate=pl.CostEstimate(flops=int(flops), transcendentals=int(transc),
                                      bytes_accessed=int(bytes_accessed)),
    )(x, *weights)


def decoder_stack(x, z, p):
    B, Lx, D = x.shape
    _, Lz, _ = z.shape
    Lc, H, _, Da = p["wq1"].shape
    M = p["w1"].shape[-1]
    weights = tuple(p[k] for k in _DEC_KEYS)
    f1, t1 = _attn_cost(Lx, Lx, D, H, Da)
    f2, t2 = _attn_cost(Lx, Lz, D, H, Da)
    flops = B * Lc * (f1 + f2 + 4 * Lx * D * M)
    transc = B * Lc * (t1 + t2 + 3 * Lx)
    bytes_accessed = (2 * B * Lx * D * x.dtype.itemsize
                      + B * Lz * D * z.dtype.itemsize + _weight_bytes(weights))
    return pl.pallas_call(
        _dec_stack_kernel,
        out_shape=jax.ShapeDtypeStruct((B, Lx, D), x.dtype),
        grid=(B, Lc),
        in_specs=[_batch_spec(x.shape), _batch_spec(z.shape)]
                + [_layer_spec(w) for w in weights],
        out_specs=_batch_spec(x.shape),
        scratch_shapes=[pltpu.VMEM((Lx, D), jnp.float32)],
        input_output_aliases={0: 0},
        compiler_params=_compiler_params(("parallel", "arbitrary")),
        cost_estimate=pl.CostEstimate(flops=int(flops), transcendentals=int(transc),
                                      bytes_accessed=int(bytes_accessed)),
    )(x, z, *weights)


def unembed(x, p):
    B, L, D = x.shape
    V = p["wu"].shape[1]
    flops = B * 2 * L * D * V
    transc = B * L * V
    bytes_accessed = (B * L * D * x.dtype.itemsize + B * L * V * 4
                      + _weight_bytes((p["wu"], p["bu"])))
    return pl.pallas_call(
        _unembed_kernel,
        out_shape=jax.ShapeDtypeStruct((B, L, V), jnp.float32),
        grid=(B,),
        in_specs=[pl.BlockSpec((1, L, D), lambda b: (b, 0, 0)),
                  _rep_spec(p["wu"]), _rep_spec(p["bu"])],
        out_specs=pl.BlockSpec((1, L, V), lambda b: (b, 0, 0)),
        compiler_params=_compiler_params(("parallel",)),
        cost_estimate=pl.CostEstimate(flops=int(flops), transcendentals=int(transc),
                                      bytes_accessed=int(bytes_accessed)),
    )(x, p["wu"], p["bu"])


# -------------------------------- parameters ---------------------------------

def _dense(key, shape, dtype=jnp.bfloat16, scale=0.02):
    return (scale * jax.random.normal(key, shape, jnp.float32)).astype(dtype)


def _init_attn_stack(key, Lc, H, D, Da):
    """Head-stacked attention weights for Lc layers; softmax scale folded in."""
    kq, kk, kv, ko = jax.random.split(key, 4)
    wq = _dense(kq, (Lc, H, D, Da), jnp.float32) * (1.0 / (Da ** 0.5))
    return dict(
        wq=wq.astype(jnp.bfloat16), bq=jnp.zeros((Lc, H, 1, Da), jnp.float32),
        wk=_dense(kk, (Lc, H, D, Da)), bk=jnp.zeros((Lc, H, 1, Da), jnp.float32),
        wv=_dense(kv, (Lc, H, D, Da)), bv=jnp.zeros((Lc, H, 1, Da), jnp.float32),
        wo=_dense(ko, (Lc, H, Da, D)), bo=jnp.zeros((Lc, 1, D), jnp.float32),
    )


def _ln_pair(Lc, D):
    return jnp.ones((Lc, 1, D), jnp.float32), jnp.zeros((Lc, 1, D), jnp.float32)


def _init_mlp_stack(key, Lc, D, M):
    k1, k2 = jax.random.split(key, 2)
    return dict(w1=_dense(k1, (Lc, D, M)), b1=jnp.zeros((Lc, 1, M), jnp.float32),
                w2=_dense(k2, (Lc, M, D)), b2=jnp.zeros((Lc, 1, D), jnp.float32))


def init_ed_transformer(key, embed_dim, mlp_dim, max_seq_len,
                        L_enc, L_dec, vocab_size, num_heads):
    # MHAttentionInefficient uses atten_dim == embed_dim per head.
    D, Da, H, M = embed_dim, embed_dim, num_heads, mlp_dim
    k_tok, k_pos, k_u, k_ea, k_em, k_d1, k_d2, k_dm = jax.random.split(key, 8)

    enc = _init_attn_stack(k_ea, L_enc, H, D, Da)
    g1, be1 = _ln_pair(L_enc, D)
    g2, be2 = _ln_pair(L_enc, D)
    enc.update(g1=g1, be1=be1, g2=g2, be2=be2)
    enc.update(_init_mlp_stack(k_em, L_enc, D, M))

    a1 = _init_attn_stack(k_d1, L_dec, H, D, Da)
    a2 = _init_attn_stack(k_d2, L_dec, H, D, Da)
    dec = {k + "1": v for k, v in a1.items()}
    dec.update({k + "2": v for k, v in a2.items()})
    dg1, dbe1 = _ln_pair(L_dec, D)
    dg2, dbe2 = _ln_pair(L_dec, D)
    dg3, dbe3 = _ln_pair(L_dec, D)
    dec.update(g1=dg1, be1=dbe1, g2=dg2, be2=dbe2, g3=dg3, be3=dbe3)
    dec.update(_init_mlp_stack(k_dm, L_dec, D, M))

    return dict(
        tok_emb=_dense(k_tok, (vocab_size, D), jnp.float32, scale=1.0),
        pos_emb=_dense(k_pos, (max_seq_len, D), jnp.float32, scale=1.0),
        enc=enc, dec=dec,
        unembed=dict(wu=_dense(k_u, (D, vocab_size)),
                     bu=jnp.zeros((1, vocab_size), jnp.float32)),
    )


# ---------------------------------- forward ----------------------------------

def ed_transformer_forward(params, z_tok, x_tok):
    """z_tok: (B, Lz) int32 source tokens; x_tok: (B, Lx) int32 target tokens."""
    _, Lz = z_tok.shape
    _, Lx = x_tok.shape
    # Token + positional embedding gathers stay in plain JAX (data-dependent,
    # tiny); residual stream is stored bf16 in HBM, f32 inside the kernels.
    z = (jnp.take(params["tok_emb"], z_tok, axis=0)
         + params["pos_emb"][:Lz][None]).astype(jnp.bfloat16)
    x = (jnp.take(params["tok_emb"], x_tok, axis=0)
         + params["pos_emb"][:Lx][None]).astype(jnp.bfloat16)

    z = encoder_stack(z, params["enc"])        # all encoder layers, one call
    x = decoder_stack(x, z, params["dec"])     # all decoder layers, one call
    return unembed(x, params["unembed"])       # (B, Lx, vocab) probabilities


# ------------------------------------ main -----------------------------------

if __name__ == "__main__":
    embed_dim, mlp_dim = 32, 64
    max_seq_len, vocab_size, num_heads = 8, 16, 4
    L_enc, L_dec = 2, 2
    B, Lz, Lx = 2, 8, 8

    key = jax.random.PRNGKey(0)
    kp, kz, kx = jax.random.split(key, 3)
    params = init_ed_transformer(kp, embed_dim, mlp_dim, max_seq_len,
                                 L_enc, L_dec, vocab_size, num_heads)
    z_tok = jax.random.randint(kz, (B, Lz), 0, vocab_size, dtype=jnp.int32)
    x_tok = jax.random.randint(kx, (B, Lx), 0, vocab_size, dtype=jnp.int32)

    fwd = jax.jit(ed_transformer_forward)
    out = jax.block_until_ready(fwd(params, z_tok, x_tok))

    assert out.shape == (B, Lx, vocab_size)
    # rows are softmax distributions over the vocabulary
    assert bool(jnp.all(jnp.abs(jnp.sum(out, axis=-1) - 1.0) < 1e-3))
    assert bool(jnp.all(jnp.isfinite(out)))
    print("KERNEL_OK")
</pallas_src>

<mosaic_0001>
module attributes {stable_mosaic.version = 11 : i64} {
  func.func @_enc_stack_kernel(%arg0: i32, %arg1: i32, %arg2: memref<1x8x32xbf16, #tpu.memory_space<vmem>>, %arg3: memref<1x4x32x32xbf16, #tpu.memory_space<vmem>>, %arg4: memref<1x4x1x32xf32, #tpu.memory_space<vmem>>, %arg5: memref<1x4x32x32xbf16, #tpu.memory_space<vmem>>, %arg6: memref<1x4x1x32xf32, #tpu.memory_space<vmem>>, %arg7: memref<1x4x32x32xbf16, #tpu.memory_space<vmem>>, %arg8: memref<1x4x1x32xf32, #tpu.memory_space<vmem>>, %arg9: memref<1x4x32x32xbf16, #tpu.memory_space<vmem>>, %arg10: memref<1x1x32xf32, #tpu.memory_space<vmem>>, %arg11: memref<1x1x32xf32, #tpu.memory_space<vmem>>, %arg12: memref<1x1x32xf32, #tpu.memory_space<vmem>>, %arg13: memref<1x32x64xbf16, #tpu.memory_space<vmem>>, %arg14: memref<1x1x64xf32, #tpu.memory_space<vmem>>, %arg15: memref<1x64x32xbf16, #tpu.memory_space<vmem>>, %arg16: memref<1x1x32xf32, #tpu.memory_space<vmem>>, %arg17: memref<1x1x32xf32, #tpu.memory_space<vmem>>, %arg18: memref<1x1x32xf32, #tpu.memory_space<vmem>>, %arg19: memref<1x8x32xbf16, #tpu.memory_space<vmem>>, %arg20: memref<8x32xf32, #tpu.memory_space<vmem>>) attributes {dimension_semantics = [#tpu.dimension_semantics<parallel>, #tpu.dimension_semantics<arbitrary>], iteration_bounds = array<i64: 2, 2>, scalar_prefetch = 0 : i64, scratch_operands = 1 : i64, tpu.core_type = #tpu.core_type<tc>, window_params = [{transform_indices = @transform_0, window_bounds = array<i64: 1, 8, 32>}, {transform_indices = @transform_1, window_bounds = array<i64: 1, 4, 32, 32>}, {transform_indices = @transform_2, window_bounds = array<i64: 1, 4, 1, 32>}, {transform_indices = @transform_3, window_bounds = array<i64: 1, 4, 32, 32>}, {transform_indices = @transform_4, window_bounds = array<i64: 1, 4, 1, 32>}, {transform_indices = @transform_5, window_bounds = array<i64: 1, 4, 32, 32>}, {transform_indices = @transform_6, window_bounds = array<i64: 1, 4, 1, 32>}, {transform_indices = @transform_7, window_bounds = array<i64: 1, 4, 32, 32>}, {transform_indices = @transform_8, window_bounds = array<i64: 1, 1, 32>}, {transform_indices = @transform_9, window_bounds = array<i64: 1, 1, 32>}, {transform_indices = @transform_10, window_bounds = array<i64: 1, 1, 32>}, {transform_indices = @transform_11, window_bounds = array<i64: 1, 32, 64>}, {transform_indices = @transform_12, window_bounds = array<i64: 1, 1, 64>}, {transform_indices = @transform_13, window_bounds = array<i64: 1, 64, 32>}, {transform_indices = @transform_14, window_bounds = array<i64: 1, 1, 32>}, {transform_indices = @transform_15, window_bounds = array<i64: 1, 1, 32>}, {transform_indices = @transform_16, window_bounds = array<i64: 1, 1, 32>}, {transform_indices = @transform_17, window_bounds = array<i64: 1, 8, 32>}]} {
    %c0_i32 = arith.constant 0 : i32
    %0 = arith.cmpi eq, %arg1, %c0_i32 : i32
    %1 = arith.extui %0 : i1 to i32
    %c0_i32_0 = arith.constant 0 : i32
    %2 = arith.cmpi ne, %1, %c0_i32_0 : i32
    scf.if %2 {
      %c0_81 = arith.constant 0 : index
      %c0_82 = arith.constant 0 : index
      %c0_83 = arith.constant 0 : index
      %130 = vector.load %arg2[%c0_81, %c0_82, %c0_83] : memref<1x8x32xbf16, #tpu.memory_space<vmem>>, vector<1x8x32xbf16>
      %131 = vector.shape_cast %130 : vector<1x8x32xbf16> to vector<8x32xbf16>
      %132 = arith.extf %131 : vector<8x32xbf16> to vector<8x32xf32>
      %c0_84 = arith.constant 0 : index
      %c0_85 = arith.constant 0 : index
      %133 = vector.load %arg20[%c0_84, %c0_85] : memref<8x32xf32, #tpu.memory_space<vmem>>, vector<8x32xf32>
      tpu.vector_store %arg20[%c0_84, %c0_85], %132 {strides = array<i32>} : memref<8x32xf32, #tpu.memory_space<vmem>>, vector<8x32xf32>,
    } else {
    }
    %c0 = arith.constant 0 : index
    %c0_1 = arith.constant 0 : index
    %3 = vector.load %arg20[%c0, %c0_1] : memref<8x32xf32, #tpu.memory_space<vmem>>, vector<8x32xf32>
    %c0_2 = arith.constant 0 : index
    %c0_3 = arith.constant 0 : index
    %c0_4 = arith.constant 0 : index
    %c0_5 = arith.constant 0 : index
    %4 = vector.load %arg3[%c0_2, %c0_3, %c0_4, %c0_5] : memref<1x4x32x32xbf16, #tpu.memory_space<vmem>>, vector<1x4x32x32xbf16>
    %5 = vector.shape_cast %4 : vector<1x4x32x32xbf16> to vector<4x32x32xbf16>
    %c0_6 = arith.constant 0 : index
    %c0_7 = arith.constant 0 : index
    %c0_8 = arith.constant 0 : index
    %c0_9 = arith.constant 0 : index
    %6 = vector.load %arg4[%c0_6, %c0_7, %c0_8, %c0_9] : memref<1x4x1x32xf32, #tpu.memory_space<vmem>>, vector<1x4x1x32xf32>
    %7 = vector.shape_cast %6 : vector<1x4x1x32xf32> to vector<4x1x32xf32>
    %c0_10 = arith.constant 0 : index
    %c0_11 = arith.constant 0 : index
    %c0_12 = arith.constant 0 : index
    %c0_13 = arith.constant 0 : index
    %8 = vector.load %arg5[%c0_10, %c0_11, %c0_12, %c0_13] : memref<1x4x32x32xbf16, #tpu.memory_space<vmem>>, vector<1x4x32x32xbf16>
    %9 = vector.shape_cast %8 : vector<1x4x32x32xbf16> to vector<4x32x32xbf16>
    %c0_14 = arith.constant 0 : index
    %c0_15 = arith.constant 0 : index
    %c0_16 = arith.constant 0 : index
    %c0_17 = arith.constant 0 : index
    %10 = vector.load %arg6[%c0_14, %c0_15, %c0_16, %c0_17] : memref<1x4x1x32xf32, #tpu.memory_space<vmem>>, vector<1x4x1x32xf32>
    %11 = vector.shape_cast %10 : vector<1x4x1x32xf32> to vector<4x1x32xf32>
    %c0_18 = arith.constant 0 : index
    %c0_19 = arith.constant 0 : index
    %c0_20 = arith.constant 0 : index
    %c0_21 = arith.constant 0 : index
    %12 = vector.load %arg7[%c0_18, %c0_19, %c0_20, %c0_21] : memref<1x4x32x32xbf16, #tpu.memory_space<vmem>>, vector<1x4x32x32xbf16>
    %13 = vector.shape_cast %12 : vector<1x4x32x32xbf16> to vector<4x32x32xbf16>
    %c0_22 = arith.constant 0 : index
    %c0_23 = arith.constant 0 : index
    %c0_24 = arith.constant 0 : index
    %c0_25 = arith.constant 0 : index
    %14 = vector.load %arg8[%c0_22, %c0_23, %c0_24, %c0_25] : memref<1x4x1x32xf32, #tpu.memory_space<vmem>>, vector<1x4x1x32xf32>
    %15 = vector.shape_cast %14 : vector<1x4x1x32xf32> to vector<4x1x32xf32>
    %c0_26 = arith.constant 0 : index
    %c0_27 = arith.constant 0 : index
    %c0_28 = arith.constant 0 : index
    %c0_29 = arith.constant 0 : index
    %16 = vector.load %arg9[%c0_26, %c0_27, %c0_28, %c0_29] : memref<1x4x32x32xbf16, #tpu.memory_space<vmem>>, vector<1x4x32x32xbf16>
    %17 = vector.shape_cast %16 : vector<1x4x32x32xbf16> to vector<4x32x32xbf16>
    %c0_30 = arith.constant 0 : index
    %c0_31 = arith.constant 0 : index
    %c0_32 = arith.constant 0 : index
    %18 = vector.load %arg10[%c0_30, %c0_31, %c0_32] : memref<1x1x32xf32, #tpu.memory_space<vmem>>, vector<1x1x32xf32>
    %19 = vector.shape_cast %18 : vector<1x1x32xf32> to vector<1x32xf32>
    %20 = arith.truncf %3 : vector<8x32xf32> to vector<8x32xbf16>
    %21 = vector.shape_cast %20 : vector<8x32xbf16> to vector<1x8x32xbf16>
    %22 = vector.shape_cast %21 : vector<1x8x32xbf16> to vector<1x8x32xbf16>
    %23 = vector.broadcast %22 : vector<1x8x32xbf16> to vector<4x8x32xbf16>
    %24 = arith.truncf %3 : vector<8x32xf32> to vector<8x32xbf16>
    %25 = vector.shape_cast %24 : vector<8x32xbf16> to vector<1x8x32xbf16>
    %26 = vector.shape_cast %25 : vector<1x8x32xbf16> to vector<1x8x32xbf16>
    %27 = vector.broadcast %26 : vector<1x8x32xbf16> to vector<4x8x32xbf16>
    "tpu.trace_start"() <{level = 10 : i32, message = "hld,hdk->hlk"}> : () -> ()
    %cst = arith.constant dense<0.000000e+00> : vector<4x8x32xf32>
    %28 = tpu.matmul %23, %5, %cst {dimension_numbers = #tpu.dot_dimension_numbers<[2], [1], [1], [2], [0, 0, 0, 1, 1, 2], [0], [0]>} : vector<4x8x32xbf16>, vector<4x32x32xbf16>, vector<4x8x32xf32> -> vector<4x8x32xf32>
    "tpu.trace_stop"() : () -> ()
    %29 = vector.broadcast %7 : vector<4x1x32xf32> to vector<4x8x32xf32>
    %30 = arith.addf %28, %29 : vector<4x8x32xf32>
    "tpu.trace_start"() <{level = 10 : i32, message = "hld,hdk->hlk"}> : () -> ()
    %cst_33 = arith.constant dense<0.000000e+00> : vector<4x8x32xf32>
    %31 = tpu.matmul %27, %9, %cst_33 {dimension_numbers = #tpu.dot_dimension_numbers<[2], [1], [1], [2], [0, 0, 0, 1, 1, 2], [0], [0]>} : vector<4x8x32xbf16>, vector<4x32x32xbf16>, vector<4x8x32xf32> -> vector<4x8x32xf32>
    "tpu.trace_stop"() : () -> ()
    %32 = vector.broadcast %11 : vector<4x1x32xf32> to vector<4x8x32xf32>
    %33 = arith.addf %31, %32 : vector<4x8x32xf32>
    "tpu.trace_start"() <{level = 10 : i32, message = "hld,hdk->hlk"}> : () -> ()
    %cst_34 = arith.constant dense<0.000000e+00> : vector<4x8x32xf32>
    %34 = tpu.matmul %27, %13, %cst_34 {dimension_numbers = #tpu.dot_dimension_numbers<[2], [1], [1], [2], [0, 0, 0, 1, 1, 2], [0], [0]>} : vector<4x8x32xbf16>, vector<4x32x32xbf16>, vector<4x8x32xf32> -> vector<4x8x32xf32>
    "tpu.trace_stop"() : () -> ()
    %35 = vector.broadcast %15 : vector<4x1x32xf32> to vector<4x8x32xf32>
    %36 = arith.addf %34, %35 : vector<4x8x32xf32>
    %37 = arith.truncf %30 : vector<4x8x32xf32> to vector<4x8x32xbf16>
    %38 = arith.truncf %33 : vector<4x8x32xf32> to vector<4x8x32xbf16>
    "tpu.trace_start"() <{level = 10 : i32, message = "hqd,hkd->hqk"}> : () -> ()
    %cst_35 = arith.constant dense<0.000000e+00> : vector<4x8x8xf32>
    %39 = tpu.matmul %37, %38, %cst_35 {dimension_numbers = #tpu.dot_dimension_numbers<[2], [2], [1], [1], [0, 0, 0, 1, 1, 1], [0], [0]>} : vector<4x8x32xbf16>, vector<4x8x32xbf16>, vector<4x8x8xf32> -> vector<4x8x8xf32>
    "tpu.trace_stop"() : () -> ()
    %cst_36 = arith.constant dense<0xFF800000> : vector<4x8xf32>
    %40 = vector.multi_reduction <maximumf>, %39, %cst_36 [2] : vector<4x8x8xf32> to vector<4x8xf32>
    %41 = vector.shape_cast %40 : vector<4x8xf32> to vector<4x8x1xf32>
    %42 = vector.broadcast %41 : vector<4x8x1xf32> to vector<4x8x8xf32>
    %43 = arith.subf %39, %42 : vector<4x8x8xf32>
    %44 = math.exp %43 : vector<4x8x8xf32>
    %cst_37 = arith.constant dense<0.000000e+00> : vector<4x8xf32>
    %45 = vector.multi_reduction <add>, %44, %cst_37 [2] : vector<4x8x8xf32> to vector<4x8xf32>
    %46 = vector.shape_cast %45 : vector<4x8xf32> to vector<4x8x1xf32>
    %47 = tpu.reciprocal %46 {approx = true} : vector<4x8x1xf32> -> vector<4x8x1xf32>
    %48 = vector.broadcast %47 : vector<4x8x1xf32> to vector<4x8x8xf32>
    %49 = arith.mulf %44, %48 : vector<4x8x8xf32>
    %50 = arith.truncf %49 : vector<4x8x8xf32> to vector<4x8x8xbf16>
    %51 = arith.truncf %36 : vector<4x8x32xf32> to vector<4x8x32xbf16>
    "tpu.trace_start"() <{level = 10 : i32, message = "hqk,hkd->hqd"}> : () -> ()
    %cst_38 = arith.constant dense<0.000000e+00> : vector<4x8x32xf32>
    %52 = tpu.matmul %50, %51, %cst_38 {dimension_numbers = #tpu.dot_dimension_numbers<[2], [1], [1], [2], [0, 0, 0, 1, 1, 2], [0], [0]>} : vector<4x8x8xbf16>, vector<4x8x32xbf16>, vector<4x8x32xf32> -> vector<4x8x32xf32>
    "tpu.trace_stop"() : () -> ()
    %53 = arith.truncf %52 : vector<4x8x32xf32> to vector<4x8x32xbf16>
    "tpu.trace_start"() <{level = 10 : i32, message = "hqd,hdo->hqo"}> : () -> ()
    %cst_39 = arith.constant dense<0.000000e+00> : vector<4x8x32xf32>
    %54 = tpu.matmul %53, %17, %cst_39 {dimension_numbers = #tpu.dot_dimension_numbers<[2], [1], [1], [2], [0, 0, 0, 1, 1, 2], [0], [0]>} : vector<4x8x32xbf16>, vector<4x32x32xbf16>, vector<4x8x32xf32> -> vector<4x8x32xf32>
    "tpu.trace_stop"() : () -> ()
    %cst_40 = arith.constant dense<0.000000e+00> : vector<8x32xf32>
    %55 = vector.multi_reduction <add>, %54, %cst_40 [0] : vector<4x8x32xf32> to vector<8x32xf32>
    %56 = vector.broadcast %19 : vector<1x32xf32> to vector<8x32xf32>
    %57 = arith.addf %55, %56 : vector<8x32xf32>
    %58 = arith.addf %57, %3 : vector<8x32xf32>
    %c0_41 = arith.constant 0 : index
    %c0_42 = arith.constant 0 : index
    %c0_43 = arith.constant 0 : index
    %59 = vector.load %arg11[%c0_41, %c0_42, %c0_43] : memref<1x1x32xf32, #tpu.memory_space<vmem>>, vector<1x1x32xf32>
    %60 = vector.shape_cast %59 : vector<1x1x32xf32> to vector<1x32xf32>
    %c0_44 = arith.constant 0 : index
    %c0_45 = arith.constant 0 : index
    %c0_46 = arith.constant 0 : index
    %61 = vector.load %arg12[%c0_44, %c0_45, %c0_46] : memref<1x1x32xf32, #tpu.memory_space<vmem>>, vector<1x1x32xf32>
    %62 = vector.shape_cast %61 : vector<1x1x32xf32> to vector<1x32xf32>
    %cst_47 = arith.constant dense<0.000000e+00> : vector<8xf32>
    %63 = vector.multi_reduction <add>, %58, %cst_47 [1] : vector<8x32xf32> to vector<8xf32>
    %64 = vector.shape_cast %63 : vector<8xf32> to vector<8x1xf32>
    %cst_48 = arith.constant 3.200000e+01 : f32
    %65 = vector.broadcast %cst_48 : f32 to vector<8x1xf32>
    %66 = arith.divf %64, %65 : vector<8x1xf32>
    %67 = vector.broadcast %66 : vector<8x1xf32> to vector<8x32xf32>
    %68 = arith.subf %58, %67 : vector<8x32xf32>
    %69 = arith.mulf %68, %68 : vector<8x32xf32>
    %cst_49 = arith.constant dense<0.000000e+00> : vector<8xf32>
    %70 = vector.multi_reduction <add>, %69, %cst_49 [1] : vector<8x32xf32> to vector<8xf32>
    %71 = vector.shape_cast %70 : vector<8xf32> to vector<8x1xf32>
    %cst_50 = arith.constant 3.200000e+01 : f32
    %72 = vector.broadcast %cst_50 : f32 to vector<8x1xf32>
    %73 = arith.divf %71, %72 : vector<8x1xf32>
    %cst_51 = arith.constant 9.99999974E-6 : f32
    %74 = vector.broadcast %cst_51 : f32 to vector<8x1xf32>
    %75 = arith.addf %73, %74 : vector<8x1xf32>
    %76 = math.rsqrt %75 : vector<8x1xf32>
    %77 = vector.broadcast %76 : vector<8x1xf32> to vector<8x32xf32>
    %78 = arith.mulf %68, %77 : vector<8x32xf32>
    %79 = vector.broadcast %60 : vector<1x32xf32> to vector<8x32xf32>
    %80 = arith.mulf %78, %79 : vector<8x32xf32>
    %81 = vector.broadcast %62 : vector<1x32xf32> to vector<8x32xf32>
    %82 = arith.addf %80, %81 : vector<8x32xf32>
    %c0_52 = arith.constant 0 : index
    %c0_53 = arith.constant 0 : index
    %c0_54 = arith.constant 0 : index
    %83 = vector.load %arg13[%c0_52, %c0_53, %c0_54] : memref<1x32x64xbf16, #tpu.memory_space<vmem>>, vector<1x32x64xbf16>
    %84 = vector.shape_cast %83 : vector<1x32x64xbf16> to vector<32x64xbf16>
    %c0_55 = arith.constant 0 : index
    %c0_56 = arith.constant 0 : index
    %c0_57 = arith.constant 0 : index
    %85 = vector.load %arg14[%c0_55, %c0_56, %c0_57] : memref<1x1x64xf32, #tpu.memory_space<vmem>>, vector<1x1x64xf32>
    %86 = vector.shape_cast %85 : vector<1x1x64xf32> to vector<1x64xf32>
    %c0_58 = arith.constant 0 : index
    %c0_59 = arith.constant 0 : index
    %c0_60 = arith.constant 0 : index
    %87 = vector.load %arg15[%c0_58, %c0_59, %c0_60] : memref<1x64x32xbf16, #tpu.memory_space<vmem>>, vector<1x64x32xbf16>
    %88 = vector.shape_cast %87 : vector<1x64x32xbf16> to vector<64x32xbf16>
    %c0_61 = arith.constant 0 : index
    %c0_62 = arith.constant 0 : index
    %c0_63 = arith.constant 0 : index
    %89 = vector.load %arg16[%c0_61, %c0_62, %c0_63] : memref<1x1x32xf32, #tpu.memory_space<vmem>>, vector<1x1x32xf32>
    %90 = vector.shape_cast %89 : vector<1x1x32xf32> to vector<1x32xf32>
    %91 = arith.truncf %82 : vector<8x32xf32> to vector<8x32xbf16>
    %cst_64 = arith.constant dense<0.000000e+00> : vector<8x64xf32>
    %92 = tpu.matmul %91, %84, %cst_64 {dimension_numbers = #tpu.dot_dimension_numbers<[1], [0], [0], [1], [0, 0, 1, 1], [], []>} : vector<8x32xbf16>, vector<32x64xbf16>, vector<8x64xf32> -> vector<8x64xf32>
    %93 = vector.broadcast %86 : vector<1x64xf32> to vector<8x64xf32>
    %94 = arith.addf %92, %93 : vector<8x64xf32>
    %cst_65 = arith.constant 0.000000e+00 : f32
    %95 = vector.broadcast %cst_65 : f32 to vector<8x64xf32>
    %96 = arith.maximumf %94, %95 : vector<8x64xf32>
    %97 = arith.truncf %96 : vector<8x64xf32> to vector<8x64xbf16>
    %cst_66 = arith.constant dense<0.000000e+00> : vector<8x32xf32>
    %98 = tpu.matmul %97, %88, %cst_66 {dimension_numbers = #tpu.dot_dimension_numbers<[1], [0], [0], [1], [0, 0, 1, 1], [], []>} : vector<8x64xbf16>, vector<64x32xbf16>, vector<8x32xf32> -> vector<8x32xf32>
    %99 = vector.broadcast %90 : vector<1x32xf32> to vector<8x32xf32>
    %100 = arith.addf %98, %99 : vector<8x32xf32>
    %101 = arith.addf %100, %82 : vector<8x32xf32>
    %c0_67 = arith.constant 0 : index
    %c0_68 = arith.constant 0 : index
    %c0_69 = arith.constant 0 : index
    %102 = vector.load %arg17[%c0_67, %c0_68, %c0_69] : memref<1x1x32xf32, #tpu.memory_space<vmem>>, vector<1x1x32xf32>
    %103 = vector.shape_cast %102 : vector<1x1x32xf32> to vector<1x32xf32>
    %c0_70 = arith.constant 0 : index
    %c0_71 = arith.constant 0 : index
    %c0_72 = arith.constant 0 : index
    %104 = vector.load %arg18[%c0_70, %c0_71, %c0_72] : memref<1x1x32xf32, #tpu.memory_space<vmem>>, vector<1x1x32xf32>
    %105 = vector.shape_cast %104 : vector<1x1x32xf32> to vector<1x32xf32>
    %cst_73 = arith.constant dense<0.000000e+00> : vector<8xf32>
    %106 = vector.multi_reduction <add>, %101, %cst_73 [1] : vector<8x32xf32> to vector<8xf32>
    %107 = vector.shape_cast %106 : vector<8xf32> to vector<8x1xf32>
    %cst_74 = arith.constant 3.200000e+01 : f32
    %108 = vector.broadcast %cst_74 : f32 to vector<8x1xf32>
    %109 = arith.divf %107, %108 : vector<8x1xf32>
    %110 = vector.broadcast %109 : vector<8x1xf32> to vector<8x32xf32>
    %111 = arith.subf %101, %110 : vector<8x32xf32>
    %112 = arith.mulf %111, %111 : vector<8x32xf32>
    %cst_75 = arith.constant dense<0.000000e+00> : vector<8xf32>
    %113 = vector.multi_reduction <add>, %112, %cst_75 [1] : vector<8x32xf32> to vector<8xf32>
    %114 = vector.shape_cast %113 : vector<8xf32> to vector<8x1xf32>
    %cst_76 = arith.constant 3.200000e+01 : f32
    %115 = vector.broadcast %cst_76 : f32 to vector<8x1xf32>
    %116 = arith.divf %114, %115 : vector<8x1xf32>
    %cst_77 = arith.constant 9.99999974E-6 : f32
    %117 = vector.broadcast %cst_77 : f32 to vector<8x1xf32>
    %118 = arith.addf %116, %117 : vector<8x1xf32>
    %119 = math.rsqrt %118 : vector<8x1xf32>
    %120 = vector.broadcast %119 : vector<8x1xf32> to vector<8x32xf32>
    %121 = arith.mulf %111, %120 : vector<8x32xf32>
    %122 = vector.broadcast %103 : vector<1x32xf32> to vector<8x32xf32>
    %123 = arith.mulf %121, %122 : vector<8x32xf32>
    %124 = vector.broadcast %105 : vector<1x32xf32> to vector<8x32xf32>
    %125 = arith.addf %123, %124 : vector<8x32xf32>
    %c0_78 = arith.constant 0 : index
    %c0_79 = arith.constant 0 : index
    %126 = vector.load %arg20[%c0_78, %c0_79] : memref<8x32xf32, #tpu.memory_space<vmem>>, vector<8x32xf32>
    tpu.vector_store %arg20[%c0_78, %c0_79], %125 {strides = array<i32>} : memref<8x32xf32, #tpu.memory_space<vmem>>, vector<8x32xf32>,
    %c1_i32 = arith.constant 1 : i32
    %127 = arith.cmpi eq, %arg1, %c1_i32 : i32
    %128 = arith.extui %127 : i1 to i32
    %c0_i32_80 = arith.constant 0 : i32
    %129 = arith.cmpi ne, %128, %c0_i32_80 : i32
    scf.if %129 {
      %130 = arith.truncf %125 : vector<8x32xf32> to vector<8x32xbf16>
      %c0_81 = arith.constant 0 : index
      %c0_82 = arith.constant 0 : index
      %c0_83 = arith.constant 0 : index
      %131 = vector.load %arg19[%c0_81, %c0_82, %c0_83] : memref<1x8x32xbf16, #tpu.memory_space<vmem>>, vector<1x8x32xbf16>
      %132 = vector.shape_cast %131 : vector<1x8x32xbf16> to vector<8x32xbf16>
      %133 = vector.shape_cast %130 : vector<8x32xbf16> to vector<1x8x32xbf16>
      tpu.vector_store %arg19[%c0_81, %c0_82, %c0_83], %133 {strides = array<i32>} : memref<1x8x32xbf16, #tpu.memory_space<vmem>>, vector<1x8x32xbf16>,
    } else {
    }
    return
  }
  func.func @transform_0(%arg0: i32, %arg1: i32) -> (i32, i32, i32) {
    %c0_i32 = arith.constant 0 : i32
    %c0_i32_0 = arith.constant 0 : i32
    %c0_i32_1 = arith.constant 0 : i32
    return %arg0, %c0_i32, %c0_i32_0 : i32, i32, i32
  }
  func.func @transform_1(%arg0: i32, %arg1: i32) -> (i32, i32, i32, i32) {
    %c0_i32 = arith.constant 0 : i32
    %c0_i32_0 = arith.constant 0 : i32
    %c0_i32_1 = arith.constant 0 : i32
    %c0_i32_2 = arith.constant 0 : i32
    return %arg1, %c0_i32, %c0_i32_0, %c0_i32_1 : i32, i32, i32, i32
  }
  func.func @transform_2(%arg0: i32, %arg1: i32) -> (i32, i32, i32, i32) {
    %c0_i32 = arith.constant 0 : i32
    %c0_i32_0 = arith.constant 0 : i32
    %c0_i32_1 = arith.constant 0 : i32
    %c0_i32_2 = arith.constant 0 : i32
    return %arg1, %c0_i32, %c0_i32_0, %c0_i32_1 : i32, i32, i32, i32
  }
  func.func @transform_3(%arg0: i32, %arg1: i32) -> (i32, i32, i32, i32) {
    %c0_i32 = arith.constant 0 : i32
    %c0_i32_0 = arith.constant 0 : i32
    %c0_i32_1 = arith.constant 0 : i32
    %c0_i32_2 = arith.constant 0 : i32
    return %arg1, %c0_i32, %c0_i32_0, %c0_i32_1 : i32, i32, i32, i32
  }
  func.func @transform_4(%arg0: i32, %arg1: i32) -> (i32, i32, i32, i32) {
    %c0_i32 = arith.constant 0 : i32
    %c0_i32_0 = arith.constant 0 : i32
    %c0_i32_1 = arith.constant 0 : i32
    %c0_i32_2 = arith.constant 0 : i32
    return %arg1, %c0_i32, %c0_i32_0, %c0_i32_1 : i32, i32, i32, i32
  }
  func.func @transform_5(%arg0: i32, %arg1: i32) -> (i32, i32, i32, i32) {
    %c0_i32 = arith.constant 0 : i32
    %c0_i32_0 = arith.constant 0 : i32
    %c0_i32_1 = arith.constant 0 : i32
    %c0_i32_2 = arith.constant 0 : i32
    return %arg1, %c0_i32, %c0_i32_0, %c0_i32_1 : i32, i32, i32, i32
  }
  func.func @transform_6(%arg0: i32, %arg1: i32) -> (i32, i32, i32, i32) {
    %c0_i32 = arith.constant 0 : i32
    %c0_i32_0 = arith.constant 0 : i32
    %c0_i32_1 = arith.constant 0 : i32
    %c0_i32_2 = arith.constant 0 : i32
    return %arg1, %c0_i32, %c0_i32_0, %c0_i32_1 : i32, i32, i32, i32
  }
  func.func @transform_7(%arg0: i32, %arg1: i32) -> (i32, i32, i32, i32) {
    %c0_i32 = arith.constant 0 : i32
    %c0_i32_0 = arith.constant 0 : i32
    %c0_i32_1 = arith.constant 0 : i32
    %c0_i32_2 = arith.constant 0 : i32
    return %arg1, %c0_i32, %c0_i32_0, %c0_i32_1 : i32, i32, i32, i32
  }
  func.func @transform_8(%arg0: i32, %arg1: i32) -> (i32, i32, i32) {
    %c0_i32 = arith.constant 0 : i32
    %c0_i32_0 = arith.constant 0 : i32
    %c0_i32_1 = arith.constant 0 : i32
    return %arg1, %c0_i32, %c0_i32_0 : i32, i32, i32
  }
  func.func @transform_9(%arg0: i32, %arg1: i32) -> (i32, i32, i32) {
    %c0_i32 = arith.constant 0 : i32
    %c0_i32_0 = arith.constant 0 : i32
    %c0_i32_1 = arith.constant 0 : i32
    return %arg1, %c0_i32, %c0_i32_0 : i32, i32, i32
  }
  func.func @transform_10(%arg0: i32, %arg1: i32) -> (i32, i32, i32) {
    %c0_i32 = arith.constant 0 : i32
    %c0_i32_0 = arith.constant 0 : i32
    %c0_i32_1 = arith.constant 0 : i32
    return %arg1, %c0_i32, %c0_i32_0 : i32, i32, i32
  }
  func.func @transform_11(%arg0: i32, %arg1: i32) -> (i32, i32, i32) {
    %c0_i32 = arith.constant 0 : i32
    %c0_i32_0 = arith.constant 0 : i32
    %c0_i32_1 = arith.constant 0 : i32
    return %arg1, %c0_i32, %c0_i32_0 : i32, i32, i32
  }
  func.func @transform_12(%arg0: i32, %arg1: i32) -> (i32, i32, i32) {
    %c0_i32 = arith.constant 0 : i32
    %c0_i32_0 = arith.constant 0 : i32
    %c0_i32_1 = arith.constant 0 : i32
    return %arg1, %c0_i32, %c0_i32_0 : i32, i32, i32
  }
  func.func @transform_13(%arg0: i32, %arg1: i32) -> (i32, i32, i32) {
    %c0_i32 = arith.constant 0 : i32
    %c0_i32_0 = arith.constant 0 : i32
    %c0_i32_1 = arith.constant 0 : i32
    return %arg1, %c0_i32, %c0_i32_0 : i32, i32, i32
  }
  func.func @transform_14(%arg0: i32, %arg1: i32) -> (i32, i32, i32) {
    %c0_i32 = arith.constant 0 : i32
    %c0_i32_0 = arith.constant 0 : i32
    %c0_i32_1 = arith.constant 0 : i32
    return %arg1, %c0_i32, %c0_i32_0 : i32, i32, i32
  }
  func.func @transform_15(%arg0: i32, %arg1: i32) -> (i32, i32, i32) {
    %c0_i32 = arith.constant 0 : i32
    %c0_i32_0 = arith.constant 0 : i32
    %c0_i32_1 = arith.constant 0 : i32
    return %arg1, %c0_i32, %c0_i32_0 : i32, i32, i32
  }
  func.func @transform_16(%arg0: i32, %arg1: i32) -> (i32, i32, i32) {
    %c0_i32 = arith.constant 0 : i32
    %c0_i32_0 = arith.constant 0 : i32
    %c0_i32_1 = arith.constant 0 : i32
    return %arg1, %c0_i32, %c0_i32_0 : i32, i32, i32
  }
  func.func @transform_17(%arg0: i32, %arg1: i32) -> (i32, i32, i32) {
    %c0_i32 = arith.constant 0 : i32
    %c0_i32_0 = arith.constant 0 : i32
    %c0_i32_1 = arith.constant 0 : i32
    return %arg0, %c0_i32, %c0_i32_0 : i32, i32, i32
  }
}

module attributes {stable_mosaic.version = 11 : i64} {
  func.func @_unembed_kernel(%arg0: i32, %arg1: memref<1x8x32xbf16, #tpu.memory_space<vmem>>, %arg2: memref<32x16xbf16, #tpu.memory_space<vmem>>, %arg3: memref<1x16xf32, #tpu.memory_space<vmem>>, %arg4: memref<1x8x16xf32, #tpu.memory_space<vmem>>) attributes {dimension_semantics = [#tpu.dimension_semantics<parallel>], iteration_bounds = array<i64: 2>, scalar_prefetch = 0 : i64, scratch_operands = 0 : i64, tpu.core_type = #tpu.core_type<tc>, window_params = [{transform_indices = @transform_0, window_bounds = array<i64: 1, 8, 32>}, {pipeline_mode = #tpu.pipeline_mode<synchronous>, transform_indices = @transform_1, window_bounds = array<i64: 32, 16>}, {pipeline_mode = #tpu.pipeline_mode<synchronous>, transform_indices = @transform_2, window_bounds = array<i64: 1, 16>}, {transform_indices = @transform_3, window_bounds = array<i64: 1, 8, 16>}]} {
    %c0 = arith.constant 0 : index
    %c0_0 = arith.constant 0 : index
    %c0_1 = arith.constant 0 : index
    %0 = vector.load %arg1[%c0, %c0_0, %c0_1] : memref<1x8x32xbf16, #tpu.memory_space<vmem>>, vector<1x8x32xbf16>
    %1 = vector.shape_cast %0 : vector<1x8x32xbf16> to vector<8x32xbf16>
    %c0_2 = arith.constant 0 : index
    %c0_3 = arith.constant 0 : index
    %2 = vector.load %arg2[%c0_2, %c0_3] : memref<32x16xbf16, #tpu.memory_space<vmem>>, vector<32x16xbf16>
    %cst = arith.constant dense<0.000000e+00> : vector<8x16xf32>
    %3 = tpu.matmul %1, %2, %cst {dimension_numbers = #tpu.dot_dimension_numbers<[1], [0], [0], [1], [0, 0, 1, 1], [], []>} : vector<8x32xbf16>, vector<32x16xbf16>, vector<8x16xf32> -> vector<8x16xf32>
    %c0_4 = arith.constant 0 : index
    %c0_5 = arith.constant 0 : index
    %4 = vector.load %arg3[%c0_4, %c0_5] : memref<1x16xf32, #tpu.memory_space<vmem>>, vector<1x16xf32>
    %5 = vector.broadcast %4 : vector<1x16xf32> to vector<8x16xf32>
    %6 = arith.addf %3, %5 : vector<8x16xf32>
    %cst_6 = arith.constant dense<0xFF800000> : vector<8xf32>
    %7 = vector.multi_reduction <maximumf>, %6, %cst_6 [1] : vector<8x16xf32> to vector<8xf32>
    %8 = vector.shape_cast %7 : vector<8xf32> to vector<8x1xf32>
    %9 = vector.broadcast %8 : vector<8x1xf32> to vector<8x16xf32>
    %10 = arith.subf %6, %9 : vector<8x16xf32>
    %11 = math.exp %10 : vector<8x16xf32>
    %cst_7 = arith.constant dense<0.000000e+00> : vector<8xf32>
    %12 = vector.multi_reduction <add>, %11, %cst_7 [1] : vector<8x16xf32> to vector<8xf32>
    %13 = vector.shape_cast %12 : vector<8xf32> to vector<8x1xf32>
    %14 = vector.broadcast %13 : vector<8x1xf32> to vector<8x16xf32>
    %15 = arith.divf %11, %14 : vector<8x16xf32>
    %c0_8 = arith.constant 0 : index
    %c0_9 = arith.constant 0 : index
    %c0_10 = arith.constant 0 : index
    %16 = vector.load %arg4[%c0_8, %c0_9, %c0_10] : memref<1x8x16xf32, #tpu.memory_space<vmem>>, vector<1x8x16xf32>
    %17 = vector.shape_cast %16 : vector<1x8x16xf32> to vector<8x16xf32>
    %18 = vector.shape_cast %15 : vector<8x16xf32> to vector<1x8x16xf32>
    tpu.vector_store %arg4[%c0_8, %c0_9, %c0_10], %18 {strides = array<i32>} : memref<1x8x16xf32, #tpu.memory_space<vmem>>, vector<1x8x16xf32>,
    return
  }
  func.func @transform_0(%arg0: i32) -> (i32, i32, i32) {
    %c0_i32 = arith.constant 0 : i32
    %c0_i32_0 = arith.constant 0 : i32
    %c0_i32_1 = arith.constant 0 : i32
    return %arg0, %c0_i32, %c0_i32_0 : i32, i32, i32
  }
  func.func @transform_1(%arg0: i32) -> (i32, i32) {
    %c0_i32 = arith.constant 0 : i32
    %c0_i32_0 = arith.constant 0 : i32
    %c0_i32_1 = arith.constant 0 : i32
    return %c0_i32, %c0_i32_0 : i32, i32
  }
  func.func @transform_2(%arg0: i32) -> (i32, i32) {
    %c0_i32 = arith.constant 0 : i32
    %c0_i32_0 = arith.constant 0 : i32
    %c0_i32_1 = arith.constant 0 : i32
    return %c0_i32, %c0_i32_0 : i32, i32
  }
  func.func @transform_3(%arg0: i32) -> (i32, i32, i32) {
    %c0_i32 = arith.constant 0 : i32
    %c0_i32_0 = arith.constant 0 : i32
    %c0_i32_1 = arith.constant 0 : i32
    return %arg0, %c0_i32, %c0_i32_0 : i32, i32, i32
  }
}

module attributes {stable_mosaic.version = 11 : i64} {
  func.func @_dec_stack_kernel(%arg0: i32, %arg1: i32, %arg2: memref<1x8x32xbf16, #tpu.memory_space<vmem>>, %arg3: memref<1x8x32xbf16, #tpu.memory_space<vmem>>, %arg4: memref<1x4x32x32xbf16, #tpu.memory_space<vmem>>, %arg5: memref<1x4x1x32xf32, #tpu.memory_space<vmem>>, %arg6: memref<1x4x32x32xbf16, #tpu.memory_space<vmem>>, %arg7: memref<1x4x1x32xf32, #tpu.memory_space<vmem>>, %arg8: memref<1x4x32x32xbf16, #tpu.memory_space<vmem>>, %arg9: memref<1x4x1x32xf32, #tpu.memory_space<vmem>>, %arg10: memref<1x4x32x32xbf16, #tpu.memory_space<vmem>>, %arg11: memref<1x1x32xf32, #tpu.memory_space<vmem>>, %arg12: memref<1x1x32xf32, #tpu.memory_space<vmem>>, %arg13: memref<1x1x32xf32, #tpu.memory_space<vmem>>, %arg14: memref<1x4x32x32xbf16, #tpu.memory_space<vmem>>, %arg15: memref<1x4x1x32xf32, #tpu.memory_space<vmem>>, %arg16: memref<1x4x32x32xbf16, #tpu.memory_space<vmem>>, %arg17: memref<1x4x1x32xf32, #tpu.memory_space<vmem>>, %arg18: memref<1x4x32x32xbf16, #tpu.memory_space<vmem>>, %arg19: memref<1x4x1x32xf32, #tpu.memory_space<vmem>>, %arg20: memref<1x4x32x32xbf16, #tpu.memory_space<vmem>>, %arg21: memref<1x1x32xf32, #tpu.memory_space<vmem>>, %arg22: memref<1x1x32xf32, #tpu.memory_space<vmem>>, %arg23: memref<1x1x32xf32, #tpu.memory_space<vmem>>, %arg24: memref<1x32x64xbf16, #tpu.memory_space<vmem>>, %arg25: memref<1x1x64xf32, #tpu.memory_space<vmem>>, %arg26: memref<1x64x32xbf16, #tpu.memory_space<vmem>>, %arg27: memref<1x1x32xf32, #tpu.memory_space<vmem>>, %arg28: memref<1x1x32xf32, #tpu.memory_space<vmem>>, %arg29: memref<1x1x32xf32, #tpu.memory_space<vmem>>, %arg30: memref<1x8x32xbf16, #tpu.memory_space<vmem>>, %arg31: memref<8x32xf32, #tpu.memory_space<vmem>>) attributes {dimension_semantics = [#tpu.dimension_semantics<parallel>, #tpu.dimension_semantics<arbitrary>], iteration_bounds = array<i64: 2, 2>, scalar_prefetch = 0 : i64, scratch_operands = 1 : i64, tpu.core_type = #tpu.core_type<tc>, window_params = [{transform_indices = @transform_0, window_bounds = array<i64: 1, 8, 32>}, {transform_indices = @transform_1, window_bounds = array<i64: 1, 8, 32>}, {transform_indices = @transform_2, window_bounds = array<i64: 1, 4, 32, 32>}, {transform_indices = @transform_3, window_bounds = array<i64: 1, 4, 1, 32>}, {transform_indices = @transform_4, window_bounds = array<i64: 1, 4, 32, 32>}, {transform_indices = @transform_5, window_bounds = array<i64: 1, 4, 1, 32>}, {transform_indices = @transform_6, window_bounds = array<i64: 1, 4, 32, 32>}, {transform_indices = @transform_7, window_bounds = array<i64: 1, 4, 1, 32>}, {transform_indices = @transform_8, window_bounds = array<i64: 1, 4, 32, 32>}, {transform_indices = @transform_9, window_bounds = array<i64: 1, 1, 32>}, {transform_indices = @transform_10, window_bounds = array<i64: 1, 1, 32>}, {transform_indices = @transform_11, window_bounds = array<i64: 1, 1, 32>}, {transform_indices = @transform_12, window_bounds = array<i64: 1, 4, 32, 32>}, {transform_indices = @transform_13, window_bounds = array<i64: 1, 4, 1, 32>}, {transform_indices = @transform_14, window_bounds = array<i64: 1, 4, 32, 32>}, {transform_indices = @transform_15, window_bounds = array<i64: 1, 4, 1, 32>}, {transform_indices = @transform_16, window_bounds = array<i64: 1, 4, 32, 32>}, {transform_indices = @transform_17, window_bounds = array<i64: 1, 4, 1, 32>}, {transform_indices = @transform_18, window_bounds = array<i64: 1, 4, 32, 32>}, {transform_indices = @transform_19, window_bounds = array<i64: 1, 1, 32>}, {transform_indices = @transform_20, window_bounds = array<i64: 1, 1, 32>}, {transform_indices = @transform_21, window_bounds = array<i64: 1, 1, 32>}, {transform_indices = @transform_22, window_bounds = array<i64: 1, 32, 64>}, {transform_indices = @transform_23, window_bounds = array<i64: 1, 1, 64>}, {transform_indices = @transform_24, window_bounds = array<i64: 1, 64, 32>}, {transform_indices = @transform_25, window_bounds = array<i64: 1, 1, 32>}, {transform_indices = @transform_26, window_bounds = array<i64: 1, 1, 32>}, {transform_indices = @transform_27, window_bounds = array<i64: 1, 1, 32>}, {transform_indices = @transform_28, window_bounds = array<i64: 1, 8, 32>}]} {
    %c0_i32 = arith.constant 0 : i32
    %0 = arith.cmpi eq, %arg1, %c0_i32 : i32
    %1 = arith.extui %0 : i1 to i32
    %c0_i32_0 = arith.constant 0 : i32
    %2 = arith.cmpi ne, %1, %c0_i32_0 : i32
    scf.if %2 {
      %c0_136 = arith.constant 0 : index
      %c0_137 = arith.constant 0 : index
      %c0_138 = arith.constant 0 : index
      %217 = vector.load %arg2[%c0_136, %c0_137, %c0_138] : memref<1x8x32xbf16, #tpu.memory_space<vmem>>, vector<1x8x32xbf16>
      %218 = vector.shape_cast %217 : vector<1x8x32xbf16> to vector<8x32xbf16>
      %219 = arith.extf %218 : vector<8x32xbf16> to vector<8x32xf32>
      %c0_139 = arith.constant 0 : index
      %c0_140 = arith.constant 0 : index
      %220 = vector.load %arg31[%c0_139, %c0_140] : memref<8x32xf32, #tpu.memory_space<vmem>>, vector<8x32xf32>
      tpu.vector_store %arg31[%c0_139, %c0_140], %219 {strides = array<i32>} : memref<8x32xf32, #tpu.memory_space<vmem>>, vector<8x32xf32>,
    } else {
    }
    %c0 = arith.constant 0 : index
    %c0_1 = arith.constant 0 : index
    %3 = vector.load %arg31[%c0, %c0_1] : memref<8x32xf32, #tpu.memory_space<vmem>>, vector<8x32xf32>
    %c0_2 = arith.constant 0 : index
    %c0_3 = arith.constant 0 : index
    %c0_4 = arith.constant 0 : index
    %4 = vector.load %arg3[%c0_2, %c0_3, %c0_4] : memref<1x8x32xbf16, #tpu.memory_space<vmem>>, vector<1x8x32xbf16>
    %5 = vector.shape_cast %4 : vector<1x8x32xbf16> to vector<8x32xbf16>
    %c0_5 = arith.constant 0 : index
    %c0_6 = arith.constant 0 : index
    %c0_7 = arith.constant 0 : index
    %c0_8 = arith.constant 0 : index
    %6 = vector.load %arg4[%c0_5, %c0_6, %c0_7, %c0_8] : memref<1x4x32x32xbf16, #tpu.memory_space<vmem>>, vector<1x4x32x32xbf16>
    %7 = vector.shape_cast %6 : vector<1x4x32x32xbf16> to vector<4x32x32xbf16>
    %c0_9 = arith.constant 0 : index
    %c0_10 = arith.constant 0 : index
    %c0_11 = arith.constant 0 : index
    %c0_12 = arith.constant 0 : index
    %8 = vector.load %arg5[%c0_9, %c0_10, %c0_11, %c0_12] : memref<1x4x1x32xf32, #tpu.memory_space<vmem>>, vector<1x4x1x32xf32>
    %9 = vector.shape_cast %8 : vector<1x4x1x32xf32> to vector<4x1x32xf32>
    %c0_13 = arith.constant 0 : index
    %c0_14 = arith.constant 0 : index
    %c0_15 = arith.constant 0 : index
    %c0_16 = arith.constant 0 : index
    %10 = vector.load %arg6[%c0_13, %c0_14, %c0_15, %c0_16] : memref<1x4x32x32xbf16, #tpu.memory_space<vmem>>, vector<1x4x32x32xbf16>
    %11 = vector.shape_cast %10 : vector<1x4x32x32xbf16> to vector<4x32x32xbf16>
    %c0_17 = arith.constant 0 : index
    %c0_18 = arith.constant 0 : index
    %c0_19 = arith.constant 0 : index
    %c0_20 = arith.constant 0 : index
    %12 = vector.load %arg7[%c0_17, %c0_18, %c0_19, %c0_20] : memref<1x4x1x32xf32, #tpu.memory_space<vmem>>, vector<1x4x1x32xf32>
    %13 = vector.shape_cast %12 : vector<1x4x1x32xf32> to vector<4x1x32xf32>
    %c0_21 = arith.constant 0 : index
    %c0_22 = arith.constant 0 : index
    %c0_23 = arith.constant 0 : index
    %c0_24 = arith.constant 0 : index
    %14 = vector.load %arg8[%c0_21, %c0_22, %c0_23, %c0_24] : memref<1x4x32x32xbf16, #tpu.memory_space<vmem>>, vector<1x4x32x32xbf16>
    %15 = vector.shape_cast %14 : vector<1x4x32x32xbf16> to vector<4x32x32xbf16>
    %c0_25 = arith.constant 0 : index
    %c0_26 = arith.constant 0 : index
    %c0_27 = arith.constant 0 : index
    %c0_28 = arith.constant 0 : index
    %16 = vector.load %arg9[%c0_25, %c0_26, %c0_27, %c0_28] : memref<1x4x1x32xf32, #tpu.memory_space<vmem>>, vector<1x4x1x32xf32>
    %17 = vector.shape_cast %16 : vector<1x4x1x32xf32> to vector<4x1x32xf32>
    %c0_29 = arith.constant 0 : index
    %c0_30 = arith.constant 0 : index
    %c0_31 = arith.constant 0 : index
    %c0_32 = arith.constant 0 : index
    %18 = vector.load %arg10[%c0_29, %c0_30, %c0_31, %c0_32] : memref<1x4x32x32xbf16, #tpu.memory_space<vmem>>, vector<1x4x32x32xbf16>
    %19 = vector.shape_cast %18 : vector<1x4x32x32xbf16> to vector<4x32x32xbf16>
    %c0_33 = arith.constant 0 : index
    %c0_34 = arith.constant 0 : index
    %c0_35 = arith.constant 0 : index
    %20 = vector.load %arg11[%c0_33, %c0_34, %c0_35] : memref<1x1x32xf32, #tpu.memory_space<vmem>>, vector<1x1x32xf32>
    %21 = vector.shape_cast %20 : vector<1x1x32xf32> to vector<1x32xf32>
    %22 = arith.truncf %3 : vector<8x32xf32> to vector<8x32xbf16>
    %23 = vector.shape_cast %22 : vector<8x32xbf16> to vector<1x8x32xbf16>
    %24 = vector.shape_cast %23 : vector<1x8x32xbf16> to vector<1x8x32xbf16>
    %25 = vector.broadcast %24 : vector<1x8x32xbf16> to vector<4x8x32xbf16>
    %26 = arith.truncf %3 : vector<8x32xf32> to vector<8x32xbf16>
    %27 = vector.shape_cast %26 : vector<8x32xbf16> to vector<1x8x32xbf16>
    %28 = vector.shape_cast %27 : vector<1x8x32xbf16> to vector<1x8x32xbf16>
    %29 = vector.broadcast %28 : vector<1x8x32xbf16> to vector<4x8x32xbf16>
    "tpu.trace_start"() <{level = 10 : i32, message = "hld,hdk->hlk"}> : () -> ()
    %cst = arith.constant dense<0.000000e+00> : vector<4x8x32xf32>
    %30 = tpu.matmul %25, %7, %cst {dimension_numbers = #tpu.dot_dimension_numbers<[2], [1], [1], [2], [0, 0, 0, 1, 1, 2], [0], [0]>} : vector<4x8x32xbf16>, vector<4x32x32xbf16>, vector<4x8x32xf32> -> vector<4x8x32xf32>
    "tpu.trace_stop"() : () -> ()
    %31 = vector.broadcast %9 : vector<4x1x32xf32> to vector<4x8x32xf32>
    %32 = arith.addf %30, %31 : vector<4x8x32xf32>
    "tpu.trace_start"() <{level = 10 : i32, message = "hld,hdk->hlk"}> : () -> ()
    %cst_36 = arith.constant dense<0.000000e+00> : vector<4x8x32xf32>
    %33 = tpu.matmul %29, %11, %cst_36 {dimension_numbers = #tpu.dot_dimension_numbers<[2], [1], [1], [2], [0, 0, 0, 1, 1, 2], [0], [0]>} : vector<4x8x32xbf16>, vector<4x32x32xbf16>, vector<4x8x32xf32> -> vector<4x8x32xf32>
    "tpu.trace_stop"() : () -> ()
    %34 = vector.broadcast %13 : vector<4x1x32xf32> to vector<4x8x32xf32>
    %35 = arith.addf %33, %34 : vector<4x8x32xf32>
    "tpu.trace_start"() <{level = 10 : i32, message = "hld,hdk->hlk"}> : () -> ()
    %cst_37 = arith.constant dense<0.000000e+00> : vector<4x8x32xf32>
    %36 = tpu.matmul %29, %15, %cst_37 {dimension_numbers = #tpu.dot_dimension_numbers<[2], [1], [1], [2], [0, 0, 0, 1, 1, 2], [0], [0]>} : vector<4x8x32xbf16>, vector<4x32x32xbf16>, vector<4x8x32xf32> -> vector<4x8x32xf32>
    "tpu.trace_stop"() : () -> ()
    %37 = vector.broadcast %17 : vector<4x1x32xf32> to vector<4x8x32xf32>
    %38 = arith.addf %36, %37 : vector<4x8x32xf32>
    %39 = arith.truncf %32 : vector<4x8x32xf32> to vector<4x8x32xbf16>
    %40 = arith.truncf %35 : vector<4x8x32xf32> to vector<4x8x32xbf16>
    "tpu.trace_start"() <{level = 10 : i32, message = "hqd,hkd->hqk"}> : () -> ()
    %cst_38 = arith.constant dense<0.000000e+00> : vector<4x8x8xf32>
    %41 = tpu.matmul %39, %40, %cst_38 {dimension_numbers = #tpu.dot_dimension_numbers<[2], [2], [1], [1], [0, 0, 0, 1, 1, 1], [0], [0]>} : vector<4x8x32xbf16>, vector<4x8x32xbf16>, vector<4x8x8xf32> -> vector<4x8x8xf32>
    "tpu.trace_stop"() : () -> ()
    %42 = tpu.iota {dimensions = array<i32: 1>} : vector<1x8x8xi32>
    %43 = tpu.iota {dimensions = array<i32: 2>} : vector<1x8x8xi32>
    %44 = arith.cmpi sge, %42, %43 : vector<1x8x8xi32>
    %cst_39 = arith.constant -1.000000e+30 : f32
    %45 = vector.shape_cast %44 : vector<1x8x8xi1> to vector<1x8x8xi1>
    %46 = vector.broadcast %45 : vector<1x8x8xi1> to vector<4x8x8xi1>
    %47 = vector.broadcast %cst_39 : f32 to vector<4x8x8xf32>
    %48 = arith.select %46, %41, %47 : vector<4x8x8xi1>, vector<4x8x8xf32>
    %cst_40 = arith.constant dense<0xFF800000> : vector<4x8xf32>
    %49 = vector.multi_reduction <maximumf>, %48, %cst_40 [2] : vector<4x8x8xf32> to vector<4x8xf32>
    %50 = vector.shape_cast %49 : vector<4x8xf32> to vector<4x8x1xf32>
    %51 = vector.broadcast %50 : vector<4x8x1xf32> to vector<4x8x8xf32>
    %52 = arith.subf %48, %51 : vector<4x8x8xf32>
    %53 = math.exp %52 : vector<4x8x8xf32>
    %cst_41 = arith.constant dense<0.000000e+00> : vector<4x8xf32>
    %54 = vector.multi_reduction <add>, %53, %cst_41 [2] : vector<4x8x8xf32> to vector<4x8xf32>
    %55 = vector.shape_cast %54 : vector<4x8xf32> to vector<4x8x1xf32>
    %56 = tpu.reciprocal %55 {approx = true} : vector<4x8x1xf32> -> vector<4x8x1xf32>
    %57 = vector.broadcast %56 : vector<4x8x1xf32> to vector<4x8x8xf32>
    %58 = arith.mulf %53, %57 : vector<4x8x8xf32>
    %59 = arith.truncf %58 : vector<4x8x8xf32> to vector<4x8x8xbf16>
    %60 = arith.truncf %38 : vector<4x8x32xf32> to vector<4x8x32xbf16>
    "tpu.trace_start"() <{level = 10 : i32, message = "hqk,hkd->hqd"}> : () -> ()
    %cst_42 = arith.constant dense<0.000000e+00> : vector<4x8x32xf32>
    %61 = tpu.matmul %59, %60, %cst_42 {dimension_numbers = #tpu.dot_dimension_numbers<[2], [1], [1], [2], [0, 0, 0, 1, 1, 2], [0], [0]>} : vector<4x8x8xbf16>, vector<4x8x32xbf16>, vector<4x8x32xf32> -> vector<4x8x32xf32>
    "tpu.trace_stop"() : () -> ()
    %62 = arith.truncf %61 : vector<4x8x32xf32> to vector<4x8x32xbf16>
    "tpu.trace_start"() <{level = 10 : i32, message = "hqd,hdo->hqo"}> : () -> ()
    %cst_43 = arith.constant dense<0.000000e+00> : vector<4x8x32xf32>
    %63 = tpu.matmul %62, %19, %cst_43 {dimension_numbers = #tpu.dot_dimension_numbers<[2], [1], [1], [2], [0, 0, 0, 1, 1, 2], [0], [0]>} : vector<4x8x32xbf16>, vector<4x32x32xbf16>, vector<4x8x32xf32> -> vector<4x8x32xf32>
    "tpu.trace_stop"() : () -> ()
    %cst_44 = arith.constant dense<0.000000e+00> : vector<8x32xf32>
    %64 = vector.multi_reduction <add>, %63, %cst_44 [0] : vector<4x8x32xf32> to vector<8x32xf32>
    %65 = vector.broadcast %21 : vector<1x32xf32> to vector<8x32xf32>
    %66 = arith.addf %64, %65 : vector<8x32xf32>
    %67 = arith.addf %66, %3 : vector<8x32xf32>
    %c0_45 = arith.constant 0 : index
    %c0_46 = arith.constant 0 : index
    %c0_47 = arith.constant 0 : index
    %68 = vector.load %arg12[%c0_45, %c0_46, %c0_47] : memref<1x1x32xf32, #tpu.memory_space<vmem>>, vector<1x1x32xf32>
    %69 = vector.shape_cast %68 : vector<1x1x32xf32> to vector<1x32xf32>
    %c0_48 = arith.constant 0 : index
    %c0_49 = arith.constant 0 : index
    %c0_50 = arith.constant 0 : index
    %70 = vector.load %arg13[%c0_48, %c0_49, %c0_50] : memref<1x1x32xf32, #tpu.memory_space<vmem>>, vector<1x1x32xf32>
    %71 = vector.shape_cast %70 : vector<1x1x32xf32> to vector<1x32xf32>
    %cst_51 = arith.constant dense<0.000000e+00> : vector<8xf32>
    %72 = vector.multi_reduction <add>, %67, %cst_51 [1] : vector<8x32xf32> to vector<8xf32>
    %73 = vector.shape_cast %72 : vector<8xf32> to vector<8x1xf32>
    %cst_52 = arith.constant 3.200000e+01 : f32
    %74 = vector.broadcast %cst_52 : f32 to vector<8x1xf32>
    %75 = arith.divf %73, %74 : vector<8x1xf32>
    %76 = vector.broadcast %75 : vector<8x1xf32> to vector<8x32xf32>
    %77 = arith.subf %67, %76 : vector<8x32xf32>
    %78 = arith.mulf %77, %77 : vector<8x32xf32>
    %cst_53 = arith.constant dense<0.000000e+00> : vector<8xf32>
    %79 = vector.multi_reduction <add>, %78, %cst_53 [1] : vector<8x32xf32> to vector<8xf32>
    %80 = vector.shape_cast %79 : vector<8xf32> to vector<8x1xf32>
    %cst_54 = arith.constant 3.200000e+01 : f32
    %81 = vector.broadcast %cst_54 : f32 to vector<8x1xf32>
    %82 = arith.divf %80, %81 : vector<8x1xf32>
    %cst_55 = arith.constant 9.99999974E-6 : f32
    %83 = vector.broadcast %cst_55 : f32 to vector<8x1xf32>
    %84 = arith.addf %82, %83 : vector<8x1xf32>
    %85 = math.rsqrt %84 : vector<8x1xf32>
    %86 = vector.broadcast %85 : vector<8x1xf32> to vector<8x32xf32>
    %87 = arith.mulf %77, %86 : vector<8x32xf32>
    %88 = vector.broadcast %69 : vector<1x32xf32> to vector<8x32xf32>
    %89 = arith.mulf %87, %88 : vector<8x32xf32>
    %90 = vector.broadcast %71 : vector<1x32xf32> to vector<8x32xf32>
    %91 = arith.addf %89, %90 : vector<8x32xf32>
    %c0_56 = arith.constant 0 : index
    %c0_57 = arith.constant 0 : index
    %c0_58 = arith.constant 0 : index
    %c0_59 = arith.constant 0 : index
    %92 = vector.load %arg14[%c0_56, %c0_57, %c0_58, %c0_59] : memref<1x4x32x32xbf16, #tpu.memory_space<vmem>>, vector<1x4x32x32xbf16>
    %93 = vector.shape_cast %92 : vector<1x4x32x32xbf16> to vector<4x32x32xbf16>
    %c0_60 = arith.constant 0 : index
    %c0_61 = arith.constant 0 : index
    %c0_62 = arith.constant 0 : index
    %c0_63 = arith.constant 0 : index
    %94 = vector.load %arg15[%c0_60, %c0_61, %c0_62, %c0_63] : memref<1x4x1x32xf32, #tpu.memory_space<vmem>>, vector<1x4x1x32xf32>
    %95 = vector.shape_cast %94 : vector<1x4x1x32xf32> to vector<4x1x32xf32>
    %c0_64 = arith.constant 0 : index
    %c0_65 = arith.constant 0 : index
    %c0_66 = arith.constant 0 : index
    %c0_67 = arith.constant 0 : index
    %96 = vector.load %arg16[%c0_64, %c0_65, %c0_66, %c0_67] : memref<1x4x32x32xbf16, #tpu.memory_space<vmem>>, vector<1x4x32x32xbf16>
    %97 = vector.shape_cast %96 : vector<1x4x32x32xbf16> to vector<4x32x32xbf16>
    %c0_68 = arith.constant 0 : index
    %c0_69 = arith.constant 0 : index
    %c0_70 = arith.constant 0 : index
    %c0_71 = arith.constant 0 : index
    %98 = vector.load %arg17[%c0_68, %c0_69, %c0_70, %c0_71] : memref<1x4x1x32xf32, #tpu.memory_space<vmem>>, vector<1x4x1x32xf32>
    %99 = vector.shape_cast %98 : vector<1x4x1x32xf32> to vector<4x1x32xf32>
    %c0_72 = arith.constant 0 : index
    %c0_73 = arith.constant 0 : index
    %c0_74 = arith.constant 0 : index
    %c0_75 = arith.constant 0 : index
    %100 = vector.load %arg18[%c0_72, %c0_73, %c0_74, %c0_75] : memref<1x4x32x32xbf16, #tpu.memory_space<vmem>>, vector<1x4x32x32xbf16>
    %101 = vector.shape_cast %100 : vector<1x4x32x32xbf16> to vector<4x32x32xbf16>
    %c0_76 = arith.constant 0 : index
    %c0_77 = arith.constant 0 : index
    %c0_78 = arith.constant 0 : index
    %c0_79 = arith.constant 0 : index
    %102 = vector.load %arg19[%c0_76, %c0_77, %c0_78, %c0_79] : memref<1x4x1x32xf32, #tpu.memory_space<vmem>>, vector<1x4x1x32xf32>
    %103 = vector.shape_cast %102 : vector<1x4x1x32xf32> to vector<4x1x32xf32>
    %c0_80 = arith.constant 0 : index
    %c0_81 = arith.constant 0 : index
    %c0_82 = arith.constant 0 : index
    %c0_83 = arith.constant 0 : index
    %104 = vector.load %arg20[%c0_80, %c0_81, %c0_82, %c0_83] : memref<1x4x32x32xbf16, #tpu.memory_space<vmem>>, vector<1x4x32x32xbf16>
    %105 = vector.shape_cast %104 : vector<1x4x32x32xbf16> to vector<4x32x32xbf16>
    %c0_84 = arith.constant 0 : index
    %c0_85 = arith.constant 0 : index
    %c0_86 = arith.constant 0 : index
    %106 = vector.load %arg21[%c0_84, %c0_85, %c0_86] : memref<1x1x32xf32, #tpu.memory_space<vmem>>, vector<1x1x32xf32>
    %107 = vector.shape_cast %106 : vector<1x1x32xf32> to vector<1x32xf32>
    %108 = arith.truncf %91 : vector<8x32xf32> to vector<8x32xbf16>
    %109 = vector.shape_cast %108 : vector<8x32xbf16> to vector<1x8x32xbf16>
    %110 = vector.shape_cast %109 : vector<1x8x32xbf16> to vector<1x8x32xbf16>
    %111 = vector.broadcast %110 : vector<1x8x32xbf16> to vector<4x8x32xbf16>
    %112 = vector.shape_cast %5 : vector<8x32xbf16> to vector<1x8x32xbf16>
    %113 = vector.shape_cast %112 : vector<1x8x32xbf16> to vector<1x8x32xbf16>
    %114 = vector.broadcast %113 : vector<1x8x32xbf16> to vector<4x8x32xbf16>
    "tpu.trace_start"() <{level = 10 : i32, message = "hld,hdk->hlk"}> : () -> ()
    %cst_87 = arith.constant dense<0.000000e+00> : vector<4x8x32xf32>
    %115 = tpu.matmul %111, %93, %cst_87 {dimension_numbers = #tpu.dot_dimension_numbers<[2], [1], [1], [2], [0, 0, 0, 1, 1, 2], [0], [0]>} : vector<4x8x32xbf16>, vector<4x32x32xbf16>, vector<4x8x32xf32> -> vector<4x8x32xf32>
    "tpu.trace_stop"() : () -> ()
    %116 = vector.broadcast %95 : vector<4x1x32xf32> to vector<4x8x32xf32>
    %117 = arith.addf %115, %116 : vector<4x8x32xf32>
    "tpu.trace_start"() <{level = 10 : i32, message = "hld,hdk->hlk"}> : () -> ()
    %cst_88 = arith.constant dense<0.000000e+00> : vector<4x8x32xf32>
    %118 = tpu.matmul %114, %97, %cst_88 {dimension_numbers = #tpu.dot_dimension_numbers<[2], [1], [1], [2], [0, 0, 0, 1, 1, 2], [0], [0]>} : vector<4x8x32xbf16>, vector<4x32x32xbf16>, vector<4x8x32xf32> -> vector<4x8x32xf32>
    "tpu.trace_stop"() : () -> ()
    %119 = vector.broadcast %99 : vector<4x1x32xf32> to vector<4x8x32xf32>
    %120 = arith.addf %118, %119 : vector<4x8x32xf32>
    "tpu.trace_start"() <{level = 10 : i32, message = "hld,hdk->hlk"}> : () -> ()
    %cst_89 = arith.constant dense<0.000000e+00> : vector<4x8x32xf32>
    %121 = tpu.matmul %114, %101, %cst_89 {dimension_numbers = #tpu.dot_dimension_numbers<[2], [1], [1], [2], [0, 0, 0, 1, 1, 2], [0], [0]>} : vector<4x8x32xbf16>, vector<4x32x32xbf16>, vector<4x8x32xf32> -> vector<4x8x32xf32>
    "tpu.trace_stop"() : () -> ()
    %122 = vector.broadcast %103 : vector<4x1x32xf32> to vector<4x8x32xf32>
    %123 = arith.addf %121, %122 : vector<4x8x32xf32>
    %124 = arith.truncf %117 : vector<4x8x32xf32> to vector<4x8x32xbf16>
    %125 = arith.truncf %120 : vector<4x8x32xf32> to vector<4x8x32xbf16>
    "tpu.trace_start"() <{level = 10 : i32, message = "hqd,hkd->hqk"}> : () -> ()
    %cst_90 = arith.constant dense<0.000000e+00> : vector<4x8x8xf32>
    %126 = tpu.matmul %124, %125, %cst_90 {dimension_numbers = #tpu.dot_dimension_numbers<[2], [2], [1], [1], [0, 0, 0, 1, 1, 1], [0], [0]>} : vector<4x8x32xbf16>, vector<4x8x32xbf16>, vector<4x8x8xf32> -> vector<4x8x8xf32>
    "tpu.trace_stop"() : () -> ()
    %cst_91 = arith.constant dense<0xFF800000> : vector<4x8xf32>
    %127 = vector.multi_reduction <maximumf>, %126, %cst_91 [2] : vector<4x8x8xf32> to vector<4x8xf32>
    %128 = vector.shape_cast %127 : vector<4x8xf32> to vector<4x8x1xf32>
    %129 = vector.broadcast %128 : vector<4x8x1xf32> to vector<4x8x8xf32>
    %130 = arith.subf %126, %129 : vector<4x8x8xf32>
    %131 = math.exp %130 : vector<4x8x8xf32>
    %cst_92 = arith.constant dense<0.000000e+00> : vector<4x8xf32>
    %132 = vector.multi_reduction <add>, %131, %cst_92 [2] : vector<4x8x8xf32> to vector<4x8xf32>
    %133 = vector.shape_cast %132 : vector<4x8xf32> to vector<4x8x1xf32>
    %134 = tpu.reciprocal %133 {approx = true} : vector<4x8x1xf32> -> vector<4x8x1xf32>
    %135 = vector.broadcast %134 : vector<4x8x1xf32> to vector<4x8x8xf32>
    %136 = arith.mulf %131, %135 : vector<4x8x8xf32>
    %137 = arith.truncf %136 : vector<4x8x8xf32> to vector<4x8x8xbf16>
    %138 = arith.truncf %123 : vector<4x8x32xf32> to vector<4x8x32xbf16>
    "tpu.trace_start"() <{level = 10 : i32, message = "hqk,hkd->hqd"}> : () -> ()
    %cst_93 = arith.constant dense<0.000000e+00> : vector<4x8x32xf32>
    %139 = tpu.matmul %137, %138, %cst_93 {dimension_numbers = #tpu.dot_dimension_numbers<[2], [1], [1], [2], [0, 0, 0, 1, 1, 2], [0], [0]>} : vector<4x8x8xbf16>, vector<4x8x32xbf16>, vector<4x8x32xf32> -> vector<4x8x32xf32>
    "tpu.trace_stop"() : () -> ()
    %140 = arith.truncf %139 : vector<4x8x32xf32> to vector<4x8x32xbf16>
    "tpu.trace_start"() <{level = 10 : i32, message = "hqd,hdo->hqo"}> : () -> ()
    %cst_94 = arith.constant dense<0.000000e+00> : vector<4x8x32xf32>
    %141 = tpu.matmul %140, %105, %cst_94 {dimension_numbers = #tpu.dot_dimension_numbers<[2], [1], [1], [2], [0, 0, 0, 1, 1, 2], [0], [0]>} : vector<4x8x32xbf16>, vector<4x32x32xbf16>, vector<4x8x32xf32> -> vector<4x8x32xf32>
    "tpu.trace_stop"() : () -> ()
    %cst_95 = arith.constant dense<0.000000e+00> : vector<8x32xf32>
    %142 = vector.multi_reduction <add>, %141, %cst_95 [0] : vector<4x8x32xf32> to vector<8x32xf32>
    %143 = vector.broadcast %107 : vector<1x32xf32> to vector<8x32xf32>
    %144 = arith.addf %142, %143 : vector<8x32xf32>
    %145 = arith.addf %144, %91 : vector<8x32xf32>
    %c0_96 = arith.constant 0 : index
    %c0_97 = arith.constant 0 : index
    %c0_98 = arith.constant 0 : index
    %146 = vector.load %arg22[%c0_96, %c0_97, %c0_98] : memref<1x1x32xf32, #tpu.memory_space<vmem>>, vector<1x1x32xf32>
    %147 = vector.shape_cast %146 : vector<1x1x32xf32> to vector<1x32xf32>
    %c0_99 = arith.constant 0 : index
    %c0_100 = arith.constant 0 : index
    %c0_101 = arith.constant 0 : index
    %148 = vector.load %arg23[%c0_99, %c0_100, %c0_101] : memref<1x1x32xf32, #tpu.memory_space<vmem>>, vector<1x1x32xf32>
    %149 = vector.shape_cast %148 : vector<1x1x32xf32> to vector<1x32xf32>
    %cst_102 = arith.constant dense<0.000000e+00> : vector<8xf32>
    %150 = vector.multi_reduction <add>, %145, %cst_102 [1] : vector<8x32xf32> to vector<8xf32>
    %151 = vector.shape_cast %150 : vector<8xf32> to vector<8x1xf32>
    %cst_103 = arith.constant 3.200000e+01 : f32
    %152 = vector.broadcast %cst_103 : f32 to vector<8x1xf32>
    %153 = arith.divf %151, %152 : vector<8x1xf32>
    %154 = vector.broadcast %153 : vector<8x1xf32> to vector<8x32xf32>
    %155 = arith.subf %145, %154 : vector<8x32xf32>
    %156 = arith.mulf %155, %155 : vector<8x32xf32>
    %cst_104 = arith.constant dense<0.000000e+00> : vector<8xf32>
    %157 = vector.multi_reduction <add>, %156, %cst_104 [1] : vector<8x32xf32> to vector<8xf32>
    %158 = vector.shape_cast %157 : vector<8xf32> to vector<8x1xf32>
    %cst_105 = arith.constant 3.200000e+01 : f32
    %159 = vector.broadcast %cst_105 : f32 to vector<8x1xf32>
    %160 = arith.divf %158, %159 : vector<8x1xf32>
    %cst_106 = arith.constant 9.99999974E-6 : f32
    %161 = vector.broadcast %cst_106 : f32 to vector<8x1xf32>
    %162 = arith.addf %160, %161 : vector<8x1xf32>
    %163 = math.rsqrt %162 : vector<8x1xf32>
    %164 = vector.broadcast %163 : vector<8x1xf32> to vector<8x32xf32>
    %165 = arith.mulf %155, %164 : vector<8x32xf32>
    %166 = vector.broadcast %147 : vector<1x32xf32> to vector<8x32xf32>
    %167 = arith.mulf %165, %166 : vector<8x32xf32>
    %168 = vector.broadcast %149 : vector<1x32xf32> to vector<8x32xf32>
    %169 = arith.addf %167, %168 : vector<8x32xf32>
    %c0_107 = arith.constant 0 : index
    %c0_108 = arith.constant 0 : index
    %c0_109 = arith.constant 0 : index
    %170 = vector.load %arg24[%c0_107, %c0_108, %c0_109] : memref<1x32x64xbf16, #tpu.memory_space<vmem>>, vector<1x32x64xbf16>
    %171 = vector.shape_cast %170 : vector<1x32x64xbf16> to vector<32x64xbf16>
    %c0_110 = arith.constant 0 : index
    %c0_111 = arith.constant 0 : index
    %c0_112 = arith.constant 0 : index
    %172 = vector.load %arg25[%c0_110, %c0_111, %c0_112] : memref<1x1x64xf32, #tpu.memory_space<vmem>>, vector<1x1x64xf32>
    %173 = vector.shape_cast %172 : vector<1x1x64xf32> to vector<1x64xf32>
    %c0_113 = arith.constant 0 : index
    %c0_114 = arith.constant 0 : index
    %c0_115 = arith.constant 0 : index
    %174 = vector.load %arg26[%c0_113, %c0_114, %c0_115] : memref<1x64x32xbf16, #tpu.memory_space<vmem>>, vector<1x64x32xbf16>
    %175 = vector.shape_cast %174 : vector<1x64x32xbf16> to vector<64x32xbf16>
    %c0_116 = arith.constant 0 : index
    %c0_117 = arith.constant 0 : index
    %c0_118 = arith.constant 0 : index
    %176 = vector.load %arg27[%c0_116, %c0_117, %c0_118] : memref<1x1x32xf32, #tpu.memory_space<vmem>>, vector<1x1x32xf32>
    %177 = vector.shape_cast %176 : vector<1x1x32xf32> to vector<1x32xf32>
    %178 = arith.truncf %169 : vector<8x32xf32> to vector<8x32xbf16>
    %cst_119 = arith.constant dense<0.000000e+00> : vector<8x64xf32>
    %179 = tpu.matmul %178, %171, %cst_119 {dimension_numbers = #tpu.dot_dimension_numbers<[1], [0], [0], [1], [0, 0, 1, 1], [], []>} : vector<8x32xbf16>, vector<32x64xbf16>, vector<8x64xf32> -> vector<8x64xf32>
    %180 = vector.broadcast %173 : vector<1x64xf32> to vector<8x64xf32>
    %181 = arith.addf %179, %180 : vector<8x64xf32>
    %cst_120 = arith.constant 0.000000e+00 : f32
    %182 = vector.broadcast %cst_120 : f32 to vector<8x64xf32>
    %183 = arith.maximumf %181, %182 : vector<8x64xf32>
    %184 = arith.truncf %183 : vector<8x64xf32> to vector<8x64xbf16>
    %cst_121 = arith.constant dense<0.000000e+00> : vector<8x32xf32>
    %185 = tpu.matmul %184, %175, %cst_121 {dimension_numbers = #tpu.dot_dimension_numbers<[1], [0], [0], [1], [0, 0, 1, 1], [], []>} : vector<8x64xbf16>, vector<64x32xbf16>, vector<8x32xf32> -> vector<8x32xf32>
    %186 = vector.broadcast %177 : vector<1x32xf32> to vector<8x32xf32>
    %187 = arith.addf %185, %186 : vector<8x32xf32>
    %188 = arith.addf %187, %169 : vector<8x32xf32>
    %c0_122 = arith.constant 0 : index
    %c0_123 = arith.constant 0 : index
    %c0_124 = arith.constant 0 : index
    %189 = vector.load %arg28[%c0_122, %c0_123, %c0_124] : memref<1x1x32xf32, #tpu.memory_space<vmem>>, vector<1x1x32xf32>
    %190 = vector.shape_cast %189 : vector<1x1x32xf32> to vector<1x32xf32>
    %c0_125 = arith.constant 0 : index
    %c0_126 = arith.constant 0 : index
    %c0_127 = arith.constant 0 : index
    %191 = vector.load %arg29[%c0_125, %c0_126, %c0_127] : memref<1x1x32xf32, #tpu.memory_space<vmem>>, vector<1x1x32xf32>
    %192 = vector.shape_cast %191 : vector<1x1x32xf32> to vector<1x32xf32>
    %cst_128 = arith.constant dense<0.000000e+00> : vector<8xf32>
    %193 = vector.multi_reduction <add>, %188, %cst_128 [1] : vector<8x32xf32> to vector<8xf32>
    %194 = vector.shape_cast %193 : vector<8xf32> to vector<8x1xf32>
    %cst_129 = arith.constant 3.200000e+01 : f32
    %195 = vector.broadcast %cst_129 : f32 to vector<8x1xf32>
    %196 = arith.divf %194, %195 : vector<8x1xf32>
    %197 = vector.broadcast %196 : vector<8x1xf32> to vector<8x32xf32>
    %198 = arith.subf %188, %197 : vector<8x32xf32>
    %199 = arith.mulf %198, %198 : vector<8x32xf32>
    %cst_130 = arith.constant dense<0.000000e+00> : vector<8xf32>
    %200 = vector.multi_reduction <add>, %199, %cst_130 [1] : vector<8x32xf32> to vector<8xf32>
    %201 = vector.shape_cast %200 : vector<8xf32> to vector<8x1xf32>
    %cst_131 = arith.constant 3.200000e+01 : f32
    %202 = vector.broadcast %cst_131 : f32 to vector<8x1xf32>
    %203 = arith.divf %201, %202 : vector<8x1xf32>
    %cst_132 = arith.constant 9.99999974E-6 : f32
    %204 = vector.broadcast %cst_132 : f32 to vector<8x1xf32>
    %205 = arith.addf %203, %204 : vector<8x1xf32>
    %206 = math.rsqrt %205 : vector<8x1xf32>
    %207 = vector.broadcast %206 : vector<8x1xf32> to vector<8x32xf32>
    %208 = arith.mulf %198, %207 : vector<8x32xf32>
    %209 = vector.broadcast %190 : vector<1x32xf32> to vector<8x32xf32>
    %210 = arith.mulf %208, %209 : vector<8x32xf32>
    %211 = vector.broadcast %192 : vector<1x32xf32> to vector<8x32xf32>
    %212 = arith.addf %210, %211 : vector<8x32xf32>
    %c0_133 = arith.constant 0 : index
    %c0_134 = arith.constant 0 : index
    %213 = vector.load %arg31[%c0_133, %c0_134] : memref<8x32xf32, #tpu.memory_space<vmem>>, vector<8x32xf32>
    tpu.vector_store %arg31[%c0_133, %c0_134], %212 {strides = array<i32>} : memref<8x32xf32, #tpu.memory_space<vmem>>, vector<8x32xf32>,
    %c1_i32 = arith.constant 1 : i32
    %214 = arith.cmpi eq, %arg1, %c1_i32 : i32
    %215 = arith.extui %214 : i1 to i32
    %c0_i32_135 = arith.constant 0 : i32
    %216 = arith.cmpi ne, %215, %c0_i32_135 : i32
    scf.if %216 {
      %217 = arith.truncf %212 : vector<8x32xf32> to vector<8x32xbf16>
      %c0_136 = arith.constant 0 : index
      %c0_137 = arith.constant 0 : index
      %c0_138 = arith.constant 0 : index
      %218 = vector.load %arg30[%c0_136, %c0_137, %c0_138] : memref<1x8x32xbf16, #tpu.memory_space<vmem>>, vector<1x8x32xbf16>
      %219 = vector.shape_cast %218 : vector<1x8x32xbf16> to vector<8x32xbf16>
      %220 = vector.shape_cast %217 : vector<8x32xbf16> to vector<1x8x32xbf16>
      tpu.vector_store %arg30[%c0_136, %c0_137, %c0_138], %220 {strides = array<i32>} : memref<1x8x32xbf16, #tpu.memory_space<vmem>>, vector<1x8x32xbf16>,
    } else {
    }
    return
  }
  func.func @transform_0(%arg0: i32, %arg1: i32) -> (i32, i32, i32) {
    %c0_i32 = arith.constant 0 : i32
    %c0_i32_0 = arith.constant 0 : i32
    %c0_i32_1 = arith.constant 0 : i32
    return %arg0, %c0_i32, %c0_i32_0 : i32, i32, i32
  }
  func.func @transform_1(%arg0: i32, %arg1: i32) -> (i32, i32, i32) {
    %c0_i32 = arith.constant 0 : i32
    %c0_i32_0 = arith.constant 0 : i32
    %c0_i32_1 = arith.constant 0 : i32
    return %arg0, %c0_i32, %c0_i32_0 : i32, i32, i32
  }
  func.func @transform_2(%arg0: i32, %arg1: i32) -> (i32, i32, i32, i32) {
    %c0_i32 = arith.constant 0 : i32
    %c0_i32_0 = arith.constant 0 : i32
    %c0_i32_1 = arith.constant 0 : i32
    %c0_i32_2 = arith.constant 0 : i32
    return %arg1, %c0_i32, %c0_i32_0, %c0_i32_1 : i32, i32, i32, i32
  }
  func.func @transform_3(%arg0: i32, %arg1: i32) -> (i32, i32, i32, i32) {
    %c0_i32 = arith.constant 0 : i32
    %c0_i32_0 = arith.constant 0 : i32
    %c0_i32_1 = arith.constant 0 : i32
    %c0_i32_2 = arith.constant 0 : i32
    return %arg1, %c0_i32, %c0_i32_0, %c0_i32_1 : i32, i32, i32, i32
  }
  func.func @transform_4(%arg0: i32, %arg1: i32) -> (i32, i32, i32, i32) {
    %c0_i32 = arith.constant 0 : i32
    %c0_i32_0 = arith.constant 0 : i32
    %c0_i32_1 = arith.constant 0 : i32
    %c0_i32_2 = arith.constant 0 : i32
    return %arg1, %c0_i32, %c0_i32_0, %c0_i32_1 : i32, i32, i32, i32
  }
  func.func @transform_5(%arg0: i32, %arg1: i32) -> (i32, i32, i32, i32) {
    %c0_i32 = arith.constant 0 : i32
    %c0_i32_0 = arith.constant 0 : i32
    %c0_i32_1 = arith.constant 0 : i32
    %c0_i32_2 = arith.constant 0 : i32
    return %arg1, %c0_i32, %c0_i32_0, %c0_i32_1 : i32, i32, i32, i32
  }
  func.func @transform_6(%arg0: i32, %arg1: i32) -> (i32, i32, i32, i32) {
    %c0_i32 = arith.constant 0 : i32
    %c0_i32_0 = arith.constant 0 : i32
    %c0_i32_1 = arith.constant 0 : i32
    %c0_i32_2 = arith.constant 0 : i32
    return %arg1, %c0_i32, %c0_i32_0, %c0_i32_1 : i32, i32, i32, i32
  }
  func.func @transform_7(%arg0: i32, %arg1: i32) -> (i32, i32, i32, i32) {
    %c0_i32 = arith.constant 0 : i32
    %c0_i32_0 = arith.constant 0 : i32
    %c0_i32_1 = arith.constant 0 : i32
    %c0_i32_2 = arith.constant 0 : i32
    return %arg1, %c0_i32, %c0_i32_0, %c0_i32_1 : i32, i32, i32, i32
  }
  func.func @transform_8(%arg0: i32, %arg1: i32) -> (i32, i32, i32, i32) {
    %c0_i32 = arith.constant 0 : i32
    %c0_i32_0 = arith.constant 0 : i32
    %c0_i32_1 = arith.constant 0 : i32
    %c0_i32_2 = arith.constant 0 : i32
    return %arg1, %c0_i32, %c0_i32_0, %c0_i32_1 : i32, i32, i32, i32
  }
  func.func @transform_9(%arg0: i32, %arg1: i32) -> (i32, i32, i32) {
    %c0_i32 = arith.constant 0 : i32
    %c0_i32_0 = arith.constant 0 : i32
    %c0_i32_1 = arith.constant 0 : i32
    return %arg1, %c0_i32, %c0_i32_0 : i32, i32, i32
  }
  func.func @transform_10(%arg0: i32, %arg1: i32) -> (i32, i32, i32) {
    %c0_i32 = arith.constant 0 : i32
    %c0_i32_0 = arith.constant 0 : i32
    %c0_i32_1 = arith.constant 0 : i32
    return %arg1, %c0_i32, %c0_i32_0 : i32, i32, i32
  }
  func.func @transform_11(%arg0: i32, %arg1: i32) -> (i32, i32, i32) {
    %c0_i32 = arith.constant 0 : i32
    %c0_i32_0 = arith.constant 0 : i32
    %c0_i32_1 = arith.constant 0 : i32
    return %arg1, %c0_i32, %c0_i32_0 : i32, i32, i32
  }
  func.func @transform_12(%arg0: i32, %arg1: i32) -> (i32, i32, i32, i32) {
    %c0_i32 = arith.constant 0 : i32
    %c0_i32_0 = arith.constant 0 : i32
    %c0_i32_1 = arith.constant 0 : i32
    %c0_i32_2 = arith.constant 0 : i32
    return %arg1, %c0_i32, %c0_i32_0, %c0_i32_1 : i32, i32, i32, i32
  }
  func.func @transform_13(%arg0: i32, %arg1: i32) -> (i32, i32, i32, i32) {
    %c0_i32 = arith.constant 0 : i32
    %c0_i32_0 = arith.constant 0 : i32
    %c0_i32_1 = arith.constant 0 : i32
    %c0_i32_2 = arith.constant 0 : i32
    return %arg1, %c0_i32, %c0_i32_0, %c0_i32_1 : i32, i32, i32, i32
  }
  func.func @transform_14(%arg0: i32, %arg1: i32) -> (i32, i32, i32, i32) {
    %c0_i32 = arith.constant 0 : i32
    %c0_i32_0 = arith.constant 0 : i32
    %c0_i32_1 = arith.constant 0 : i32
    %c0_i32_2 = arith.constant 0 : i32
    return %arg1, %c0_i32, %c0_i32_0, %c0_i32_1 : i32, i32, i32, i32
  }
  func.func @transform_15(%arg0: i32, %arg1: i32) -> (i32, i32, i32, i32) {
    %c0_i32 = arith.constant 0 : i32
    %c0_i32_0 = arith.constant 0 : i32
    %c0_i32_1 = arith.constant 0 : i32
    %c0_i32_2 = arith.constant 0 : i32
    return %arg1, %c0_i32, %c0_i32_0, %c0_i32_1 : i32, i32, i32, i32
  }
  func.func @transform_16(%arg0: i32, %arg1: i32) -> (i32, i32, i32, i32) {
    %c0_i32 = arith.constant 0 : i32
    %c0_i32_0 = arith.constant 0 : i32
    %c0_i32_1 = arith.constant 0 : i32
    %c0_i32_2 = arith.constant 0 : i32
    return %arg1, %c0_i32, %c0_i32_0, %c0_i32_1 : i32, i32, i32, i32
  }
  func.func @transform_17(%arg0: i32, %arg1: i32) -> (i32, i32, i32, i32) {
    %c0_i32 = arith.constant 0 : i32
    %c0_i32_0 = arith.constant 0 : i32
    %c0_i32_1 = arith.constant 0 : i32
    %c0_i32_2 = arith.constant 0 : i32
    return %arg1, %c0_i32, %c0_i32_0, %c0_i32_1 : i32, i32, i32, i32
  }
  func.func @transform_18(%arg0: i32, %arg1: i32) -> (i32, i32, i32, i32) {
    %c0_i32 = arith.constant 0 : i32
    %c0_i32_0 = arith.constant 0 : i32
    %c0_i32_1 = arith.constant 0 : i32
    %c0_i32_2 = arith.constant 0 : i32
    return %arg1, %c0_i32, %c0_i32_0, %c0_i32_1 : i32, i32, i32, i32
  }
  func.func @transform_19(%arg0: i32, %arg1: i32) -> (i32, i32, i32) {
    %c0_i32 = arith.constant 0 : i32
    %c0_i32_0 = arith.constant 0 : i32
    %c0_i32_1 = arith.constant 0 : i32
    return %arg1, %c0_i32, %c0_i32_0 : i32, i32, i32
  }
  func.func @transform_20(%arg0: i32, %arg1: i32) -> (i32, i32, i32) {
    %c0_i32 = arith.constant 0 : i32
    %c0_i32_0 = arith.constant 0 : i32
    %c0_i32_1 = arith.constant 0 : i32
    return %arg1, %c0_i32, %c0_i32_0 : i32, i32, i32
  }
  func.func @transform_21(%arg0: i32, %arg1: i32) -> (i32, i32, i32) {
    %c0_i32 = arith.constant 0 : i32
    %c0_i32_0 = arith.constant 0 : i32
    %c0_i32_1 = arith.constant 0 : i32
    return %arg1, %c0_i32, %c0_i32_0 : i32, i32, i32
  }
  func.func @transform_22(%arg0: i32, %arg1: i32) -> (i32, i32, i32) {
    %c0_i32 = arith.constant 0 : i32
    %c0_i32_0 = arith.constant 0 : i32
    %c0_i32_1 = arith.constant 0 : i32
    return %arg1, %c0_i32, %c0_i32_0 : i32, i32, i32
  }
  func.func @transform_23(%arg0: i32, %arg1: i32) -> (i32, i32, i32) {
    %c0_i32 = arith.constant 0 : i32
    %c0_i32_0 = arith.constant 0 : i32
    %c0_i32_1 = arith.constant 0 : i32
    return %arg1, %c0_i32, %c0_i32_0 : i32, i32, i32
  }
  func.func @transform_24(%arg0: i32, %arg1: i32) -> (i32, i32, i32) {
    %c0_i32 = arith.constant 0 : i32
    %c0_i32_0 = arith.constant 0 : i32
    %c0_i32_1 = arith.constant 0 : i32
    return %arg1, %c0_i32, %c0_i32_0 : i32, i32, i32
  }
  func.func @transform_25(%arg0: i32, %arg1: i32) -> (i32, i32, i32) {
    %c0_i32 = arith.constant 0 : i32
    %c0_i32_0 = arith.constant 0 : i32
    %c0_i32_1 = arith.constant 0 : i32
    return %arg1, %c0_i32, %c0_i32_0 : i32, i32, i32
  }
  func.func @transform_26(%arg0: i32, %arg1: i32) -> (i32, i32, i32) {
    %c0_i32 = arith.constant 0 : i32
    %c0_i32_0 = arith.constant 0 : i32
    %c0_i32_1 = arith.constant 0 : i32
    return %arg1, %c0_i32, %c0_i32_0 : i32, i32, i32
  }
  func.func @transform_27(%arg0: i32, %arg1: i32) -> (i32, i32, i32) {
    %c0_i32 = arith.constant 0 : i32
    %c0_i32_0 = arith.constant 0 : i32
    %c0_i32_1 = arith.constant 0 : i32
    return %arg1, %c0_i32, %c0_i32_0 : i32, i32, i32
  }
  func.func @transform_28(%arg0: i32, %arg1: i32) -> (i32, i32, i32) {
    %c0_i32 = arith.constant 0 : i32
    %c0_i32_0 = arith.constant 0 : i32
    %c0_i32_1 = arith.constant 0 : i32
    return %arg0, %c0_i32, %c0_i32_0 : i32, i32, i32
  }
}

</mosaic_0001>

<bundles_post_ra>
// kernel: ed_transformer_forward.5
= control target key start
LH: loop header
LB: loop body
LE: loop exit
PB: predicated region body
PF: predicated region fallthrough
CT: control target
= control target key end

     0   :  { %8 = vsyncpa [#allocation3], 0  ;;  %s592_s0 = inlined_call_operand.vmem [shape: bf16[2,8,32], index: 0, kind: input, shape index: {}]   ;;  %s593_s1 = inlined_call_operand.vmem [shape: bf16[32,16], index: 1, kind: input, shape index: {}]   ;;  %s594_s2 = inlined_call_operand.vmem [shape: f32[1,16], index: 2, kind: input, shape index: {}]   ;;  %s595_s3 = inlined_call_operand.hbm [shape: f32[2,8,16], index: 3, kind: output, shape index: {}]  }
   0x1   :  { %10 = vsyncpa [#allocation3 + $0x1], 0  ;;  %s480_s12 = smov 0   ;;  %s482_s13 = smov 0  }
   0x2   :  { %s484_s14 = smov 0   ;;  %s486_s15 = smov 0  }
   0x3 LB: > { %s501_s16 = sadd.s32 4294967295, %s455_s15   ;;  %s321_s17 = sadd.s32 4294967294, %s455_s15   ;;  %s455_s15 = sphi %s486_s15, %s601_s15   ;;  %s451_s14 = sphi %s484_s14, %s600_s14   ;;  %s447_s13 = sphi %s482_s13, %s599_s13   ;;  %s443_s12 = sphi %s480_s12, %s598_s12  }
   0x4   : > { %s505_s18 = sadd.s32 1, %s455_s15   ;;  %s91_s19 = sadd.s32 1, %s451_s14 }
   0x5   : > { %s88_s20 = ssub.s32 %s455_s15, %s505_s18  ;;  %p101_p0 = scmp.ne.s32.totalorder %s451_s14, %s447_s13 }
   0x6   : > { %p89_p1 = scmp.eq.s32.totalorder %s88_s20, 0  ;;  %p102_p2 = scmp.eq.s32.totalorder %s501_s16, 1 }
   0x7   : > { %p107_p3 = scmp.ne.s32.totalorder %s447_s13, %s443_s12  ;;  %p108_p4 = scmp.eq.s32.totalorder %s321_s17, 1 }
   0x8   : > { %s516_s21 = scalar_select %p89_p1, %s451_s14, %s91_s19  }
   0x9   : > { %p518_p5 = por %p102_p2, %p101_p0  ;;  %p522_p6 = por %p108_p4, %p107_p3 }
   0xa   : > { %p324_p7 = scmp.ge.s32.totalorder %s455_s15, 1  ;;  %p139_p8 = scmp.lt.s32.totalorder %s455_s15, 3 }
   0xc   : > { %p140_p9 = pnand %p324_p7, %p139_p8 }
   0xd   : > { %v387_v0 = vld [vmem:[%s593_s1] sm:$0xff] (!%p140_p9)   ;;  %v457_v1 = vmov (!%p140_p9), 0.0   ;;  %v388_v2 = vld [vmem:[%s593_s1 + $0x8] sm:$0xff] (!%p140_p9)   ;;  %vm458_vm0 = vmmov (!%p140_p9), 0   ;;  %p162_p10 = scmp.lt.s32.totalorder (!%p140_p9), %s501_s16, 1  ;;  %vm191_vm1 = vcmask (!%p140_p9), 261120  }
   0xe   : > { %143 = sbr.rel (%p140_p9) target bundleno = 568 (0x238), region = 32  ;;  %338 = vmatprep.subr.bf16.mxu0 (!%p140_p9), %v457_v1  ;;  %342 = vmatprep.mubr.msk.bf16.mxu0 (!%p140_p9), %vm458_vm0, %v457_v1  ;;  %v327_v4 = vld [vmem:[%s594_s2] ss:$0 sm:$0xff] (!%p140_p9)  ;;  %vm235_vm2 = vcmask (!%p140_p9), 130048   ;;  %s159_s8 = sand.u32 (!%p140_p9), 1, %s447_s13  }
   0xf   : > { %339 = vmatpush3.bf16.msra.mxu0 (!%p140_p9), %v387_v0  ;;  %s325_s9 = sshll.u32 (!%p140_p9), %s159_s8, 3  ;;  %s332_s10 = sshll.u32 (!%p140_p9), %s501_s16, 7 }
  0x10   : > { %340 = vmatprep.subr.bf16.mxu0 (!%p140_p9), %v457_v1  ;;  %s161_s11 = scalar_lea.vmem (!%p140_p9), [#allocation2], %s325_s9  ;;  %s549_s24 = scalar_lea.hbm (!%p140_p9), %s595_s3, %s332_s10 }
  0x11   : > { %s262_s17 = sshll.u32 (!%p140_p9), %s161_s11, 4  ;;  %s249_s25 = scalar_lea.sflag (!%p140_p9), [#allocation3], %s159_s8  ;;  %s551_s17 = int_to_ptr.vmem [resolvable:$true] %s262_s17 }
  0x12   : > { %s393_s26 = scalar_lea.vmem (!%p140_p9), %s551_s17, 128 }
  0x13   : > { %341 = vmatpush3.bf16.msra.mxu0 (!%p140_p9), %v388_v2  ;;  %p394_p11 = scmp.ne.s32.totalorder (!%p140_p9), %s551_s17, %s393_s26 }
  0x15   : > { %s163_s28 = scalar_select %p162_p10, %s501_s16, 1 }
  0x16   : > { %p395_p12 = pnand %p394_p11, %p518_p5  ;;  %s459_s16 = smov [#allocation2]  }
  0x17   : > { %s326_s29 = sshll.u32 %s163_s28, 2  ;;  %s397_s27 = sshll.u32 %s459_s16, 4  ;;  %s398_s27 = int_to_ptr.vmem [resolvable:$false] %s397_s27 }
  0x18   : > { %s165_s5 = scalar_lea.vmem %s592_s0, %s326_s29  ;;  %p396_p13 = pneg %p395_p12 }
  0x19   : > { %v167_v3 = vld [vmem:[%s165_s5] sm:$0xf]  ;;  %s399_s28 = scalar_lea.vmem %s398_s27, 256  ;;  %p400_p0 = scmp.lt.s32.totalorder %s551_s17, %s398_s27 }
  0x1a   : > { %343 = vmatmul.mubr.msk.bf16.vlgmr.msra.gmra.mrb[0].mxu0 %vm191_vm1, %v167_v3  ;;  %p401_p1 = scmp.lt.s32.totalorder %s399_s28, %s393_s26 }
  0x1c   : > { %p402_p2 = por %p401_p1, %p400_p0 }
  0x1e   : > { %p403_p3 = pnand %p402_p2, %p396_p13 }
  0xed   : > { %v229_v5 = vpop.f32.mrb[0].mxu0 }
  0xee   : > { %v230_v6 = vadd.f32 %v327_v4, %v229_v5  ;;  %v344_v7 = vpop.f32.mrb[1].mxu0 }
  0xef   : > { %v232_v8 = vpop.f32.mrb[2].mxu0 }
  0xf0   : > { %v345_v9 = vpop.f32.mrb[3].mxu0  ;;  %v236_v10 = vsel %vm235_vm2, %v230_v6, -inf }
  0xf1   : > { %237 = vmax.xlane.f32.xlu0 %v236_v10 }
 0x17e   : > { %v238_v11 = vpop.xlane.xlu0 %237 }
 0x17f   : > { %v239_v12 = vsub.f32 %v230_v6, %v238_v11 }
 0x181   : > { %v240_v13 = vmul.f32 1.442695, %v239_v12 }
 0x183   : > { %389 = vpow2.f32 %v240_v13 }
 0x18d   : > { %v390_v14 = vpop.eup %389 }
 0x18e   : > { %v242_v15 = vsel %vm235_vm2, %v390_v14, 0.0 }
 0x18f   : > { %243 = vadd.xlane.f32.xlu0 %v242_v15 }
 0x21c   : > { %v244_v16 = vpop.xlane.xlu0 %243 }
 0x21d   : > { %391 = vrcp.f32 %v244_v16 }
 0x227   : > { %v392_v17 = vpop.eup %391 }
 0x228   : > { %v246_v18 = vmul.f32 %v392_v17, %v390_v14 }
 0x22a   : > { %247 = vst.msk [vmem:[%s161_s11] sm:$0xff] %vm235_vm2, %v246_v18 }
 0x22b   : > { %406 = shalt.err (!%p403_p3)
}
 0x22c   : > { %s407_s29 = scalar_lea.hbm %s549_s24, 128  ;;  %s411_s5 = scalar_lea.hbm %s595_s3, 256 }
 0x22d   : > { %p408_p4 = scmp.ne.s32.totalorder %s549_s24, %s407_s29  ;;  %p412_p9 = scmp.lt.u32.totalorder %s549_s24, %s595_s3 }
 0x22e   : > { %p413_p10 = scmp.lt.u32.totalorder %s411_s5, %s407_s29  ;;  %p415_p12 = scmp.lt.u32.totalorder %s407_s29, %s549_s24 }
 0x22f   : > { %p409_p7 = pnand %p408_p4, %p518_p5 }
 0x230   : > { %p414_p11 = por %p413_p10, %p412_p9 }
 0x231   : > { %p410_p8 = pneg %p409_p7 }
 0x232   : > { %p416_p13 = por %p415_p12, %p414_p11 }
 0x234   : > { %p417_p0 = pnand %p416_p13, %p410_p8 }
 0x236   : > { %420 = shalt.err (!%p417_p0)
}
 0x237   : > { %346 = dma.vmem_to_hbm [thread:$0]  (%p518_p5), %s551_s17, 128, %s549_s24, %s249_s25  }
 0x238 PF: > { %p352_p1 = scmp.ge.s32.totalorder %s455_s15, 2  ;;  %s274_s8 = sand.u32 1, %s443_s12  }
 0x239   : > { %s275_s9 = scalar_lea.sflag [#allocation3], %s274_s8 }
 0x23a   : > { %p349_p2 = pnand %p352_p1, %p522_p6 }
 0x23c   : > { %438 = dma.done.wait (!%p349_p2), %s275_s9, 128  }
 0x23d   : > { %440 = vsyncadd (!%p349_p2), %s275_s9, 4294967168  ;;  %p13_p3 = scmp.ge.s32.totalorder %s505_s18, 4   ;;  %s598_s12 = smov %s447_s13 }
 0x23e   : > { %s599_s13 = smov %s451_s14  ;;  %s600_s14 = smov %s516_s21 }
 0x23f   : > { %s601_s15 = smov %s505_s18  ;;  %15 = sbr.rel (!%p13_p3) target bundleno = 3 (0x3), region = 67 }
 0x246   :  { %280 = vsyncpa [#allocation3], 1 }
 0x247   :  { %282 = vsyncpa [#allocation3 + $0x1], 1 }

// kernel: ed_transformer_forward.3
= control target key start
LH: loop header
LB: loop body
LE: loop exit
PB: predicated region body
PF: predicated region fallthrough
CT: control target
= control target key end

     0   :  { %s4465_s0 = inlined_call_operand.vmem [shape: bf16[2,8,32], index: 0, kind: input, shape index: {}, may-alias: {0,17}]   ;;  %s4466_s1 = inlined_call_operand.vmem [shape: bf16[2,4,32,32], index: 1, kind: input, shape index: {}]   ;;  %s4467_s2 = inlined_call_operand.vmem [shape: f32[2,4,1,32], index: 2, kind: input, shape index: {}]   ;;  %s4468_s3 = inlined_call_operand.vmem [shape: bf16[2,4,32,32], index: 3, kind: input, shape index: {}]   ;;  %s4469_s4 = inlined_call_operand.vmem [shape: f32[2,4,1,32], index: 4, kind: input, shape index: {}]   ;;  %s4470_s5 = inlined_call_operand.hbm [shape: bf16[2,4,32,32], index: 5, kind: input, shape index: {}]   ;;  %s4471_s6 = inlined_call_operand.vmem [shape: f32[2,4,1,32], index: 6, kind: input, shape index: {}]   ;;  %s4472_s7 = inlined_call_operand.hbm [shape: bf16[2,4,32,32], index: 7, kind: input, shape index: {}]   ;;  %s4473_s8 = inlined_call_operand.vmem [shape: f32[2,1,32], index: 8, kind: input, shape index: {}]   ;;  %s4474_s9 = inlined_call_operand.vmem [shape: f32[2,1,32], index: 9, kind: input, shape index: {}]   ;;  %s4475_s10 = inlined_call_operand.vmem [shape: f32[2,1,32], index: 10, kind: input, shape index: {}]   ;;  %s4476_s11 = inlined_call_operand.vmem [shape: bf16[2,32,64], index: 11, kind: input, shape index: {}]   ;;  %s4477_s12 = inlined_call_operand.hbm [shape: f32[2,1,64], index: 12, kind: input, shape index: {}]   ;;  %s4478_s13 = inlined_call_operand.vmem [shape: bf16[2,64,32], index: 13, kind: input, shape index: {}]   ;;  %s4479_s14 = inlined_call_operand.hbm [shape: f32[2,1,32], index: 14, kind: input, shape index: {}]   ;;  %s4480_s15 = inlined_call_operand.hbm [shape: f32[2,1,32], index: 15, kind: input, shape index: {}]   ;;  %s4481_s16 = inlined_call_operand.hbm [shape: f32[2,1,32], index: 16, kind: input, shape index: {}]   ;;  %s4482_s17 = inlined_call_operand.vmem [shape: bf16[2,8,32], index: 17, kind: output, shape index: {}, may-alias: {0,17}]  }
   0x1   :  { %4502 = sst [smem:[#allocation27_spill]] %s4465_s0 }
   0x2   :  { %4503 = sst [smem:[#allocation28_spill]] %s4466_s1 }
   0x3   :  { %4504 = sst [smem:[#allocation29_spill]] %s4467_s2 }
   0x4   :  { %4505 = sst [smem:[#allocation30_spill]] %s4468_s3 }
   0x5   :  { %4506 = sst [smem:[#allocation31_spill]] %s4469_s4 }
   0x6   :  { %4507 = sst [smem:[#allocation32_spill]] %s4470_s5 }
   0x7   :  { %4508 = sst [smem:[#allocation33_spill]] %s4471_s6 }
   0x8   :  { %4509 = sst [smem:[#allocation34_spill]] %s4472_s7 }
   0x9   :  { %4510 = sst [smem:[#allocation35_spill]] %s4473_s8 }
   0xa   :  { %4511 = sst [smem:[#allocation36_spill]] %s4474_s9 }
   0xb   :  { %4512 = sst [smem:[#allocation37_spill]] %s4475_s10 }
   0xc   :  { %4513 = sst [smem:[#allocation38_spill]] %s4476_s11 }
   0xd   :  { %4514 = sst [smem:[#allocation39_spill]] %s4477_s12 }
   0xe   :  { %4515 = sst [smem:[#allocation40_spill]] %s4478_s13 }
   0xf   :  { %4516 = sst [smem:[#allocation41_spill]] %s4479_s14 }
  0x10   :  { %4517 = sst [smem:[#allocation42_spill]] %s4480_s15 }
  0x11   :  { %4518 = sst [smem:[#allocation43_spill]] %s4481_s16 }
  0x12   :  { %4519 = sst [smem:[#allocation44_spill]] %s4482_s17 }
  0x13   :  { %22 = vsyncpa [#allocation4], 0 }
  0x14   :  { %24 = vsyncpa [#allocation4 + $0x1], 0 }
  0x15   :  { %25 = vsyncpa [#allocation6], 0 }
  0x16   :  { %27 = vsyncpa [#allocation6 + $0x1], 0 }
  0x17   :  { %28 = vsyncpa [#allocation9], 0 }
  0x18   :  { %30 = vsyncpa [#allocation9 + $0x1], 0 }
  0x19   :  { %31 = vsyncpa [#allocation12], 0 }
  0x1a   :  { %33 = vsyncpa [#allocation12 + $0x1], 0  ;;  %s3821_s24 = smov 0   ;;  %s3823_s25 = smov 0  }
  0x1b   :  { %s3825_s26 = smov 0   ;;  %s3827_s27 = smov 0  }
  0x1c   :  { %s3829_s28 = smov 0   ;;  %s3831_s29 = smov 0  }
  0x1d   :  { %s3833_s0 = smov 0   ;;  %s3835_s30 = smov 0  }
  0x1e LB: > { %4520 = sst [smem:[#allocation17_spill]] %s3695_s25  ;;  %s4485_s18 = sadd.s32 4294967295, %s3719_s30   ;;  %s3719_s30 = sphi %s3835_s30, %s39_s30   ;;  %s3715_s0 = sphi %s3833_s0, %s4581_s0   ;;  %s3711_s29 = sphi %s3831_s29, %s4580_s29   ;;  %s3707_s28 = sphi %s3829_s28, %s4579_s28   ;;  %s3703_s27 = sphi %s3827_s27, %s4578_s27   ;;  %s3699_s26 = sphi %s3825_s26, %s4577_s26   ;;  %s3695_s25 = sphi %s3823_s25, %s4576_s25   ;;  %s3691_s24 = sphi %s3821_s24, %s4575_s24  }
  0x1f   : > { %4521 = sst [smem:[#allocation18_spill]] %s3699_s26  ;;  %s48_s19 = sadd.s32 1, %s3711_s29 }
  0x20   : > { %4522 = sst [smem:[#allocation19_spill]] %s3711_s29  ;;  %p49_p0 = scmp.ge.s32.totalorder %s48_s19, 2 }
  0x21   : > { %4523 = sst [smem:[#allocation20_spill]] %s3715_s0  ;;  %s51_s1 = sadd.s32 1, %s3715_s0 }
  0x22   : > { %4524 = sst [smem:[#allocation21_spill]] %s3719_s30  ;;  %s188_s20 = sadd.s32 1, %s3699_s26 }
  0x23   : > { %p195_p1 = scmp.ne.s32.totalorder %s3699_s26, %s3695_s25  ;;  %s4583_s19 = smov (%p49_p0, %s48_s19), 0 }
  0x24   : > { %4525 = sst [smem:[#allocation22_spill]] %s4583_s19  ;;  %s4585_s1 = smov (!%p49_p0, %s51_s1), %s3715_s0 }
  0x25   : > { %s185_s21 = ssub.s32 %s3711_s29, %s4583_s19  ;;  %p196_p2 = scmp.eq.s32.totalorder %s3719_s30, 0 }
  0x26   : > { %p53_p3 = scmp.ge.s32.totalorder %s4585_s1, 2  ;;  %p186_p4 = scmp.eq.s32.totalorder %s185_s21, 0 }
  0x27   : > { %p197_p5 = por %p196_p2, %p195_p1  ;;  %p201_p6 = scmp.ne.s32.totalorder %s3695_s25, %s3691_s24 }
  0x28   : > { %s4587_s1 = smov (%p53_p3, %s4585_s1), 0  ;;  %p202_p7 = scmp.eq.s32.totalorder %s4485_s18, 0 }
  0x29   : > { %4526 = sst [smem:[#allocation23_spill]] %s4587_s1  ;;  %p3334_p8 = scmp.lt.s32.totalorder %s3719_s30, 4 }
  0x2a   : > { %s3875_s22 = scalar_select %p186_p4, %s3699_s26, %s188_s20  }
  0x2b   : > { %s3881_s23 = sand.u32 1, %s3699_s26   ;;  %p3883_p9 = por %p202_p7, %p201_p6 }
  0x2c   : > { %4527 = sst [smem:[#allocation24_spill]] %s3875_s22  ;;  %s4487_s21 = sshll.u32 %s3881_s23, 6 }
  0x2d   : > { %s4528_s19 = scalar_select %p3883_p9, 1, 0 }
  0x2e   : > { %s4488_s0 = sshll.u32 %s3711_s29, 10  ;;  %p3889_p10 = pnand %p3334_p8, %p197_p5 }
  0x2f   : > { %s4489_s20 = sand.u32 1, %s3719_s30   ;;  %s4530_s7 = sld [smem:[#allocation34_spill]] }
  0x30   : > { %s4529_s24 = scalar_select %p3889_p10, 1, 0 }
  0x31   : > { %s606_s26 = scalar_lea.vmem [#allocation5], %s4487_s21  ;;  %s3908_s13 = scalar_lea.sflag [#allocation6], %s4489_s20 }
  0x32   : > { %s613_s17 = sshll.u32 %s606_s26, 4  ;;  %p3914_p13 = pneg %p3889_p10  ;;  %s3903_s17 = int_to_ptr.vmem [resolvable:$true] %s613_s17 }
  0x35   : > { %s3899_s22 = scalar_lea.hbm %s4530_s7, %s4488_s0  ;;  %s3466_s26 = scalar_lea.hbm %s4530_s7, 2048 }
  0x36   : > { %s3461_s11 = scalar_lea.hbm %s3899_s22, 1024  ;;  %p3467_p2 = scmp.lt.u32.totalorder %s3899_s22, %s4530_s7 }
  0x37   : > { %p3462_p12 = scmp.ne.s32.totalorder %s3899_s22, %s3461_s11  ;;  %p3468_p3 = scmp.lt.u32.totalorder %s3466_s26, %s3461_s11 }
  0x38   : > { %p3470_p5 = scmp.lt.u32.totalorder %s3461_s11, %s3899_s22 }
  0x39   : > { %p3464_p0 = pnand %p3914_p13, %p3462_p12  ;;  %p3469_p4 = por %p3468_p3, %p3467_p2 }
  0x3b   : > { %p3465_p1 = pneg %p3464_p0  ;;  %p3471_p6 = por %p3470_p5, %p3469_p4 }
  0x3d   : > { %p3472_p7 = pnand %p3471_p6, %p3465_p1 }
  0x3f   : > { %3475 = shalt.err (!%p3472_p7)
}
  0x40   : > { %s3476_s20 = scalar_lea.vmem %s3903_s17, 1024  ;;  %s3721_s21 = smov [#allocation5]  }
  0x41   : > { %p3477_p8 = scmp.ne.s32.totalorder %s3903_s17, %s3476_s20  ;;  %s3481_s1 = sshll.u32 %s3721_s21, 4  ;;  %s3482_s1 = int_to_ptr.vmem [resolvable:$false] %s3481_s1 }
  0x42   : > { %s3483_s10 = scalar_lea.vmem %s3482_s1, 2048  ;;  %p3484_p11 = scmp.lt.s32.totalorder %s3903_s17, %s3482_s1 }
  0x43   : > { %p3479_p12 = pnand %p3477_p8, %p3914_p13  ;;  %p3485_p9 = scmp.lt.s32.totalorder %s3483_s10, %s3476_s20 }
  0x45   : > { %p3480_p0 = pneg %p3479_p12  ;;  %p3486_p2 = por %p3485_p9, %p3484_p11 }
  0x47   : > { %p3487_p3 = pnand %p3486_p2, %p3480_p0 }
  0x49   : > { %3490 = shalt.err (!%p3487_p3)
}
  0x4a   : > { %s4491_s11 = smov 64   ;;  %s4492_s0 = smov 4  }
  0x4b   : > { %3321 = dma.hbm_to_vmem [thread:$0]  (!%p3889_p10), %s3899_s22, 1024, %s3903_s17, %s3908_s13, %s4491_s11, %s4491_s11, %s4492_s0  }
  0x4c   : > { %p723_p9 = scmp.lt.s32.totalorder %s3719_s30, 5  ;;  %s3943_s20 = sshll.u32 %s3711_s29, 4 }
  0x4d   : > { %p4532_p11 = scmp.ge.s32.totalorder %s3719_s30, 1  ;;  %s4534_s14 = sld [smem:[#allocation41_spill]] }
  0x4e   : > { %s677_s7 = scalar_lea.vmem [#allocation8], %s3881_s23  ;;  %s4535_s22 = sand.u32 1, %s3719_s30  }
  0x4f   : > { %p3947_p1 = pnand %p4532_p11, %p723_p9  ;;  %s684_s17 = sshll.u32 %s677_s7, 4  ;;  %s685_s17 = int_to_ptr.vmem [resolvable:$true] %s684_s17 }
  0x50   : > { %s3960_s11 = scalar_lea.sflag [#allocation9], %s4535_s22 }
  0x51   : > { %s4533_s26 = scalar_select %p3947_p1, 1, 0 }
  0x53   : > { %s3955_s10 = scalar_lea.hbm %s4534_s14, %s3943_s20  ;;  %s3496_s21 = scalar_lea.hbm %s4534_s14, 32 }
  0x54   : > { %s3491_s0 = scalar_lea.hbm %s3955_s10, 16  ;;  %p3497_p7 = scmp.lt.u32.totalorder %s3955_s10, %s4534_s14 }
  0x55   : > { %p3492_p4 = scmp.ne.s32.totalorder %s3955_s10, %s3491_s0  ;;  %p3498_p8 = scmp.lt.u32.totalorder %s3496_s21, %s3491_s0 }
  0x56   : > { %p3500_p0 = scmp.lt.u32.totalorder %s3491_s0, %s3955_s10 }
  0x57   : > { %p3494_p5 = pnand %p3492_p4, %p3914_p13  ;;  %p3499_p12 = por %p3498_p8, %p3497_p7 }
  0x59   : > { %p3495_p6 = pneg %p3494_p5  ;;  %p3501_p2 = por %p3500_p0, %p3499_p12 }
  0x5b   : > { %p3502_p3 = pnand %p3501_p2, %p3495_p6 }
  0x5d   : > { %3505 = shalt.err (!%p3502_p3)
}
  0x5e   : > { %s3506_s7 = scalar_lea.vmem %s685_s17, 16  ;;  %s3724_s22 = smov [#allocation8]  }
  0x5f   : > { %p3507_p9 = scmp.ne.s32.totalorder %s685_s17, %s3506_s7  ;;  %s3511_s4 = sshll.u32 %s3724_s22, 4  ;;  %s3512_s4 = int_to_ptr.vmem [resolvable:$false] %s3511_s4 }
  0x60   : > { %s3513_s8 = scalar_lea.vmem %s3512_s4, 32  ;;  %p3514_p5 = scmp.lt.s32.totalorder %s685_s17, %s3512_s4 }
  0x61   : > { %p3509_p11 = pnand %p3507_p9, %p3914_p13  ;;  %p3515_p1 = scmp.lt.s32.totalorder %s3513_s8, %s3506_s7 }
  0x63   : > { %p3510_p4 = pneg %p3509_p11  ;;  %p3516_p10 = por %p3515_p1, %p3514_p5 }
  0x65   : > { %p3517_p7 = pnand %p3516_p10, %p3510_p4 }
  0x67   : > { %3520 = shalt.err (!%p3517_p7)
}
  0x68   : > { %p4536_p8 = scmp.ne.s32.totalorder %s4529_s24, 0  ;;  %s4537_s6 = sshll.u32 %s3711_s29, 10 }
  0x69   : > { %s4538_s5 = sld [smem:[#allocation32_spill]]  ;;  %s4539_s4 = sshll.u32 %s3881_s23, 6 }
  0x6a   : > { %3327 = dma.hbm_to_vmem [thread:$0]  (!%p4536_p8), %s3955_s10, 16, %s685_s17, %s3960_s11  }
  0x6b   : > { %s578_s1 = scalar_lea.vmem [#allocation3], %s4539_s4  ;;  %s575_s22 = scalar_lea.sflag [#allocation4], %s3881_s23 }
  0x6c   : > { %s585_s7 = sshll.u32 %s578_s1, 4  ;;  %s3989_s7 = int_to_ptr.vmem [resolvable:$true] %s585_s7 }
  0x6f   : > { %s3985_s21 = scalar_lea.hbm %s4538_s5, %s4537_s6  ;;  %s3526_s6 = scalar_lea.hbm %s4538_s5, 2048 }
  0x70   : > { %s3521_s8 = scalar_lea.hbm %s3985_s21, 1024  ;;  %p3527_p12 = scmp.lt.u32.totalorder %s3985_s21, %s4538_s5 }
  0x71   : > { %p3522_p10 = scmp.ne.s32.totalorder %s3985_s21, %s3521_s8  ;;  %p3528_p0 = scmp.lt.u32.totalorder %s3526_s6, %s3521_s8 }
  0x72   : > { %p3530_p3 = scmp.lt.u32.totalorder %s3521_s8, %s3985_s21 }
  0x73   : > { %p3524_p1 = pnand %p3522_p10, %p3914_p13  ;;  %p3529_p2 = por %p3528_p0, %p3527_p12 }
  0x75   : > { %p3525_p6 = pneg %p3524_p1  ;;  %p3531_p9 = por %p3530_p3, %p3529_p2 }
  0x77   : > { %p3532_p11 = pnand %p3531_p9, %p3525_p6 }
  0x79   : > { %3535 = shalt.err (!%p3532_p11)
}
  0x7a   : > { %s3536_s4 = scalar_lea.vmem %s3989_s7, 1024  ;;  %s3725_s1 = smov [#allocation3]  }
  0x7b   : > { %p3537_p4 = scmp.ne.s32.totalorder %s3989_s7, %s3536_s4  ;;  %s3541_s10 = sshll.u32 %s3725_s1, 4  ;;  %s3542_s10 = int_to_ptr.vmem [resolvable:$false] %s3541_s10 }
  0x7c   : > { %s3543_s17 = scalar_lea.vmem %s3542_s10, 2048  ;;  %p3544_p10 = scmp.lt.s32.totalorder %s3989_s7, %s3542_s10 }
  0x7d   : > { %p3539_p5 = pnand %p3537_p4, %p3914_p13  ;;  %p3545_p1 = scmp.lt.s32.totalorder %s3543_s17, %s3536_s4 }
  0x7f   : > { %p3540_p7 = pneg %p3539_p5  ;;  %p3546_p12 = por %p3545_p1, %p3544_p10 }
  0x81   : > { %p3547_p0 = pnand %p3546_p12, %p3540_p7 }
  0x83   : > { %3550 = shalt.err (!%p3547_p0)
}
  0x84   : > { %s4540_s8 = smov 4   ;;  %s4541_s6 = smov 64  }
  0x85   : > { %3318 = dma.hbm_to_vmem [thread:$0]  (!%p4536_p8), %s3985_s21, 1024, %s3989_s7, %s575_s22, %s4541_s6, %s4541_s6, %s4540_s8  }
  0x86   : > { %s4542_s12 = sld [smem:[#allocation39_spill]]  ;;  %s652_s1 = scalar_lea.vmem [#allocation7], %s3881_s23 }
  0x87   : > { %s659_s10 = sshll.u32 %s652_s1, 4  ;;  %s660_s10 = int_to_ptr.vmem [resolvable:$true] %s659_s10 }
  0x8c   : > { %s4022_s4 = scalar_lea.hbm %s4542_s12, %s3943_s20  ;;  %s3556_s21 = scalar_lea.hbm %s4542_s12, 32 }
  0x8d   : > { %s3551_s17 = scalar_lea.hbm %s4022_s4, 16  ;;  %p3557_p9 = scmp.lt.u32.totalorder %s4022_s4, %s4542_s12 }
  0x8e   : > { %p3552_p6 = scmp.ne.s32.totalorder %s4022_s4, %s3551_s17  ;;  %p3558_p11 = scmp.lt.u32.totalorder %s3556_s21, %s3551_s17 }
  0x8f   : > { %p3560_p5 = scmp.lt.u32.totalorder %s3551_s17, %s4022_s4 }
  0x90   : > { %p3554_p2 = pnand %p3552_p6, %p3914_p13  ;;  %p3559_p4 = por %p3558_p11, %p3557_p9 }
  0x92   : > { %p3555_p3 = pneg %p3554_p2  ;;  %p3561_p7 = por %p3560_p5, %p3559_p4 }
  0x94   : > { %p3562_p10 = pnand %p3561_p7, %p3555_p3 }
  0x96   : > { %3565 = shalt.err (!%p3562_p10)
}
  0x97   : > { %s3566_s8 = scalar_lea.vmem %s660_s10, 16  ;;  %s3726_s6 = smov [#allocation7]  }
  0x98   : > { %p3567_p1 = scmp.ne.s32.totalorder %s660_s10, %s3566_s8  ;;  %s3571_s9 = sshll.u32 %s3726_s6, 4  ;;  %s3572_s9 = int_to_ptr.vmem [resolvable:$false] %s3571_s9 }
  0x99   : > { %s3573_s5 = scalar_lea.vmem %s3572_s9, 32  ;;  %p3574_p6 = scmp.lt.s32.totalorder %s660_s10, %s3572_s9 }
  0x9a   : > { %p3569_p12 = pnand %p3567_p1, %p3914_p13  ;;  %p3575_p2 = scmp.lt.s32.totalorder %s3573_s5, %s3566_s8 }
  0x9c   : > { %p3570_p0 = pneg %p3569_p12  ;;  %p3576_p8 = por %p3575_p2, %p3574_p6 }
  0x9e   : > { %p3577_p9 = pnand %p3576_p8, %p3570_p0 }
  0xa0   : > { %3580 = shalt.err (!%p3577_p9)
}
  0xa1   : > { %p4543_p11 = scmp.ne.s32.totalorder %s4529_s24, 0  ;;  %s4544_s15 = sld [smem:[#allocation42_spill]] }
  0xa2   : > { %s694_s17 = scalar_lea.vmem [#allocation10], %s3881_s23 }
  0xa3   : > { %3324 = dma.hbm_to_vmem [thread:$0]  (!%p4543_p11), %s4022_s4, 16, %s660_s10, %s3908_s13  }
  0xa4   : > { %s701_s21 = sshll.u32 %s694_s17, 4  ;;  %s702_s21 = int_to_ptr.vmem [resolvable:$true] %s701_s21 }
  0xa7   : > { %s4047_s1 = scalar_lea.hbm %s4544_s15, %s3943_s20  ;;  %s3586_s13 = scalar_lea.hbm %s4544_s15, 32 }
  0xa8   : > { %s3581_s7 = scalar_lea.hbm %s4047_s1, 16  ;;  %p3587_p5 = scmp.lt.u32.totalorder %s4047_s1, %s4544_s15 }
  0xa9   : > { %p3582_p8 = scmp.ne.s32.totalorder %s4047_s1, %s3581_s7  ;;  %p3588_p7 = scmp.lt.u32.totalorder %s3586_s13, %s3581_s7 }
  0xaa   : > { %p3590_p1 = scmp.lt.u32.totalorder %s3581_s7, %s4047_s1 }
  0xab   : > { %p3584_p3 = pnand %p3582_p8, %p3914_p13  ;;  %p3589_p10 = por %p3588_p7, %p3587_p5 }
  0xad   : > { %p3585_p4 = pneg %p3584_p3  ;;  %p3591_p12 = por %p3590_p1, %p3589_p10 }
  0xaf   : > { %p3592_p0 = pnand %p3591_p12, %p3585_p4 }
  0xb1   : > { %3595 = shalt.err (!%p3592_p0)
}
  0xb2   : > { %s3596_s6 = scalar_lea.vmem %s702_s21, 16  ;;  %s3727_s9 = smov [#allocation10]  }
  0xb3   : > { %p3597_p6 = scmp.ne.s32.totalorder %s702_s21, %s3596_s6  ;;  %s3601_s5 = sshll.u32 %s3727_s9, 4  ;;  %s3602_s5 = int_to_ptr.vmem [resolvable:$false] %s3601_s5 }
  0xb4   : > { %s3603_s14 = scalar_lea.vmem %s3602_s5, 32  ;;  %p3604_p8 = scmp.lt.s32.totalorder %s702_s21, %s3602_s5 }
  0xb5   : > { %p3599_p2 = pnand %p3597_p6, %p3914_p13  ;;  %p3605_p3 = scmp.lt.s32.totalorder %s3603_s14, %s3596_s6 }
  0xb7   : > { %p3600_p9 = pneg %p3599_p2  ;;  %p3606_p11 = por %p3605_p3, %p3604_p8 }
  0xb9   : > { %p3607_p5 = pnand %p3606_p11, %p3600_p9 }
  0xbb   : > { %3610 = shalt.err (!%p3607_p5)
}
  0xbc   : > { %p4545_p7 = scmp.ne.s32.totalorder %s4529_s24, 0  ;;  %s4546_s16 = sld [smem:[#allocation43_spill]] }
  0xbd   : > { %s711_s22 = scalar_lea.vmem [#allocation11], %s3881_s23  ;;  %s709_s13 = scalar_lea.sflag [#allocation12], %s3881_s23 }
  0xbe   : > { %3330 = dma.hbm_to_vmem [thread:$0]  (!%p4545_p7), %s4047_s1, 16, %s702_s21, %s3960_s11  }
  0xbf   : > { %s718_s8 = sshll.u32 %s711_s22, 4  ;;  %s719_s8 = int_to_ptr.vmem [resolvable:$true] %s718_s8 }
  0xc2   : > { %s4072_s7 = scalar_lea.hbm %s4546_s16, %s3943_s20  ;;  %s3616_s1 = scalar_lea.hbm %s4546_s16, 32 }
  0xc3   : > { %s3611_s4 = scalar_lea.hbm %s4072_s7, 16  ;;  %p3617_p1 = scmp.lt.u32.totalorder %s4072_s7, %s4546_s16 }
  0xc4   : > { %p3612_p11 = scmp.ne.s32.totalorder %s4072_s7, %s3611_s4  ;;  %p3618_p12 = scmp.lt.u32.totalorder %s3616_s1, %s3611_s4 }
  0xc5   : > { %p3620_p6 = scmp.lt.u32.totalorder %s3611_s4, %s4072_s7 }
  0xc6   : > { %p3614_p4 = pnand %p3612_p11, %p3914_p13  ;;  %p3619_p0 = por %p3618_p12, %p3617_p1 }
  0xc8   : > { %p3615_p10 = pneg %p3614_p4  ;;  %p3621_p2 = por %p3620_p6, %p3619_p0 }
  0xca   : > { %p3622_p9 = pnand %p3621_p2, %p3615_p10 }
  0xcc   : > { %3625 = shalt.err (!%p3622_p9)
}
  0xcd   : > { %s3626_s23 = scalar_lea.vmem %s719_s8, 16  ;;  %s3728_s6 = smov [#allocation11]  }
  0xce   : > { %p3627_p8 = scmp.ne.s32.totalorder %s719_s8, %s3626_s23  ;;  %s3631_s9 = sshll.u32 %s3728_s6, 4  ;;  %s3632_s9 = int_to_ptr.vmem [resolvable:$false] %s3631_s9 }
  0xcf   : > { %s3633_s5 = scalar_lea.vmem %s3632_s9, 32  ;;  %p3634_p11 = scmp.lt.s32.totalorder %s719_s8, %s3632_s9 }
  0xd0   : > { %p3629_p3 = pnand %p3627_p8, %p3914_p13  ;;  %p3635_p4 = scmp.lt.s32.totalorder %s3633_s5, %s3626_s23 }
  0xd2   : > { %p3630_p5 = pneg %p3629_p3  ;;  %p3636_p7 = por %p3635_p4, %p3634_p11 }
  0xd4   : > { %p3637_p1 = pnand %p3636_p7, %p3630_p5 }
  0xd6   : > { %3640 = shalt.err (!%p3637_p1)
}
  0xd7   : > { %p4547_p12 = scmp.ne.s32.totalorder %s4529_s24, 0  ;;  %p4548_p10 = scmp.ne.s32.totalorder %s4533_s26, 0 }
  0xd9   : > { %3333 = dma.hbm_to_vmem [thread:$0]  (!%p4547_p12), %s4072_s7, 16, %s719_s8, %s709_s13  }
  0xda   : > { %727 = sbr.rel (%p4548_p10) target bundleno = 2547 (0x9f3), region = 88 }
  0xe1   : > { %s4096_s18 = sand.u32 1, %s3695_s25   ;;  %p4550_p13 = scmp.ne.s32.totalorder %s4528_s19, 0 }
  0xe2   : > { %4549 = sst [smem:[#allocation25_spill]] %s4096_s18  ;;  %s2927_s14 = sshll.u32 %s4096_s18, 6 }
  0xe3   : > { %s730_s0 = scalar_lea.sflag [#allocation4], %s4096_s18  ;;  %s4100_s17 = scalar_lea.vmem [#allocation3], %s2927_s14 }
  0xe4   : > { %3674 = dma.done.wait (%p4550_p13), %s730_s0, 1024  }
  0xe5   : > { %3676 = vsyncadd (%p4550_p13), %s730_s0, 4294966272  ;;  %s4551_s24 = sadd.s32 4294967295, %s3719_s30   ;;  %s4108_s22 = scalar_lea.vmem [#allocation5], %s2927_s14 }
  0xe6   : > { %s738_s26 = sand.u32 1, %s4551_s24   ;;  %4552 = sst [smem:[#allocation26_spill]] %s4108_s22 }
  0xe7   : > { %s739_s7 = scalar_lea.sflag [#allocation6], %s738_s26 }
  0xe8   : > { %3678 = dma.done.wait (%p4550_p13), %s739_s7, 1040  }
  0xe9   : > { %3680 = vsyncadd (%p4550_p13), %s739_s7, 4294966256  ;;  %s756_s13 = scalar_lea.sflag [#allocation9], %s738_s26 }
  0xea   : > { %3682 = dma.done.wait (%p4550_p13), %s756_s13, 32  }
  0xeb   : > { %3684 = vsyncadd (%p4550_p13), %s756_s13, 4294967264  ;;  %s772_s11 = scalar_lea.sflag [#allocation12], %s4096_s18 }
  0xec   : > { %3686 = dma.done.wait (%p4550_p13), %s772_s11, 16  }
  0xed   : > { %3688 = vsyncadd (%p4550_p13), %s772_s11, 4294967280  ;;  %p890_p7 = scmp.lt.s32.totalorder %s3707_s28, 1  ;;  %p894_p0 = scmp.lt.s32.totalorder %s3703_s27, 1 }
  0xee   : > { %s4553_s6 = sld [smem:[#allocation27_spill]]  ;;  %s4554_s24 = sld [smem:[#allocation28_spill]] }
  0xef   : > { %s4589_s28 = smov (!%p890_p7, %s3707_s28), 1  ;;  %s4555_s2 = sld [smem:[#allocation29_spill]] }
  0xf0   : > { %s4131_s21 = scalar_select %p894_p0, %s3703_s27, 1 }
  0xf1   : > { %s2929_s20 = sshll.u32 %s4589_s28, 2  ;;  %s4556_s3 = sld [smem:[#allocation30_spill]] }
  0xf2   : > { %s3031_s5 = sshll.u32 %s4131_s21, 6  ;;  %s2932_s7 = sshll.u32 %s4131_s21, 2 }
  0xf3   : > { %s4557_s19 = sld [smem:[#allocation31_spill]]  ;;  %s4558_s0 = sld [smem:[#allocation33_spill]] }
  0xf4   : > { %s893_s9 = scalar_lea.vmem %s4553_s6, %s2929_s20  ;;  %s4140_s26 = scalar_lea.vmem %s4554_s24, %s3031_s5 }
  0xf5   : > { %s4146_s1 = scalar_lea.vmem %s4555_s2, %s2932_s7  ;;  %s4559_s13 = sld [smem:[#allocation35_spill]] }
  0xf6   : > { %s4560_s25 = sld [smem:[#allocation36_spill]]  ;;  %s3033_s8 = sshll.u32 %s4131_s21, 4 }
  0xf7   : > { %s4151_s28 = scalar_lea.vmem %s4556_s3, %s3031_s5  ;;  %s4561_s3 = sld [smem:[#allocation37_spill]] }
  0xf8   : > { %s4562_s18 = sld [smem:[#allocation38_spill]]  ;;  %s3034_s12 = sshll.u32 %s4131_s21, 5 }
  0xf9   : > { %s4156_s6 = scalar_lea.vmem %s4557_s19, %s2932_s7  ;;  %s4161_s24 = scalar_lea.vmem %s4558_s0, %s2932_s7 }
  0xfa   : > { %s4563_s0 = sld [smem:[#allocation40_spill]]  ;;  %s4564_s2 = sld [smem:[#allocation44_spill]] }
  0xfb   : > { %s918_s11 = scalar_lea.vmem %s4559_s13, %s4131_s21  ;;  %p2942_p6 = scmp.ne.s32.totalorder %s3703_s27, 0 }
  0xfc   : > { %s921_s4 = scalar_lea.vmem %s4560_s25, %s4131_s21  ;;  %v944_v0 = vld [vmem:[%s893_s9] sm:$0xf] (!%p2942_p6)  ;;  %vm946_vm0 = vcmask (!%p2942_p6), 261120  }
  0xfd   : > { %s924_s30 = scalar_lea.vmem %s4561_s3, %s4131_s21  ;;  %943 = sbr.rel (%p2942_p6) target bundleno = 260 (0x104), region = 116  ;;  %v945_v1 = vunpack.c.l.bf16 (!%p2942_p6), %v944_v0 }
  0xfe   : > { %s4179_s22 = scalar_lea.vmem %s4562_s18, %s3033_s8 }
  0xff   : > { %947 = vst.msk [vmem:[#allocation2] sm:$0xff] (!%p2942_p6), %vm946_vm0, %v945_v1 }
 0x100   : > { %s4185_s15 = scalar_lea.vmem %s4563_s0, %s3034_s12  ;;  %s4190_s25 = scalar_lea.vmem %s4564_s2, %s2929_s20 }
 0x104 PF: > { %v3403_v2 = vld [vmem:[%s4140_s26] sm:$0xff]   ;;  %v3729_v3 = vmov 0.0   ;;  %v3404_v4 = vld [vmem:[%s4140_s26 + $0x10] sm:$0xff]   ;;  %v3405_v5 = vld [vmem:[%s4140_s26 + $0x8] sm:$0xff]   ;;  %vm3730_vm1 = vmmov 0   ;;  %vm1063_vm2 = vcmask 261120  }
 0x105   : > { %3107 = vmatprep.subr.bf16.mxu0 %v3729_v3  ;;  %3115 = vmatprep.subr.bf16.mxu1 %v3729_v3  ;;  %v3406_v6 = vld [vmem:[%s4140_s26 + $0x18] sm:$0xff]   ;;  %v3407_v9 = vld [vmem:[%s4140_s26 + $0x20] sm:$0xff]   ;;  %v3408_v10 = vld [vmem:[%s4140_s26 + $0x30] sm:$0xff]   ;;  %vm1975_vm3 = vcmask 1043456   ;;  %vm1919_vm4 = vcmask 64512   ;;  %s4565_s3 = sld [smem:[#allocation26_spill]] }
 0x106   : > { %3108 = vmatpush3.bf16.msra.mxu0 %v3403_v2  ;;  %3111 = vmatprep.mubr.msk.bf16.mxu0 %vm3730_vm1, %v3729_v3  ;;  %v4205_v7 = vld [vmem:[#allocation2] sm:$0xff]  ;;  %v3409_v11 = vld [vmem:[%s4140_s26 + $0x28] sm:$0xff]   ;;  %v3410_v12 = vld [vmem:[%s4140_s26 + $0x38] sm:$0xff]   ;;  %vm2534_vm5 = vcmask 523264   ;;  %p3026_p2 = scmp.ne.s32.totalorder %s3703_s27, 1 }
 0x107   : > { %3116 = vmatpush3.bf16.msra.mxu1 %v3404_v4  ;;  %3109 = vmatprep.subr.bf16.mxu0 %v3729_v3  ;;  %v4209_v8 = vpack.c.bf16 %v4205_v7, %v4205_v7  ;;  %v3411_v13 = vld [vmem:[%s4151_s28] sm:$0xff]   ;;  %v3412_v14 = vld [vmem:[%s4151_s28 + $0x10] sm:$0xff]   ;;  %v3413_v15 = vld [vmem:[%s4151_s28 + $0x8] sm:$0xff]   ;;  %vm2614_vm6 = vcmask (!%p3026_p2), 257024  }
 0x108   : > { %3117 = vmatprep.subr.bf16.mxu1 %v3729_v3  ;;  %3119 = vmatprep.mubr.msk.bf16.mxu1 %vm3730_vm1, %v3729_v3  ;;  %v3414_v16 = vld [vmem:[%s4151_s28 + $0x18] sm:$0xff]   ;;  %v3415_v17 = vld [vmem:[%s4151_s28 + $0x20] sm:$0xff]   ;;  %v3416_v18 = vld [vmem:[%s4151_s28 + $0x30] sm:$0xff]  }
 0x109   : > { %v3417_v19 = vld [vmem:[%s4151_s28 + $0x28] sm:$0xff]   ;;  %v3418_v20 = vld [vmem:[%s4151_s28 + $0x38] sm:$0xff]   ;;  %v3421_v23 = vld [vmem:[%s4100_s17 + $0x8] sm:$0xff]  }
 0x10a   : > { %3110 = vmatpush3.bf16.msra.mxu0 %v3405_v5  ;;  %v3419_v21 = vld [vmem:[%s4100_s17] sm:$0xff]   ;;  %v3420_v22 = vld [vmem:[%s4100_s17 + $0x10] sm:$0xff]   ;;  %v3422_v24 = vld [vmem:[%s4100_s17 + $0x18] sm:$0xff]  }
 0x10b   : > { %3118 = vmatpush3.bf16.msra.mxu1 %v3406_v6  ;;  %3123 = vmatprep.subr.bf16.mxu0 %v3729_v3  ;;  %v3423_v25 = vld [vmem:[%s4100_s17 + $0x20] sm:$0xff]   ;;  %v3424_v26 = vld [vmem:[%s4100_s17 + $0x30] sm:$0xff]   ;;  %v3425_v27 = vld [vmem:[%s4100_s17 + $0x28] sm:$0xff]  }
 0x10c   : > { %3131 = vmatprep.subr.bf16.mxu1 %v3729_v3  ;;  %v3426_v28 = vld [vmem:[%s4100_s17 + $0x38] sm:$0xff]  }
 0x10d   : > { %3112 = vmatmul.mubr.msk.bf16.vlgmr.msra.gmra.mrb[0].mxu0 %vm1063_vm2, %v4209_v8  ;;  %v2959_v45 = vld [vmem:[%s4156_s6] ss:$0 sm:$0xff]  ;;  %v2960_v46 = vld [vmem:[%s4156_s6 + $0x1] ss:$0 sm:$0xff]  ;;  %v2961_v63 = vld [vmem:[%s4156_s6 + $0x2] ss:$0 sm:$0xff] }
 0x10e   : > { %3120 = vmatmul.mubr.msk.bf16.vlgmr.msra.gmra.mrb[0].mxu1 %vm1063_vm2, %v4209_v8  ;;  %3124 = vmatpush3.bf16.msra.mxu0 %v3407_v9  ;;  %v2943_v57 = vld [vmem:[%s4146_s1] ss:$0 sm:$0xff]  ;;  %v2944_v60 = vld [vmem:[%s4146_s1 + $0x1] ss:$0 sm:$0xff]  ;;  %v2962_v1 = vld [vmem:[%s4156_s6 + $0x3] ss:$0 sm:$0xff] }
 0x10f   : > { %3132 = vmatpush3.bf16.msra.mxu1 %v3408_v10  ;;  %3125 = vmatprep.subr.bf16.mxu0 %v3729_v3 }
 0x110   : > { %3133 = vmatprep.subr.bf16.mxu1 %v3729_v3  ;;  %3127 = vmatprep.mubr.msk.bf16.mxu0 %vm3730_vm1, %v3729_v3 }
 0x111   : > { %3135 = vmatprep.mubr.msk.bf16.mxu1 %vm3730_vm1, %v3729_v3 }
 0x112   : > { %3126 = vmatpush3.bf16.msra.mxu0 %v3409_v11 }
 0x113   : > { %3134 = vmatpush3.bf16.msra.mxu1 %v3410_v12  ;;  %3139 = vmatprep.subr.bf16.mxu0 %v3729_v3 }
 0x114   : > { %3147 = vmatprep.subr.bf16.mxu1 %v3729_v3 }
 0x115   : > { %3128 = vmatmul.mubr.msk.bf16.vlgmr.msra.gmra.mrb[4].mxu0 %vm1063_vm2, %v4209_v8 }
 0x116   : > { %3136 = vmatmul.mubr.msk.bf16.vlgmr.msra.gmra.mrb[4].mxu1 %vm1063_vm2, %v4209_v8  ;;  %3140 = vmatpush3.bf16.msra.mxu0 %v3411_v13 }
 0x117   : > { %3148 = vmatpush3.bf16.msra.mxu1 %v3412_v14  ;;  %3141 = vmatprep.subr.bf16.mxu0 %v3729_v3 }
 0x118   : > { %3149 = vmatprep.subr.bf16.mxu1 %v3729_v3  ;;  %3143 = vmatprep.mubr.msk.bf16.mxu0 %vm3730_vm1, %v3729_v3 }
 0x119   : > { %3151 = vmatprep.mubr.msk.bf16.mxu1 %vm3730_vm1, %v3729_v3 }
 0x11a   : > { %3142 = vmatpush3.bf16.msra.mxu0 %v3413_v15 }
 0x11b   : > { %3150 = vmatpush3.bf16.msra.mxu1 %v3414_v16  ;;  %3155 = vmatprep.subr.bf16.mxu0 %v3729_v3 }
 0x11c   : > { %3163 = vmatprep.subr.bf16.mxu1 %v3729_v3 }
 0x11d   : > { %3144 = vmatmul.mubr.msk.bf16.vlgmr.msra.gmra.mrb[8].mxu0 %vm1063_vm2, %v4209_v8 }
 0x11e   : > { %3152 = vmatmul.mubr.msk.bf16.vlgmr.msra.gmra.mrb[8].mxu1 %vm1063_vm2, %v4209_v8  ;;  %3156 = vmatpush3.bf16.msra.mxu0 %v3415_v17  ;;  %v2945_v17 = vld [vmem:[%s4146_s1 + $0x2] ss:$0 sm:$0xff] }
 0x11f   : > { %3164 = vmatpush3.bf16.msra.mxu1 %v3416_v18  ;;  %3157 = vmatprep.subr.bf16.mxu0 %v3729_v3 }
 0x120   : > { %3165 = vmatprep.subr.bf16.mxu1 %v3729_v3  ;;  %3159 = vmatprep.mubr.msk.bf16.mxu0 %vm3730_vm1, %v3729_v3 }
 0x121   : > { %3167 = vmatprep.mubr.msk.bf16.mxu1 %vm3730_vm1, %v3729_v3 }
 0x122   : > { %3158 = vmatpush3.bf16.msra.mxu0 %v3417_v19 }
 0x123   : > { %3166 = vmatpush3.bf16.msra.mxu1 %v3418_v20  ;;  %3171 = vmatprep.subr.bf16.mxu0 %v3729_v3  ;;  %v2946_v20 = vld [vmem:[%s4146_s1 + $0x3] ss:$0 sm:$0xff]  ;;  %s4567_s1 = sld [smem:[#allocation25_spill]] }
 0x124   : > { %3179 = vmatprep.subr.bf16.mxu1 %v3729_v3 }
 0x125   : > { %3160 = vmatmul.mubr.msk.bf16.vlgmr.msra.gmra.mrb[12].mxu0 %vm1063_vm2, %v4209_v8 }
 0x126   : > { %3168 = vmatmul.mubr.msk.bf16.vlgmr.msra.gmra.mrb[12].mxu1 %vm1063_vm2, %v4209_v8  ;;  %3172 = vmatpush3.bf16.msra.mxu0 %v3419_v21 }
 0x127   : > { %3173 = vmatprep.subr.bf16.mxu0 %v3729_v3  ;;  %3175 = vmatprep.mubr.msk.bf16.mxu0 %vm3730_vm1, %v3729_v3 }
 0x128   : > { %3183 = vmatprep.mubr.msk.bf16.mxu1 %vm3730_vm1, %v3729_v3  ;;  %3180 = vmatpush3.bf16.msra.mxu1 %v3420_v22 }
 0x129   : > { %3181 = vmatprep.subr.bf16.mxu1 %v3729_v3  ;;  %s4572_s21 = scalar_lea.vmem [#allocation10], %s4567_s1 }
 0x12a   : > { %3174 = vmatpush3.bf16.msra.mxu0 %v3421_v23 }
 0x12b   : > { %3187 = vmatprep.subr.bf16.mxu0 %v3729_v3 }
 0x12c   : > { %3182 = vmatpush3.bf16.msra.mxu1 %v3422_v24 }
 0x12d   : > { %3176 = vmatmul.mubr.msk.bf16.vlgmr.msra.gmra.mrb[16].mxu0 %vm1063_vm2, %v4209_v8  ;;  %3195 = vmatprep.subr.bf16.mxu1 %v3729_v3 }
 0x12e   : > { %3191 = vmatprep.mubr.msk.bf16.mxu0 %vm3730_vm1, %v3729_v3  ;;  %3188 = vmatpush3.bf16.msra.mxu0 %v3423_v25 }
 0x12f   : > { %3184 = vmatmul.mubr.msk.bf16.vlgmr.msra.gmra.mrb[16].mxu1 %vm1063_vm2, %v4209_v8  ;;  %3189 = vmatprep.subr.bf16.mxu0 %v3729_v3 }
 0x130   : > { %3196 = vmatpush3.bf16.msra.mxu1 %v3424_v26  ;;  %3199 = vmatprep.mubr.msk.bf16.mxu1 %vm3730_vm1, %v3729_v3 }
 0x131   : > { %3197 = vmatprep.subr.bf16.mxu1 %v3729_v3 }
 0x132   : > { %3190 = vmatpush3.bf16.msra.mxu0 %v3425_v27  ;;  %v2975_v27 = vld [vmem:[%s4161_s24] ss:$0 sm:$0xff] }
 0x133   : > { %3203 = vmatprep.subr.bf16.mxu0 %v3729_v3 }
 0x134   : > { %3198 = vmatpush3.bf16.msra.mxu1 %v3426_v28 }
 0x135   : > { %3209 = vmatprep.subr.bf16.mxu1 %v3729_v3  ;;  %3192 = vmatmul.mubr.msk.bf16.vlgmr.msra.gmra.mrb[20].mxu0 %vm1063_vm2, %v4209_v8 }
 0x136   : > { %3205 = vmatprep.mubr.msk.bf16.mxu0 %vm3730_vm1, %v3729_v3 }
 0x137   : > { %3200 = vmatmul.mubr.msk.bf16.vlgmr.msra.gmra.mrb[20].mxu1 %vm1063_vm2, %v4209_v8 }
 0x138   : > { %3211 = vmatprep.mubr.msk.bf16.mxu1 %vm3730_vm1, %v3729_v3 }
 0x1e0   : > { %v1101_v29 = vpop.f32.mrb[0].mxu0 }
 0x1e1   : > { %v3113_v30 = vpop.f32.mrb[1].mxu0  ;;  %v1153_v31 = vpop.f32.mrb[0].mxu1  ;;  %v1102_v0 = vadd.f32 %v2943_v57, %v1101_v29  ;;  %v2976_v29 = vld [vmem:[%s4161_s24 + $0x1] ss:$0 sm:$0xff] }
 0x1e2   : > { %v1104_v32 = vpop.f32.mrb[2].mxu0  ;;  %v3121_v33 = vpop.f32.mrb[1].mxu1  ;;  %v1154_v2 = vadd.f32 %v2944_v60, %v1153_v31 }
 0x1e3   : > { %v3114_v34 = vpop.f32.mrb[3].mxu0  ;;  %v1156_v35 = vpop.f32.mrb[2].mxu1  ;;  %v1727_v12 = vpack.c.bf16 %v1102_v0, %v1102_v0 }
 0x1e4   : > { %v3122_v36 = vpop.f32.mrb[3].mxu1  ;;  %v1728_v16 = vpack.c.bf16 %v1154_v2, %v1154_v2 }
 0x1e8   : > { %v1205_v37 = vpop.f32.mrb[4].mxu0 }
 0x1e9   : > { %v3129_v38 = vpop.f32.mrb[5].mxu0  ;;  %v1257_v39 = vpop.f32.mrb[4].mxu1  ;;  %v1206_v23 = vadd.f32 %v2945_v17, %v1205_v37 }
 0x1ea   : > { %v1208_v40 = vpop.f32.mrb[6].mxu0  ;;  %v3137_v41 = vpop.f32.mrb[5].mxu1  ;;  %v1258_v24 = vadd.f32 %v2946_v20, %v1257_v39 }
 0x1eb   : > { %v3130_v42 = vpop.f32.mrb[7].mxu0  ;;  %v1260_v43 = vpop.f32.mrb[6].mxu1  ;;  %v1729_v25 = vpack.c.bf16 %v1206_v23, %v1206_v23 }
 0x1ec   : > { %v3138_v44 = vpop.f32.mrb[7].mxu1  ;;  %v1730_v26 = vpack.c.bf16 %v1258_v24, %v1258_v24  ;;  %v2977_v43 = vld [vmem:[%s4161_s24 + $0x2] ss:$0 sm:$0xff] }
 0x1ed   : > { %v2978_v44 = vld [vmem:[%s4161_s24 + $0x3] ss:$0 sm:$0xff]  ;;  %s4570_s24 = scalar_lea.vmem [#allocation7], %s4567_s1 }
 0x1f0   : > { %v1333_v47 = vpop.f32.mrb[8].mxu0 }
 0x1f1   : > { %v1334_v48 = vadd.f32 %v2959_v45, %v1333_v47  ;;  %v1385_v49 = vpop.f32.mrb[8].mxu1  ;;  %v3145_v50 = vpop.f32.mrb[9].mxu0 }
 0x1f2   : > { %v1386_v51 = vadd.f32 %v2960_v46, %v1385_v49  ;;  %v1336_v52 = vpop.f32.mrb[10].mxu0  ;;  %v3153_v53 = vpop.f32.mrb[9].mxu1 }
 0x1f3   : > { %v1731_v54 = vpack.c.bf16 %v1334_v48, %v1334_v48  ;;  %v3146_v55 = vpop.f32.mrb[11].mxu0  ;;  %v1388_v56 = vpop.f32.mrb[10].mxu1 }
 0x1f4   : > { %v1732_v58 = vpack.c.bf16 %v1386_v51, %v1386_v51  ;;  %v3154_v59 = vpop.f32.mrb[11].mxu1 }
 0x1f5   : > { %v1739_v61 = vsel %vm1063_vm2, %v1731_v54, 0 }
 0x1f6   : > { %v1785_v62 = vsel %vm1063_vm2, %v1732_v58, 0  ;;  %3204 = vmatpush3.bf16.xpose.msra.mxu0 %v1739_v61 }
 0x1f7   : > { %3210 = vmatpush3.bf16.xpose.msra.mxu1 %v1785_v62  ;;  %3215 = vmatprep.subr.bf16.mxu0 %v3729_v3 }
 0x1f8   : > { %v1437_v4 = vpop.f32.mrb[12].mxu0  ;;  %3221 = vmatprep.subr.bf16.mxu1 %v3729_v3 }
 0x1f9   : > { %v1438_v5 = vadd.f32 %v2961_v63, %v1437_v4  ;;  %v1489_v6 = vpop.f32.mrb[12].mxu1  ;;  %v3161_v8 = vpop.f32.mrb[13].mxu0 }
 0x1fa   : > { %v1490_v9 = vadd.f32 %v2962_v1, %v1489_v6  ;;  %v1440_v10 = vpop.f32.mrb[14].mxu0  ;;  %v3169_v11 = vpop.f32.mrb[13].mxu1 }
 0x1fb   : > { %v1733_v13 = vpack.c.bf16 %v1438_v5, %v1438_v5  ;;  %v3162_v14 = vpop.f32.mrb[15].mxu0  ;;  %v1492_v15 = vpop.f32.mrb[14].mxu1 }
 0x1fc   : > { %v1734_v18 = vpack.c.bf16 %v1490_v9, %v1490_v9  ;;  %v3170_v19 = vpop.f32.mrb[15].mxu1 }
 0x1fd   : > { %v1831_v21 = vsel %vm1063_vm2, %v1733_v13, 0  ;;  %3206 = vmatmul.mubr.msk.bf16.vlgmr.msra.gmra.mrb[24].mxu0 %vm1063_vm2, %v1727_v12 }
 0x1fe   : > { %v1877_v22 = vsel %vm1063_vm2, %v1734_v18, 0  ;;  %3212 = vmatmul.mubr.msk.bf16.vlgmr.msra.gmra.mrb[24].mxu1 %vm1063_vm2, %v1728_v16  ;;  %3216 = vmatpush3.bf16.xpose.msra.mxu0 %v1831_v21 }
 0x1ff   : > { %3222 = vmatpush3.bf16.xpose.msra.mxu1 %v1877_v22  ;;  %3217 = vmatprep.mubr.msk.bf16.mxu0 %vm3730_vm1, %v3729_v3 }
 0x200   : > { %3223 = vmatprep.mubr.msk.bf16.mxu1 %vm3730_vm1, %v3729_v3  ;;  %3227 = vmatprep.subr.bf16.mxu0 %v3729_v3  ;;  %v1565_v28 = vpop.f32.mrb[16].mxu0 }
 0x201   : > { %3233 = vmatprep.subr.bf16.mxu1 %v3729_v3  ;;  %v1566_v30 = vadd.f32 %v2975_v27, %v1565_v28  ;;  %v3177_v31 = vpop.f32.mrb[17].mxu0 }
 0x202   : > { %v1568_v32 = vpop.f32.mrb[18].mxu0  ;;  %v1617_v33 = vpop.f32.mrb[16].mxu1 }
 0x203   : > { %v1968_v34 = vpack.c.bf16 %v1566_v30, %v1566_v30  ;;  %v3178_v35 = vpop.f32.mrb[19].mxu0  ;;  %v1618_v36 = vadd.f32 %v2976_v29, %v1617_v33  ;;  %v3185_v37 = vpop.f32.mrb[17].mxu1 }
 0x204   : > { %v1620_v38 = vpop.f32.mrb[18].mxu1 }
 0x205   : > { %3218 = vmatmul.mubr.msk.bf16.vlgmr.msra.gmra.mrb[28].mxu0 %vm1063_vm2, %v1729_v25  ;;  %v1977_v39 = vsel %vm1975_vm3, %v1968_v34, 0  ;;  %v1969_v40 = vpack.c.bf16 %v1618_v36, %v1618_v36  ;;  %v3186_v41 = vpop.f32.mrb[19].mxu1 }
 0x206   : > { %3224 = vmatmul.mubr.msk.bf16.vlgmr.msra.gmra.mrb[28].mxu1 %vm1063_vm2, %v1730_v26  ;;  %3229 = vmatprep.mubr.msk.bf16.mxu0 %vm3730_vm1, %v3729_v3 }
 0x207   : > { %3235 = vmatprep.mubr.msk.bf16.mxu1 %vm3730_vm1, %v3729_v3  ;;  %3228 = vmatpush3.bf16.msra.mxu0 %v1977_v39  ;;  %v2023_v42 = vsel %vm1975_vm3, %v1969_v40, 0 }
 0x208   : > { %3239 = vmatprep.subr.bf16.mxu0 %v3729_v3  ;;  %3234 = vmatpush3.bf16.msra.mxu1 %v2023_v42  ;;  %v1669_v45 = vpop.f32.mrb[20].mxu0 }
 0x209   : > { %3245 = vmatprep.subr.bf16.mxu1 %v3729_v3  ;;  %v1670_v47 = vadd.f32 %v2977_v43, %v1669_v45  ;;  %v3193_v48 = vpop.f32.mrb[21].mxu0 }
 0x20a   : > { %v1721_v46 = vpop.f32.mrb[20].mxu1  ;;  %v1672_v51 = vpop.f32.mrb[22].mxu0 }
 0x20b   : > { %v1722_v49 = vadd.f32 %v2978_v44, %v1721_v46  ;;  %v3201_v50 = vpop.f32.mrb[21].mxu1  ;;  %v1970_v53 = vpack.c.bf16 %v1670_v47, %v1670_v47  ;;  %v3194_v54 = vpop.f32.mrb[23].mxu0 }
 0x20c   : > { %v1724_v52 = vpop.f32.mrb[22].mxu1  ;;  %v3428_v54 = vld [vmem:[%s4565_s3 + $0x8] sm:$0xff]  }
 0x20d   : > { %v1971_v55 = vpack.c.bf16 %v1722_v49, %v1722_v49  ;;  %v3202_v56 = vpop.f32.mrb[23].mxu1  ;;  %v4338_v57 = vsel %vm1975_vm3, %v1970_v53, 0  ;;  %v3427_v49 = vld [vmem:[%s4565_s3] sm:$0xff]  }
 0x20e   : > { %v3430_v56 = vld [vmem:[%s4565_s3 + $0x18] sm:$0xff]  }
 0x20f   : > { %v4341_v58 = vsel %vm1975_vm3, %v1971_v55, 0  ;;  %v3429_v55 = vld [vmem:[%s4565_s3 + $0x10] sm:$0xff]  }
 0x2d0   : > { %v1775_v59 = vpop.f32.mrb[24].mxu0 }
 0x2d1   : > { %v1821_v60 = vpop.f32.mrb[24].mxu1  ;;  %v3207_v61 = vpop.f32.mrb[25].mxu0  ;;  %v1920_v62 = vsel %vm1919_vm4, %v1775_v59, -inf }
 0x2d2   : > { %v3213_v63 = vpop.f32.mrb[25].mxu1  ;;  %1921 = vmax.xlane.f32.xlu0 %v1920_v62  ;;  %v1778_v0 = vpop.f32.mrb[26].mxu0  ;;  %v1923_v5 = vsel %vm1919_vm4, %v1821_v60, -inf }
 0x2d3   : > { %v1824_v1 = vpop.f32.mrb[26].mxu1  ;;  %v3208_v2 = vpop.f32.mrb[27].mxu0  ;;  %v3432_v0 = vld [vmem:[%s4565_s3 + $0x28] sm:$0xff]  }
 0x2d4   : > { %v3214_v4 = vpop.f32.mrb[27].mxu1  ;;  %v3433_v1 = vld [vmem:[%s4565_s3 + $0x30] sm:$0xff]  }
 0x2d6   : > { %1924 = vmax.xlane.f32.xlu0 %v1923_v5 }
 0x2d8   : > { %v1867_v6 = vpop.f32.mrb[28].mxu0 }
 0x2d9   : > { %v1913_v8 = vpop.f32.mrb[28].mxu1  ;;  %v3219_v9 = vpop.f32.mrb[29].mxu0  ;;  %v1926_v10 = vsel %vm1919_vm4, %v1867_v6, -inf }
 0x2da   : > { %v3225_v11 = vpop.f32.mrb[29].mxu1  ;;  %1927 = vmax.xlane.f32.xlu1 %v1926_v10  ;;  %v1870_v12 = vpop.f32.mrb[30].mxu0  ;;  %v1929_v16 = vsel %vm1919_vm4, %v1913_v8, -inf  ;;  %v3434_v9 = vld [vmem:[%s4565_s3 + $0x38] sm:$0xff]  }
 0x2db   : > { %v1916_v13 = vpop.f32.mrb[30].mxu1  ;;  %v3220_v14 = vpop.f32.mrb[31].mxu0 }
 0x2dc   : > { %v3226_v15 = vpop.f32.mrb[31].mxu1 }
 0x2de   : > { %1930 = vmax.xlane.f32.xlu1 %v1929_v16 }
 0x35f   : > { %v1922_v17 = vpop.xlane.xlu0 %1921 }
 0x360   : > { %v1932_v18 = vsub.f32 %v1775_v59, %v1922_v17 }
 0x362   : > { %v1936_v19 = vmul.f32 1.442695, %v1932_v18 }
 0x363   : > { %v1925_v20 = vpop.xlane.xlu0 %1924 }
 0x364   : > { %3441 = vpow2.f32 %v1936_v19  ;;  %v1933_v21 = vsub.f32 %v1821_v60, %v1925_v20 }
 0x366   : > { %v1938_v22 = vmul.f32 1.442695, %v1933_v21 }
 0x367   : > { %v1928_v23 = vpop.xlane.xlu1 %1927 }
 0x368   : > { %3443 = vpow2.f32 %v1938_v22  ;;  %v1934_v24 = vsub.f32 %v1867_v6, %v1928_v23 }
 0x36a   : > { %v1940_v25 = vmul.f32 1.442695, %v1934_v24 }
 0x36b   : > { %v1931_v26 = vpop.xlane.xlu1 %1930 }
 0x36c   : > { %3445 = vpow2.f32 %v1940_v25  ;;  %v1935_v27 = vsub.f32 %v1913_v8, %v1931_v26 }
 0x36e   : > { %v3442_v28 = vpop.eup %3441  ;;  %v1942_v29 = vmul.f32 1.442695, %v1935_v27 }
 0x36f   : > { %v1944_v30 = vsel %vm1919_vm4, %v3442_v28, 0.0 }
 0x370   : > { %3447 = vpow2.f32 %v1942_v29  ;;  %1945 = vadd.xlane.f32.xlu0 %v1944_v30 }
 0x372   : > { %v3444_v31 = vpop.eup %3443 }
 0x373   : > { %v1947_v32 = vsel %vm1919_vm4, %v3444_v31, 0.0 }
 0x374   : > { %1948 = vadd.xlane.f32.xlu1 %v1947_v32 }
 0x376   : > { %v3446_v33 = vpop.eup %3445 }
 0x377   : > { %v1950_v34 = vsel %vm1919_vm4, %v3446_v33, 0.0 }
 0x378   : > { %1951 = vadd.xlane.f32.xlu0 %v1950_v34 }
 0x37a   : > { %v3448_v35 = vpop.eup %3447 }
 0x37b   : > { %v1953_v36 = vsel %vm1919_vm4, %v3448_v35, 0.0 }
 0x37c   : > { %1954 = vadd.xlane.f32.xlu1 %v1953_v36 }
 0x3fd   : > { %v1946_v37 = vpop.xlane.xlu0 %1945 }
 0x3fe   : > { %3449 = vrcp.f32 %v1946_v37  ;;  %v3011_v37 = vld [vmem:[%s918_s11] ss:$0 sm:$0xff]  ;;  %s4573_s11 = scalar_lea.vmem [#allocation11], %s4567_s1 }
 0x401   : > { %v1949_v38 = vpop.xlane.xlu1 %1948 }
 0x402   : > { %3451 = vrcp.f32 %v1949_v38 }
 0x405   : > { %v1952_v39 = vpop.xlane.xlu0 %1951 }
 0x406   : > { %3453 = vrcp.f32 %v1952_v39 }
 0x408   : > { %v3450_v40 = vpop.eup %3449 }
 0x409   : > { %v1960_v41 = vmul.f32 %v3450_v40, %v3442_v28  ;;  %v1955_v42 = vpop.xlane.xlu1 %1954 }
 0x40a   : > { %3455 = vrcp.f32 %v1955_v42 }
 0x40b   : > { %v1964_v43 = vpack.c.bf16 %v1960_v41, %v1960_v41 }
 0x40c   : > { %v3452_v44 = vpop.eup %3451 }
 0x40d   : > { %v1961_v45 = vmul.f32 %v3452_v44, %v3444_v31  ;;  %3230 = vmatmul.mubr.msk.bf16.vlgmr.msra.gmra.mrb[32].mxu0 %vm1919_vm4, %v1964_v43 }
 0x40e   : > { %3240 = vmatpush3.bf16.msra.mxu0 %v4338_v57  ;;  %3241 = vmatprep.mubr.msk.bf16.mxu0 %vm3730_vm1, %v3729_v3 }
 0x40f   : > { %v1965_v46 = vpack.c.bf16 %v1961_v45, %v1961_v45  ;;  %3251 = vmatprep.subr.bf16.mxu0 %v3729_v3 }
 0x410   : > { %v3454_v47 = vpop.eup %3453 }
 0x411   : > { %v1962_v48 = vmul.f32 %v3454_v47, %v3446_v33  ;;  %3236 = vmatmul.mubr.msk.bf16.vlgmr.msra.gmra.mrb[32].mxu1 %vm1919_vm4, %v1965_v46 }
 0x412   : > { %3246 = vmatpush3.bf16.msra.mxu1 %v4341_v58  ;;  %3247 = vmatprep.mubr.msk.bf16.mxu1 %vm3730_vm1, %v3729_v3  ;;  %v3431_v58 = vld [vmem:[%s4565_s3 + $0x20] sm:$0xff]  }
 0x413   : > { %v1966_v50 = vpack.c.bf16 %v1962_v48, %v1962_v48  ;;  %3259 = vmatprep.subr.bf16.mxu1 %v3729_v3 }
 0x414   : > { %v3456_v51 = vpop.eup %3455 }
 0x415   : > { %v1963_v52 = vmul.f32 %v3456_v51, %v3448_v35  ;;  %3242 = vmatmul.mubr.msk.bf16.vlgmr.msra.gmra.mrb[36].mxu0 %vm1919_vm4, %v1966_v50  ;;  %v3435_v51 = vld [vmem:[%s4179_s22] sm:$0xff]  }
 0x416   : > { %3252 = vmatpush3.bf16.msra.mxu0 %v3427_v49  ;;  %3255 = vmatprep.mubr.msk.bf16.mxu0 %vm3730_vm1, %v3729_v3 }
 0x417   : > { %v1967_v53 = vpack.c.bf16 %v1963_v52, %v1963_v52  ;;  %3253 = vmatprep.subr.bf16.mxu0 %v3729_v3  ;;  %v3436_v52 = vld [vmem:[%s4179_s22 + $0x8] sm:$0xff]  }
 0x419   : > { %3248 = vmatmul.mubr.msk.bf16.vlgmr.msra.gmra.mrb[36].mxu1 %vm1919_vm4, %v1967_v53  ;;  %v3438_v53 = vld [vmem:[%s4185_s15 + $0x8] sm:$0xff]  }
 0x41a   : > { %3263 = vmatprep.mubr.msk.bf16.mxu1 %vm3730_vm1, %v3729_v3  ;;  %3254 = vmatpush3.bf16.msra.mxu0 %v3428_v54 }
 0x41b   : > { %3260 = vmatpush3.bf16.msra.mxu1 %v3429_v55  ;;  %3267 = vmatprep.subr.bf16.mxu0 %v3729_v3 }
 0x41c   : > { %3261 = vmatprep.subr.bf16.mxu1 %v3729_v3 }
 0x41f   : > { %3262 = vmatpush3.bf16.msra.mxu1 %v3430_v56 }
 0x420   : > { %3275 = vmatprep.subr.bf16.mxu1 %v3729_v3 }
 0x4e0   : > { %v2013_v57 = vpop.f32.mrb[32].mxu0 }
 0x4e1   : > { %v2157_v59 = vpack.c.bf16 %v2013_v57, %v2013_v57  ;;  %v3231_v60 = vpop.f32.mrb[33].mxu0 }
 0x4e2   : > { %v2016_v61 = vpop.f32.mrb[34].mxu0  ;;  %v3013_v60 = vld [vmem:[%s924_s30] ss:$0 sm:$0xff]  ;;  %s4571_s30 = scalar_lea.vmem [#allocation8], %s4567_s1 }
 0x4e3   : > { %v3232_v62 = vpop.f32.mrb[35].mxu0  ;;  %3256 = vmatmul.mubr.msk.bf16.vlgmr.msra.gmra.mrb[40].mxu0 %vm1063_vm2, %v2157_v59 }
 0x4e4   : > { %v2059_v63 = vpop.f32.mrb[32].mxu1  ;;  %3268 = vmatpush3.bf16.msra.mxu0 %v3431_v58  ;;  %3271 = vmatprep.mubr.msk.bf16.mxu0 %vm3730_vm1, %v3729_v3  ;;  %v3012_v58 = vld [vmem:[%s921_s4] ss:$0 sm:$0xff] }
 0x4e5   : > { %v2158_v2 = vpack.c.bf16 %v2059_v63, %v2059_v63  ;;  %v3237_v4 = vpop.f32.mrb[33].mxu1  ;;  %3269 = vmatprep.subr.bf16.mxu0 %v3729_v3 }
 0x4e6   : > { %v2062_v5 = vpop.f32.mrb[34].mxu1 }
 0x4e7   : > { %v3238_v6 = vpop.f32.mrb[35].mxu1  ;;  %3264 = vmatmul.mubr.msk.bf16.vlgmr.msra.gmra.mrb[40].mxu1 %vm1063_vm2, %v2158_v2  ;;  %v3014_v2 = vld [vmem:[%s4570_s24] ss:$0 sm:$0xff] }
 0x4e8   : > { %v2105_v8 = vpop.f32.mrb[36].mxu0  ;;  %3270 = vmatpush3.bf16.msra.mxu0 %v3432_v0  ;;  %3276 = vmatpush3.bf16.msra.mxu1 %v3433_v1  ;;  %v3439_v0 = vld [vmem:[%s4185_s15 + $0x10] sm:$0xff]   ;;  %v3440_v1 = vld [vmem:[%s4185_s15 + $0x18] sm:$0xff]  }
 0x4e9   : > { %v2159_v10 = vpack.c.bf16 %v2105_v8, %v2105_v8  ;;  %v3243_v11 = vpop.f32.mrb[37].mxu0  ;;  %3277 = vmatprep.subr.bf16.mxu1 %v3729_v3  ;;  %3279 = vmatprep.mubr.msk.bf16.mxu1 %vm3730_vm1, %v3729_v3 }
 0x4ea   : > { %v2108_v12 = vpop.f32.mrb[38].mxu0  ;;  %3283 = vmatprep.subr.bf16.mxu0 %v3729_v3 }
 0x4eb   : > { %v3244_v13 = vpop.f32.mrb[39].mxu0  ;;  %3272 = vmatmul.mubr.msk.bf16.vlgmr.msra.gmra.mrb[44].mxu0 %vm1063_vm2, %v2159_v10  ;;  %v3018_v12 = vld [vmem:[%s4571_s30] ss:$0 sm:$0xff] }
 0x4ec   : > { %v2151_v14 = vpop.f32.mrb[36].mxu1  ;;  %3278 = vmatpush3.bf16.msra.mxu1 %v3434_v9  ;;  %3287 = vmatprep.mubr.msk.bf16.mxu0 %vm3730_vm1, %v3729_v3 }
 0x4ed   : > { %v2160_v15 = vpack.c.bf16 %v2151_v14, %v2151_v14  ;;  %v3249_v16 = vpop.f32.mrb[37].mxu1  ;;  %3291 = vmatprep.subr.bf16.mxu1 %v3729_v3  ;;  %3284 = vmatpush3.bf16.msra.mxu0 %v3435_v51 }
 0x4ee   : > { %v2154_v17 = vpop.f32.mrb[38].mxu1  ;;  %3285 = vmatprep.subr.bf16.mxu0 %v3729_v3 }
 0x4ef   : > { %v3250_v18 = vpop.f32.mrb[39].mxu1  ;;  %3280 = vmatmul.mubr.msk.bf16.vlgmr.msra.gmra.mrb[44].mxu1 %vm1063_vm2, %v2160_v15 }
 0x4f0   : > { %3299 = vmatprep.mubr.msk.bf16.mxu1 %vm3730_vm1, %v3729_v3 }
 0x4f1   : > { %3286 = vmatpush3.bf16.msra.mxu0 %v3436_v52 }
 0x5b6   : > { %v2210_v19 = vpop.f32.mrb[40].mxu0 }
 0x5b7   : > { %v3257_v20 = vpop.f32.mrb[41].mxu0  ;;  %v2381_v24 = vsel %vm1063_vm2, %v2210_v19, 0.0 }
 0x5b8   : > { %v2213_v21 = vpop.f32.mrb[42].mxu0 }
 0x5b9   : > { %v3258_v22 = vpop.f32.mrb[43].mxu0 }
 0x5ba   : > { %v2265_v23 = vpop.f32.mrb[40].mxu1 }
 0x5bb   : > { %v2382_v25 = vsel %vm1063_vm2, %v2265_v23, 0.0  ;;  %v3265_v26 = vpop.f32.mrb[41].mxu1 }
 0x5bc   : > { %v2383_v27 = vadd.f32 %v2382_v25, %v2381_v24  ;;  %v2268_v28 = vpop.f32.mrb[42].mxu1 }
 0x5bd   : > { %v3266_v29 = vpop.f32.mrb[43].mxu1  ;;  %v3024_v28 = vld [vmem:[%s4572_s21] ss:$0 sm:$0xff] }
 0x5be   : > { %v2320_v30 = vpop.f32.mrb[44].mxu0 }
 0x5bf   : > { %v2384_v31 = vsel %vm1063_vm2, %v2320_v30, 0.0  ;;  %v3273_v32 = vpop.f32.mrb[45].mxu0  ;;  %v3025_v30 = vld [vmem:[%s4573_s11] ss:$0 sm:$0xff] }
 0x5c0   : > { %v2385_v33 = vadd.f32 %v2384_v31, %v2383_v27  ;;  %v2323_v34 = vpop.f32.mrb[46].mxu0 }
 0x5c1   : > { %v3274_v35 = vpop.f32.mrb[47].mxu0 }
 0x5c2   : > { %v2375_v36 = vpop.f32.mrb[44].mxu1 }
 0x5c3   : > { %v2386_v38 = vsel %vm1063_vm2, %v2375_v36, 0.0  ;;  %v3281_v39 = vpop.f32.mrb[45].mxu1 }
 0x5c4   : > { %v2387_v40 = vadd.f32 %v2386_v38, %v2385_v33  ;;  %v2378_v41 = vpop.f32.mrb[46].mxu1 }
 0x5c5   : > { %v3282_v42 = vpop.f32.mrb[47].mxu1 }
 0x5c6   : > { %v2394_v43 = vadd.f32 %v3011_v37, %v2387_v40 }
 0x5c8   : > { %v2395_v44 = vadd.f32 %v2394_v43, %v4205_v7  ;;  %v3437_v7 = vld [vmem:[%s4185_s15] sm:$0xff]  }
 0x5c9   : > { %3292 = vmatpush3.bf16.msra.mxu1 %v3437_v7 }
 0x5ca   : > { %v2398_v45 = vsel %vm1063_vm2, %v2395_v44, 0.0  ;;  %3293 = vmatprep.subr.bf16.mxu1 %v3729_v3 }
 0x5cb   : > { %2399 = vadd.xlane.f32.xlu0 %v2398_v45 }
 0x5cd   : > { %3294 = vmatpush3.bf16.msra.mxu1 %v3438_v53 }
 0x5ce   : > { %3295 = vmatprep.subr.bf16.mxu1 %v3729_v3 }
 0x5d1   : > { %3296 = vmatpush3.bf16.msra.mxu1 %v3439_v0 }
 0x5d2   : > { %3297 = vmatprep.subr.bf16.mxu1 %v3729_v3 }
 0x5d5   : > { %3298 = vmatpush3.bf16.msra.mxu1 %v3440_v1 }
 0x658   : > { %v2400_v46 = vpop.xlane.xlu0 %2399 }
 0x659   : > { %v2402_v47 = vmul.f32 0.03125, %v2400_v46 }
 0x65b   : > { %v2403_v48 = vsub.f32 %v2395_v44, %v2402_v47 }
 0x65d   : > { %v2404_v49 = vmul.f32 %v2403_v48, %v2403_v48 }
 0x65f   : > { %v2405_v50 = vsel %vm1063_vm2, %v2404_v49, 0.0 }
 0x660   : > { %2406 = vadd.xlane.f32.xlu1 %v2405_v50 }
 0x6ed   : > { %v2407_v54 = vpop.xlane.xlu1 %2406 }
 0x6ee   : > { %v2408_v55 = vmul.f32 0.03125, %v2407_v54 }
 0x6f0   : > { %v2409_v56 = vadd.f32 1e-05, %v2408_v55 }
 0x6f2   : > { %3457 = vrsqrt.f32 %v2409_v56 }
 0x6fc   : > { %v3458_v57 = vpop.eup %3457 }
 0x6fd   : > { %v2411_v59 = vmul.f32 %v3458_v57, %v2403_v48 }
 0x6ff   : > { %v2418_v61 = vmul.f32 %v3012_v58, %v2411_v59 }
 0x701   : > { %v2425_v62 = vadd.f32 %v3013_v60, %v2418_v61 }
 0x703   : > { %v2440_v63 = vpack.c.bf16 %v2425_v62, %v2425_v62 }
 0x705   : > { %3288 = vmatmul.mubr.msk.bf16.vlgmr.msra.gmra.mrb[48].mxu0 %vm1063_vm2, %v2440_v63 }
 0x7d8   : > { %v2496_v4 = vpop.f32.mrb[48].mxu0 }
 0x7d9   : > { %v2497_v5 = vadd.f32 %v3014_v2, %v2496_v4  ;;  %v3289_v6 = vpop.f32.mrb[49].mxu0 }
 0x7da   : > { %v2499_v8 = vpop.f32.mrb[50].mxu0 }
 0x7db   : > { %v2502_v9 = vmax.f32 %v2497_v5, 0.0  ;;  %v3290_v10 = vpop.f32.mrb[51].mxu0 }
 0x7dd   : > { %v2503_v11 = vpack.c.bf16 %v2502_v9, %v2502_v9 }
 0x7df   : > { %3300 = vmatmul.mubr.msk.bf16.vlgmr.msra.gmra.mrb[48].mxu1 %vm2534_vm5, %v2503_v11 }
 0x8b2   : > { %v2572_v13 = vpop.f32.mrb[48].mxu1 }
 0x8b3   : > { %v2573_v14 = vadd.f32 %v3018_v12, %v2572_v13  ;;  %v3301_v15 = vpop.f32.mrb[49].mxu1 }
 0x8b4   : > { %v2575_v16 = vpop.f32.mrb[50].mxu1 }
 0x8b5   : > { %v3302_v3 = vpop.f32.mrb[51].mxu1  ;;  %v2578_v17 = vadd.f32 %v2573_v14, %v2425_v62 }
 0x8b7   : > { %v2581_v18 = vsel %vm1063_vm2, %v2578_v17, 0.0 }
 0x8b8   : > { %2582 = vadd.xlane.f32.xlu0 %v2581_v18 }
 0x945   : > { %v2583_v19 = vpop.xlane.xlu0 %2582 }
 0x946   : > { %v2584_v20 = vmul.f32 0.03125, %v2583_v19 }
 0x948   : > { %v2585_v21 = vsub.f32 %v2578_v17, %v2584_v20 }
 0x94a   : > { %v2586_v22 = vmul.f32 %v2585_v21, %v2585_v21 }
 0x94c   : > { %v2587_v23 = vsel %vm1063_vm2, %v2586_v22, 0.0 }
 0x94d   : > { %2588 = vadd.xlane.f32.xlu1 %v2587_v23 }
 0x9da   : > { %v2589_v24 = vpop.xlane.xlu1 %2588 }
 0x9db   : > { %v2590_v25 = vmul.f32 0.03125, %v2589_v24 }
 0x9dd   : > { %v2591_v26 = vadd.f32 1e-05, %v2590_v25 }
 0x9df   : > { %3459 = vrsqrt.f32 %v2591_v26 }
 0x9e9   : > { %v3460_v27 = vpop.eup %3459 }
 0x9ea   : > { %v2593_v29 = vmul.f32 %v3460_v27, %v2585_v21  ;;  %2612 = sbr.rel (%p3026_p2) target bundleno = 2547 (0x9f3), region = 120 }
 0x9ec   : > { %v2600_v31 = vmul.f32 %v3024_v28, %v2593_v29 }
 0x9ee   : > { %v2607_v32 = vadd.f32 %v3025_v30, %v2600_v31 }
 0x9f0   : > { %2608 = vst.msk [vmem:[#allocation2] sm:$0xff] %vm1063_vm2, %v2607_v32  ;;  %v2613_v33 = vpack.c.bf16 (!%p3026_p2), %v2607_v32, %v2607_v32 }
 0x9f2   : > { %2615 = vst.msk [vmem:[%s4190_s25] sm:$0xf] %vm2614_vm6, %v2613_v33 }
 0x9f3 PF: > { %s4574_s4 = sld [smem:[#allocation21_spill]]  ;;  %s4575_s24 = sld [smem:[#allocation17_spill]] }
 0x9f4   : > { %s4576_s25 = sld [smem:[#allocation18_spill]]  ;;  %s4577_s26 = sld [smem:[#allocation24_spill]] }
 0x9f5   : > { %s4578_s27 = sld [smem:[#allocation19_spill]]  ;;  %s4579_s28 = sld [smem:[#allocation20_spill]] }
 0x9f6   : > { %s4580_s29 = sld [smem:[#allocation22_spill]]  ;;  %s4581_s0 = sld [smem:[#allocation23_spill]] }
 0x9f9   : > { %s39_s30 = sadd.s32 1, %s4574_s4  }
 0x9fa   : > { %p36_p9 = scmp.ge.s32.totalorder %s39_s30, 6  }
 0x9fc   :  { %38 = sbr.rel (!%p36_p9) target bundleno = 30 (0x1e), region = 230 }
 0xa03   :  { %2635 = vsyncpa [#allocation4], 1 }
 0xa04   :  { %2637 = vsyncpa [#allocation4 + $0x1], 1 }
 0xa05   :  { %2638 = vsyncpa [#allocation6], 1 }
 0xa06   :  { %2640 = vsyncpa [#allocation6 + $0x1], 1 }
 0xa07   :  { %2641 = vsyncpa [#allocation9], 1 }
 0xa08   :  { %2643 = vsyncpa [#allocation9 + $0x1], 1 }
 0xa09   :  { %2644 = vsyncpa [#allocation12], 1 }
 0xa0a   :  { %2646 = vsyncpa [#allocation12 + $0x1], 1 }

// kernel: ed_transformer_forward.4
= control target key start
LH: loop header
LB: loop body
LE: loop exit
PB: predicated region body
PF: predicated region fallthrough
CT: control target
= control target key end

     0   :  { %s8245_s0 = inlined_call_operand.vmem [shape: bf16[2,8,32], index: 0, kind: input, shape index: {}, may-alias: {0,28}]   ;;  %s8246_s1 = inlined_call_operand.vmem [shape: bf16[2,8,32], index: 1, kind: input, shape index: {}]   ;;  %s8247_s2 = inlined_call_operand.vmem [shape: bf16[2,4,32,32], index: 2, kind: input, shape index: {}]   ;;  %s8248_s3 = inlined_call_operand.hbm [shape: f32[2,4,1,32], index: 3, kind: input, shape index: {}]   ;;  %s8249_s4 = inlined_call_operand.vmem [shape: bf16[2,4,32,32], index: 4, kind: input, shape index: {}]   ;;  %s8250_s5 = inlined_call_operand.hbm [shape: f32[2,4,1,32], index: 5, kind: input, shape index: {}]   ;;  %s8251_s6 = inlined_call_operand.vmem [shape: bf16[2,4,32,32], index: 6, kind: input, shape index: {}]   ;;  %s8252_s7 = inlined_call_operand.hbm [shape: f32[2,4,1,32], index: 7, kind: input, shape index: {}]   ;;  %s8253_s8 = inlined_call_operand.vmem [shape: bf16[2,4,32,32], index: 8, kind: input, shape index: {}]   ;;  %s8254_s9 = inlined_call_operand.hbm [shape: f32[2,1,32], index: 9, kind: input, shape index: {}]   ;;  %s8255_s10 = inlined_call_operand.hbm [shape: f32[2,1,32], index: 10, kind: input, shape index: {}]   ;;  %s8256_s11 = inlined_call_operand.hbm [shape: f32[2,1,32], index: 11, kind: input, shape index: {}]   ;;  %s8257_s12 = inlined_call_operand.vmem [shape: bf16[2,4,32,32], index: 12, kind: input, shape index: {}]   ;;  %s8258_s13 = inlined_call_operand.hbm [shape: f32[2,4,1,32], index: 13, kind: input, shape index: {}]   ;;  %s8259_s14 = inlined_call_operand.vmem [shape: bf16[2,4,32,32], index: 14, kind: input, shape index: {}]   ;;  %s8260_s15 = inlined_call_operand.hbm [shape: f32[2,4,1,32], index: 15, kind: input, shape index: {}]   ;;  %s8261_s16 = inlined_call_operand.vmem [shape: bf16[2,4,32,32], index: 16, kind: input, shape index: {}]   ;;  %s8262_s17 = inlined_call_operand.hbm [shape: f32[2,4,1,32], index: 17, kind: input, shape index: {}]   ;;  %s8263_s18 = inlined_call_operand.vmem [shape: bf16[2,4,32,32], index: 18, kind: input, shape index: {}]   ;;  %s8264_s19 = inlined_call_operand.hbm [shape: f32[2,1,32], index: 19, kind: input, shape index: {}]   ;;  %s8265_s20 = inlined_call_operand.hbm [shape: f32[2,1,32], index: 20, kind: input, shape index: {}]   ;;  %s8266_s21 = inlined_call_operand.hbm [shape: f32[2,1,32], index: 21, kind: input, shape index: {}]   ;;  %s8267_s22 = inlined_call_operand.hbm [shape: bf16[2,32,64], index: 22, kind: input, shape index: {}]   ;;  %s8268_s23 = inlined_call_operand.hbm [shape: f32[2,1,64], index: 23, kind: input, shape index: {}]   ;;  %s8269_s24 = inlined_call_operand.vmem [shape: bf16[2,64,32], index: 24, kind: input, shape index: {}]   ;;  %s8270_s25 = inlined_call_operand.hbm [shape: f32[2,1,32], index: 25, kind: input, shape index: {}]   ;;  %s8271_s26 = inlined_call_operand.hbm [shape: f32[2,1,32], index: 26, kind: input, shape index: {}]   ;;  %s8272_s27 = inlined_call_operand.hbm [shape: f32[2,1,32], index: 27, kind: input, shape index: {}]   ;;  %s8273_s28 = inlined_call_operand.vmem [shape: bf16[2,8,32], index: 28, kind: output, shape index: {}, may-alias: {0,28}]  }
   0x1   :  { %8314 = sst [smem:[#allocation54_spill]] %s8245_s0 }
   0x2   :  { %8315 = sst [smem:[#allocation55_spill]] %s8246_s1 }
   0x3   :  { %8316 = sst [smem:[#allocation56_spill]] %s8247_s2 }
   0x4   :  { %8317 = sst [smem:[#allocation57_spill]] %s8248_s3 }
   0x5   :  { %8318 = sst [smem:[#allocation58_spill]] %s8249_s4 }
   0x6   :  { %8319 = sst [smem:[#allocation59_spill]] %s8250_s5 }
   0x7   :  { %8320 = sst [smem:[#allocation60_spill]] %s8251_s6 }
   0x8   :  { %8321 = sst [smem:[#allocation61_spill]] %s8252_s7 }
   0x9   :  { %8322 = sst [smem:[#allocation62_spill]] %s8253_s8 }
   0xa   :  { %8323 = sst [smem:[#allocation63_spill]] %s8254_s9 }
   0xb   :  { %8324 = sst [smem:[#allocation64_spill]] %s8255_s10 }
   0xc   :  { %8325 = sst [smem:[#allocation65_spill]] %s8256_s11 }
   0xd   :  { %8326 = sst [smem:[#allocation66_spill]] %s8257_s12 }
   0xe   :  { %8327 = sst [smem:[#allocation67_spill]] %s8258_s13 }
   0xf   :  { %8328 = sst [smem:[#allocation68_spill]] %s8259_s14 }
  0x10   :  { %8329 = sst [smem:[#allocation69_spill]] %s8260_s15 }
  0x11   :  { %8330 = sst [smem:[#allocation70_spill]] %s8261_s16 }
  0x12   :  { %8331 = sst [smem:[#allocation71_spill]] %s8262_s17 }
  0x13   :  { %8332 = sst [smem:[#allocation72_spill]] %s8263_s18 }
  0x14   :  { %8333 = sst [smem:[#allocation73_spill]] %s8264_s19 }
  0x15   :  { %8334 = sst [smem:[#allocation74_spill]] %s8265_s20 }
  0x16   :  { %8335 = sst [smem:[#allocation75_spill]] %s8266_s21 }
  0x17   :  { %8336 = sst [smem:[#allocation76_spill]] %s8267_s22 }
  0x18   :  { %8337 = sst [smem:[#allocation77_spill]] %s8268_s23 }
  0x19   :  { %8338 = sst [smem:[#allocation78_spill]] %s8269_s24 }
  0x1a   :  { %8339 = sst [smem:[#allocation79_spill]] %s8270_s25 }
  0x1b   :  { %8340 = sst [smem:[#allocation80_spill]] %s8271_s26 }
  0x1c   :  { %8341 = sst [smem:[#allocation81_spill]] %s8272_s27 }
  0x1d   :  { %8342 = sst [smem:[#allocation82_spill]] %s8273_s28 }
  0x1e   :  { %33 = vsyncpa [#allocation4], 0 }
  0x1f   :  { %35 = vsyncpa [#allocation4 + $0x1], 0 }
  0x20   :  { %36 = vsyncpa [#allocation6], 0 }
  0x21   :  { %38 = vsyncpa [#allocation6 + $0x1], 0 }
  0x22   :  { %39 = vsyncpa [#allocation9], 0 }
  0x23   :  { %41 = vsyncpa [#allocation9 + $0x1], 0 }
  0x24   :  { %42 = vsyncpa [#allocation12], 0 }
  0x25   :  { %44 = vsyncpa [#allocation12 + $0x1], 0 }
  0x26   :  { %45 = vsyncpa [#allocation15], 0 }
  0x27   :  { %47 = vsyncpa [#allocation15 + $0x1], 0 }
  0x28   :  { %48 = vsyncpa [#allocation18], 0 }
  0x29   :  { %50 = vsyncpa [#allocation18 + $0x1], 0 }
  0x2a   :  { %51 = vsyncpa [#allocation21], 0 }
  0x2b   :  { %53 = vsyncpa [#allocation21 + $0x1], 0 }
  0x2c   :  { %54 = vsyncpa [#allocation24], 0 }
  0x2d   :  { %56 = vsyncpa [#allocation24 + $0x1], 0 }
  0x2e   :  { %57 = vsyncpa [#allocation27], 0 }
  0x2f   :  { %59 = vsyncpa [#allocation27 + $0x1], 0  ;;  %s7035_s8 = smov 0   ;;  %s7037_s5 = smov 0  }
  0x30   :  { %s7039_s9 = smov 0   ;;  %s7041_s30 = smov 0  }
  0x31   :  { %s7043_s3 = smov 0   ;;  %s7045_s6 = smov 0  }
  0x32   :  { %s7047_s10 = smov 0   ;;  %s7049_s0 = smov 0  }
  0x33 LB: > { %8343 = sst [smem:[#allocation38_spill]] %s6841_s5  ;;  %s8280_s11 = sadd.s32 4294967295, %s6865_s0   ;;  %s6865_s0 = sphi %s7049_s0, %s65_s0   ;;  %s6861_s10 = sphi %s7047_s10, %s8441_s10   ;;  %s6857_s6 = sphi %s7045_s6, %s8440_s6   ;;  %s6853_s3 = sphi %s7043_s3, %s8439_s3   ;;  %s6849_s30 = sphi %s7041_s30, %s8438_s30   ;;  %s6845_s9 = sphi %s7039_s9, %s8437_s9   ;;  %s6841_s5 = sphi %s7037_s5, %s8436_s5   ;;  %s6837_s8 = sphi %s7035_s8, %s8435_s8  }
  0x34   : > { %8344 = sst [smem:[#allocation39_spill]] %s6845_s9  ;;  %s74_s29 = sadd.s32 1, %s6857_s6 }
  0x35   : > { %8345 = sst [smem:[#allocation40_spill]] %s6849_s30  ;;  %p75_p0 = scmp.ge.s32.totalorder %s74_s29, 2 }
  0x36   : > { %8346 = sst [smem:[#allocation41_spill]] %s6853_s3  ;;  %s77_s2 = sadd.s32 1, %s6861_s10 }
  0x37   : > { %8347 = sst [smem:[#allocation42_spill]] %s6857_s6  ;;  %s162_s7 = sadd.s32 1, %s6845_s9 }
  0x38   : > { %8348 = sst [smem:[#allocation43_spill]] %s6861_s10  ;;  %p169_p1 = scmp.ne.s32.totalorder %s6845_s9, %s6841_s5 }
  0x39   : > { %8349 = sst [smem:[#allocation44_spill]] %s6865_s0  ;;  %s8443_s29 = smov (%p75_p0, %s74_s29), 0 }
  0x3a   : > { %8350 = sst [smem:[#allocation45_spill]] %s8443_s29  ;;  %s8445_s2 = smov (!%p75_p0, %s77_s2), %s6861_s10 }
  0x3b   : > { %s159_s12 = ssub.s32 %s6857_s6, %s8443_s29  ;;  %p170_p2 = scmp.eq.s32.totalorder %s6865_s0, 0 }
  0x3c   : > { %p79_p3 = scmp.ge.s32.totalorder %s8445_s2, 2  ;;  %p160_p4 = scmp.eq.s32.totalorder %s159_s12, 0 }
  0x3d   : > { %p7085_p5 = por %p170_p2, %p169_p1  ;;  %p175_p6 = scmp.ne.s32.totalorder %s6841_s5, %s6837_s8 }
  0x3e   : > { %s8447_s2 = smov (%p79_p3, %s8445_s2), 0  ;;  %p176_p7 = scmp.eq.s32.totalorder %s8280_s11, 0 }
  0x3f   : > { %8352 = sst [smem:[#allocation46_spill]] %s8447_s2  ;;  %p5336_p9 = scmp.ge.s32.totalorder %s6865_s0, 4 }
  0x40   : > { %s7093_s4 = scalar_select %p160_p4, %s6845_s9, %s162_s7  }
  0x41   : > { %p7097_p8 = por %p176_p7, %p175_p6  ;;  %845 = sbr.rel (%p5336_p9) target bundleno = 524 (0x20c), region = 16 }
  0x42   : > { %8353 = sst [smem:[#allocation47_spill]] %s7093_s4  ;;  %s7103_s12 = sand.u32 (!%p5336_p9), 1, %s6845_s9  }
  0x43   : > { %s8354_s28 = scalar_select %p7097_p8, 1, 0 }
  0x44   : > { %s7106_s8 = sshll.u32 (!%p5336_p9), %s6857_s6, 6  ;;  %s7109_s7 = sshll.u32 (!%p5336_p9), %s7103_s12, 2 }
  0x45   : > { %8355 = sst [smem:[#allocation48_spill]] %s8354_s28  ;;  %s7112_s11 = sand.u32 (!%p5336_p9), 1, %s6865_s0  }
  0x46   : > { %s8356_s10 = sld [smem:[#allocation59_spill]] (!%p5336_p9)  ;;  %s904_s9 = scalar_lea.vmem (!%p5336_p9), [#allocation5], %s7109_s7 }
  0x47   : > { %s911_s18 = sshll.u32 (!%p5336_p9), %s904_s9, 4  ;;  %s8293_s16 = scalar_lea.sflag (!%p5336_p9), [#allocation6], %s7112_s11  ;;  %s7121_s18 = int_to_ptr.vmem [resolvable:$true] %s911_s18 }
  0x4c   : > { %s8357_s4 = smov %s8356_s10  ;;  %s7118_s24 = scalar_lea.hbm %s8356_s10, %s7106_s8 }
  0x4d   : > { %s6291_s14 = scalar_lea.hbm %s7118_s24, 64  ;;  %s6295_s29 = scalar_lea.hbm %s8357_s4, 128 }
  0x4e   : > { %p6292_p10 = scmp.ne.s32.totalorder %s7118_s24, %s6291_s14  ;;  %p6296_p13 = scmp.lt.u32.totalorder %s7118_s24, %s8357_s4 }
  0x4f   : > { %p6297_p0 = scmp.lt.u32.totalorder %s6295_s29, %s6291_s14  ;;  %p6299_p2 = scmp.lt.u32.totalorder %s6291_s14, %s7118_s24 }
  0x50   : > { %p6293_p11 = pnand %p6292_p10, %p7085_p5 }
  0x51   : > { %p6298_p1 = por %p6297_p0, %p6296_p13 }
  0x52   : > { %p6294_p12 = pneg %p6293_p11 }
  0x53   : > { %p6300_p3 = por %p6299_p2, %p6298_p1 }
  0x55   : > { %p6301_p4 = pnand %p6300_p3, %p6294_p12 }
  0x57   : > { %6304 = shalt.err (!%p6301_p4)
}
  0x58   : > { %s6305_s9 = scalar_lea.vmem %s7121_s18, 64  ;;  %s6867_s30 = smov [#allocation5]  }
  0x59   : > { %p6306_p6 = scmp.ne.s32.totalorder %s7121_s18, %s6305_s9  ;;  %s6309_s3 = sshll.u32 %s6867_s30, 4  ;;  %s6310_s3 = int_to_ptr.vmem [resolvable:$false] %s6309_s3 }
  0x5a   : > { %s6311_s10 = scalar_lea.vmem %s6310_s3, 128  ;;  %p6312_p10 = scmp.lt.s32.totalorder %s7121_s18, %s6310_s3 }
  0x5b   : > { %p6307_p7 = pnand %p6306_p6, %p7085_p5  ;;  %p6313_p11 = scmp.lt.s32.totalorder %s6311_s10, %s6305_s9 }
  0x5d   : > { %p6308_p9 = pneg %p6307_p7  ;;  %p6314_p13 = por %p6313_p11, %p6312_p10 }
  0x5f   : > { %p6315_p0 = pnand %p6314_p13, %p6308_p9 }
  0x61   : > { %6318 = shalt.err (!%p6315_p0)
}
  0x62   : > { %s8294_s14 = smov 16   ;;  %s8298_s29 = smov 1  }
  0x63   : > { %6080 = dma.hbm_to_vmem [thread:$0]  (%p7085_p5), %s7118_s24, 64, %s7121_s18, %s8293_s16, %s8294_s14, %s8294_s14, %s8298_s29  }
  0x64   : > { %s7151_s2 = sshll.u32 %s6857_s6, 4  ;;  %s8358_s3 = sld [smem:[#allocation63_spill]] }
  0x65   : > { %s961_s28 = scalar_lea.vmem [#allocation8], %s7103_s12  ;;  %s8297_s0 = scalar_lea.sflag [#allocation9], %s7112_s11 }
  0x66   : > { %s968_s5 = sshll.u32 %s961_s28, 4  ;;  %s969_s5 = int_to_ptr.vmem [resolvable:$true] %s968_s5 }
  0x6a   : > { %s8359_s4 = smov %s8358_s3  ;;  %s7157_s10 = scalar_lea.hbm %s8358_s3, %s7151_s2 }
  0x6b   : > { %s6319_s27 = scalar_lea.hbm %s7157_s10, 16  ;;  %s6323_s16 = scalar_lea.hbm %s8359_s4, 32 }
  0x6c   : > { %p6320_p12 = scmp.ne.s32.totalorder %s7157_s10, %s6319_s27  ;;  %p6324_p3 = scmp.lt.u32.totalorder %s7157_s10, %s8359_s4 }
  0x6d   : > { %p6325_p4 = scmp.lt.u32.totalorder %s6323_s16, %s6319_s27  ;;  %p6327_p7 = scmp.lt.u32.totalorder %s6319_s27, %s7157_s10 }
  0x6e   : > { %p6321_p1 = pnand %p6320_p12, %p7085_p5 }
  0x6f   : > { %p6326_p6 = por %p6325_p4, %p6324_p3 }
  0x70   : > { %p6322_p2 = pneg %p6321_p1 }
  0x71   : > { %p6328_p9 = por %p6327_p7, %p6326_p6 }
  0x73   : > { %p6329_p10 = pnand %p6328_p9, %p6322_p2 }
  0x75   : > { %6332 = shalt.err (!%p6329_p10)
}
  0x76   : > { %s6333_s28 = scalar_lea.vmem %s969_s5, 16  ;;  %s6870_s3 = smov [#allocation8]  }
  0x77   : > { %p6334_p11 = scmp.ne.s32.totalorder %s969_s5, %s6333_s28  ;;  %s6337_s14 = sshll.u32 %s6870_s3, 4  ;;  %s6338_s14 = int_to_ptr.vmem [resolvable:$false] %s6337_s14 }
  0x78   : > { %s6339_s18 = scalar_lea.vmem %s6338_s14, 32  ;;  %p6340_p12 = scmp.lt.s32.totalorder %s969_s5, %s6338_s14 }
  0x79   : > { %p6335_p13 = pnand %p6334_p11, %p7085_p5  ;;  %p6341_p1 = scmp.lt.s32.totalorder %s6339_s18, %s6333_s28 }
  0x7b   : > { %p6336_p0 = pneg %p6335_p13  ;;  %p6342_p8 = por %p6341_p1, %p6340_p12 }
  0x7d   : > { %p6343_p3 = pnand %p6342_p8, %p6336_p0 }
  0x7f   : > { %6346 = shalt.err (!%p6343_p3)
}
  0x80   : > { %6082 = dma.hbm_to_vmem [thread:$0]  (%p7085_p5), %s7157_s10, 16, %s969_s5, %s8297_s0  }
  0x81   : > { %s8360_s24 = sld [smem:[#allocation65_spill]]  ;;  %s995_s14 = scalar_lea.vmem [#allocation11], %s7103_s12 }
  0x82   : > { %s1002_s30 = sshll.u32 %s995_s14, 4  ;;  %s8300_s28 = scalar_lea.sflag [#allocation12], %s7112_s11  ;;  %s1003_s30 = int_to_ptr.vmem [resolvable:$true] %s1002_s30 }
  0x87   : > { %s7184_s9 = scalar_lea.hbm %s8360_s24, %s7151_s2  ;;  %s6351_s10 = scalar_lea.hbm %s8360_s24, 32 }
  0x88   : > { %s6347_s3 = scalar_lea.hbm %s7184_s9, 16  ;;  %p6352_p6 = scmp.lt.u32.totalorder %s7184_s9, %s8360_s24 }
  0x89   : > { %p6348_p8 = scmp.ne.s32.totalorder %s7184_s9, %s6347_s3  ;;  %p6353_p7 = scmp.lt.u32.totalorder %s6351_s10, %s6347_s3 }
  0x8a   : > { %p6355_p10 = scmp.lt.u32.totalorder %s6347_s3, %s7184_s9 }
  0x8b   : > { %p6349_p2 = pnand %p6348_p8, %p7085_p5  ;;  %p6354_p9 = por %p6353_p7, %p6352_p6 }
  0x8d   : > { %p6350_p4 = pneg %p6349_p2  ;;  %p6356_p11 = por %p6355_p10, %p6354_p9 }
  0x8f   : > { %p6357_p13 = pnand %p6356_p11, %p6350_p4 }
  0x91   : > { %6360 = shalt.err (!%p6357_p13)
}
  0x92   : > { %s6361_s14 = scalar_lea.vmem %s1003_s30, 16  ;;  %s6871_s0 = smov [#allocation11]  }
  0x93   : > { %p6362_p0 = scmp.ne.s32.totalorder %s1003_s30, %s6361_s14  ;;  %s6365_s29 = sshll.u32 %s6871_s0, 4  ;;  %s6366_s29 = int_to_ptr.vmem [resolvable:$false] %s6365_s29 }
  0x94   : > { %s6367_s18 = scalar_lea.vmem %s6366_s29, 32  ;;  %p6368_p3 = scmp.lt.s32.totalorder %s1003_s30, %s6366_s29 }
  0x95   : > { %p6363_p12 = pnand %p6362_p0, %p7085_p5  ;;  %p6369_p8 = scmp.lt.s32.totalorder %s6367_s18, %s6361_s14 }
  0x97   : > { %p6364_p1 = pneg %p6363_p12  ;;  %p6370_p2 = por %p6369_p8, %p6368_p3 }
  0x99   : > { %p6371_p6 = pnand %p6370_p2, %p6364_p1 }
  0x9b   : > { %6374 = shalt.err (!%p6371_p6)
}
  0x9c   : > { %6084 = dma.hbm_to_vmem [thread:$0]  (%p7085_p5), %s7184_s9, 16, %s1003_s30, %s8300_s28  }
  0x9d   : > { %s8361_s15 = sld [smem:[#allocation69_spill]]  ;;  %s1050_s29 = scalar_lea.vmem [#allocation14], %s7109_s7 }
  0x9e   : > { %s1057_s10 = sshll.u32 %s1050_s29, 4  ;;  %s8302_s16 = scalar_lea.sflag [#allocation15], %s7112_s11  ;;  %s7214_s10 = int_to_ptr.vmem [resolvable:$true] %s1057_s10 }
  0xa3   : > { %s7211_s0 = scalar_lea.hbm %s8361_s15, %s7106_s8  ;;  %s6379_s14 = scalar_lea.hbm %s8361_s15, 128 }
  0xa4   : > { %s6375_s27 = scalar_lea.hbm %s7211_s0, 64  ;;  %p6380_p10 = scmp.lt.u32.totalorder %s7211_s0, %s8361_s15 }
  0xa5   : > { %p6376_p4 = scmp.ne.s32.totalorder %s7211_s0, %s6375_s27  ;;  %p6381_p11 = scmp.lt.u32.totalorder %s6379_s14, %s6375_s27 }
  0xa6   : > { %p6383_p0 = scmp.lt.u32.totalorder %s6375_s27, %s7211_s0 }
  0xa7   : > { %p6377_p7 = pnand %p6376_p4, %p7085_p5  ;;  %p6382_p13 = por %p6381_p11, %p6380_p10 }
  0xa9   : > { %p6378_p9 = pneg %p6377_p7  ;;  %p6384_p12 = por %p6383_p0, %p6382_p13 }
  0xab   : > { %p6385_p1 = pnand %p6384_p12, %p6378_p9 }
  0xad   : > { %6388 = shalt.err (!%p6385_p1)
}
  0xae   : > { %s6389_s5 = scalar_lea.vmem %s7214_s10, 64  ;;  %s6872_s29 = smov [#allocation14]  }
  0xaf   : > { %p6390_p3 = scmp.ne.s32.totalorder %s7214_s10, %s6389_s5  ;;  %s6393_s9 = sshll.u32 %s6872_s29, 4  ;;  %s6394_s9 = int_to_ptr.vmem [resolvable:$false] %s6393_s9 }
  0xb0   : > { %s6395_s30 = scalar_lea.vmem %s6394_s9, 128  ;;  %p6396_p6 = scmp.lt.s32.totalorder %s7214_s10, %s6394_s9 }
  0xb1   : > { %p6391_p8 = pnand %p6390_p3, %p7085_p5  ;;  %p6397_p4 = scmp.lt.s32.totalorder %s6395_s30, %s6389_s5 }
  0xb3   : > { %p6392_p2 = pneg %p6391_p8  ;;  %p6398_p7 = por %p6397_p4, %p6396_p6 }
  0xb5   : > { %p6399_p10 = pnand %p6398_p7, %p6392_p2 }
  0xb7   : > { %6402 = shalt.err (!%p6399_p10)
}
  0xb8   : > { %s8362_s27 = smov 1   ;;  %s8363_s14 = smov 16  }
  0xb9   : > { %6086 = dma.hbm_to_vmem [thread:$0]  (%p7085_p5), %s7211_s0, 64, %s7214_s10, %s8302_s16, %s8363_s14, %s8363_s14, %s8362_s27  }
  0xba   : > { %s8364_s19 = sld [smem:[#allocation73_spill]]  ;;  %s1107_s29 = scalar_lea.vmem [#allocation17], %s7103_s12 }
  0xbb   : > { %s1114_s9 = sshll.u32 %s1107_s29, 4  ;;  %s1115_s9 = int_to_ptr.vmem [resolvable:$true] %s1114_s9 }
  0xc0   : > { %s7247_s5 = scalar_lea.hbm %s8364_s19, %s7151_s2  ;;  %s6407_s10 = scalar_lea.hbm %s8364_s19, 32 }
  0xc1   : > { %s6403_s28 = scalar_lea.hbm %s7247_s5, 16  ;;  %p6408_p0 = scmp.lt.u32.totalorder %s7247_s5, %s8364_s19 }
  0xc2   : > { %p6404_p9 = scmp.ne.s32.totalorder %s7247_s5, %s6403_s28  ;;  %p6409_p12 = scmp.lt.u32.totalorder %s6407_s10, %s6403_s28 }
  0xc3   : > { %p6411_p3 = scmp.lt.u32.totalorder %s6403_s28, %s7247_s5 }
  0xc4   : > { %p6405_p11 = pnand %p6404_p9, %p7085_p5  ;;  %p6410_p1 = por %p6409_p12, %p6408_p0 }
  0xc6   : > { %p6406_p13 = pneg %p6405_p11  ;;  %p6412_p8 = por %p6411_p3, %p6410_p1 }
  0xc8   : > { %p6413_p2 = pnand %p6412_p8, %p6406_p13 }
  0xca   : > { %6416 = shalt.err (!%p6413_p2)
}
  0xcb   : > { %s6417_s29 = scalar_lea.vmem %s1115_s9, 16  ;;  %s6873_s16 = smov [#allocation17]  }
  0xcc   : > { %p6418_p6 = scmp.ne.s32.totalorder %s1115_s9, %s6417_s29  ;;  %s6421_s30 = sshll.u32 %s6873_s16, 4  ;;  %s6422_s30 = int_to_ptr.vmem [resolvable:$false] %s6421_s30 }
  0xcd   : > { %s6423_s4 = scalar_lea.vmem %s6422_s30, 32  ;;  %p6424_p10 = scmp.lt.s32.totalorder %s1115_s9, %s6422_s30 }
  0xce   : > { %p6419_p4 = pnand %p6418_p6, %p7085_p5  ;;  %p6425_p9 = scmp.lt.s32.totalorder %s6423_s4, %s6417_s29 }
  0xd0   : > { %p6420_p7 = pneg %p6419_p4  ;;  %p6426_p11 = por %p6425_p9, %p6424_p10 }
  0xd2   : > { %p6427_p0 = pnand %p6426_p11, %p6420_p7 }
  0xd4   : > { %6430 = shalt.err (!%p6427_p0)
}
  0xd5   : > { %s8365_s28 = scalar_lea.sflag [#allocation18], %s7112_s11  ;;  %s8366_s21 = sld [smem:[#allocation75_spill]] }
  0xd6   : > { %6088 = dma.hbm_to_vmem [thread:$0]  (%p7085_p5), %s7247_s5, 16, %s1115_s9, %s8365_s28  }
  0xd7   : > { %s1141_s30 = scalar_lea.vmem [#allocation20], %s7103_s12 }
  0xd8   : > { %s1148_s18 = sshll.u32 %s1141_s30, 4  ;;  %s1149_s18 = int_to_ptr.vmem [resolvable:$true] %s1148_s18 }
  0xdb   : > { %s7274_s16 = scalar_lea.hbm %s8366_s21, %s7151_s2  ;;  %s6435_s9 = scalar_lea.hbm %s8366_s21, 32 }
  0xdc   : > { %s6431_s29 = scalar_lea.hbm %s7274_s16, 16  ;;  %p6436_p3 = scmp.lt.u32.totalorder %s7274_s16, %s8366_s21 }
  0xdd   : > { %p6432_p13 = scmp.ne.s32.totalorder %s7274_s16, %s6431_s29  ;;  %p6437_p8 = scmp.lt.u32.totalorder %s6435_s9, %s6431_s29 }
  0xde   : > { %p6439_p6 = scmp.lt.u32.totalorder %s6431_s29, %s7274_s16 }
  0xdf   : > { %p6433_p12 = pnand %p6432_p13, %p7085_p5  ;;  %p6438_p2 = por %p6437_p8, %p6436_p3 }
  0xe1   : > { %p6434_p1 = pneg %p6433_p12  ;;  %p6440_p4 = por %p6439_p6, %p6438_p2 }
  0xe3   : > { %p6441_p7 = pnand %p6440_p4, %p6434_p1 }
  0xe5   : > { %6444 = shalt.err (!%p6441_p7)
}
  0xe6   : > { %s6445_s10 = scalar_lea.vmem %s1149_s18, 16  ;;  %s6874_s30 = smov [#allocation20]  }
  0xe7   : > { %p6446_p10 = scmp.ne.s32.totalorder %s1149_s18, %s6445_s10  ;;  %s6449_s3 = sshll.u32 %s6874_s30, 4  ;;  %s6450_s3 = int_to_ptr.vmem [resolvable:$false] %s6449_s3 }
  0xe8   : > { %s6451_s4 = scalar_lea.vmem %s6450_s3, 32  ;;  %p6452_p0 = scmp.lt.s32.totalorder %s1149_s18, %s6450_s3 }
  0xe9   : > { %p6447_p9 = pnand %p6446_p10, %p7085_p5  ;;  %p6453_p13 = scmp.lt.s32.totalorder %s6451_s4, %s6445_s10 }
  0xeb   : > { %p6448_p11 = pneg %p6447_p9  ;;  %p6454_p12 = por %p6453_p13, %p6452_p0 }
  0xed   : > { %p6455_p3 = pnand %p6454_p12, %p6448_p11 }
  0xef   : > { %6458 = shalt.err (!%p6455_p3)
}
  0xf0   : > { %s8367_s29 = scalar_lea.sflag [#allocation21], %s7112_s11  ;;  %s8368_s23 = sld [smem:[#allocation77_spill]] }
  0xf1   : > { %6090 = dma.hbm_to_vmem [thread:$0]  (%p7085_p5), %s7274_s16, 16, %s1149_s18, %s8367_s29  }
  0xf2   : > { %s1179_s3 = scalar_lea.vmem [#allocation23], %s7103_s12 }
  0xf3   : > { %s1186_s0 = sshll.u32 %s1179_s3, 4  ;;  %s1187_s0 = int_to_ptr.vmem [resolvable:$true] %s1186_s0 }
  0xf6   : > { %s7301_s28 = scalar_lea.hbm %s8368_s23, %s7151_s2  ;;  %s6463_s18 = scalar_lea.hbm %s8368_s23, 32 }
  0xf7   : > { %s6459_s30 = scalar_lea.hbm %s7301_s28, 16  ;;  %p6464_p6 = scmp.lt.u32.totalorder %s7301_s28, %s8368_s23 }
  0xf8   : > { %p6460_p1 = scmp.ne.s32.totalorder %s7301_s28, %s6459_s30  ;;  %p6465_p4 = scmp.lt.u32.totalorder %s6463_s18, %s6459_s30 }
  0xf9   : > { %p6467_p10 = scmp.lt.u32.totalorder %s6459_s30, %s7301_s28 }
  0xfa   : > { %p6461_p8 = pnand %p6460_p1, %p7085_p5  ;;  %p6466_p7 = por %p6465_p4, %p6464_p6 }
  0xfc   : > { %p6462_p2 = pneg %p6461_p8  ;;  %p6468_p9 = por %p6467_p10, %p6466_p7 }
  0xfe   : > { %p6469_p11 = pnand %p6468_p9, %p6462_p2 }
 0x100   : > { %6472 = shalt.err (!%p6469_p11)
}
 0x101   : > { %s6473_s9 = scalar_lea.vmem %s1187_s0, 16  ;;  %s6875_s3 = smov [#allocation23]  }
 0x102   : > { %p6474_p0 = scmp.ne.s32.totalorder %s1187_s0, %s6473_s9  ;;  %s6477_s10 = sshll.u32 %s6875_s3, 4  ;;  %s6478_s10 = int_to_ptr.vmem [resolvable:$false] %s6477_s10 }
 0x103   : > { %s6479_s4 = scalar_lea.vmem %s6478_s10, 32  ;;  %p6480_p3 = scmp.lt.s32.totalorder %s1187_s0, %s6478_s10 }
 0x104   : > { %p6475_p13 = pnand %p6474_p0, %p7085_p5  ;;  %p6481_p1 = scmp.lt.s32.totalorder %s6479_s4, %s6473_s9 }
 0x106   : > { %p6476_p12 = pneg %p6475_p13  ;;  %p6482_p8 = por %p6481_p1, %p6480_p3 }
 0x108   : > { %p6483_p4 = pnand %p6482_p8, %p6476_p12 }
 0x10a   : > { %6486 = shalt.err (!%p6483_p4)
}
 0x10b   : > { %s8369_s30 = scalar_lea.sflag [#allocation24], %s7112_s11  ;;  %s8370_s26 = sld [smem:[#allocation80_spill]] }
 0x10c   : > { %6092 = dma.hbm_to_vmem [thread:$0]  (%p7085_p5), %s7301_s28, 16, %s1187_s0, %s8369_s30  }
 0x10d   : > { %s1221_s10 = scalar_lea.vmem [#allocation26], %s7103_s12 }
 0x10e   : > { %s1228_s5 = sshll.u32 %s1221_s10, 4  ;;  %s1229_s5 = int_to_ptr.vmem [resolvable:$true] %s1228_s5 }
 0x111   : > { %s7328_s29 = scalar_lea.hbm %s8370_s26, %s7151_s2  ;;  %s6491_s0 = scalar_lea.hbm %s8370_s26, 32 }
 0x112   : > { %s6487_s3 = scalar_lea.hbm %s7328_s29, 16  ;;  %p6492_p10 = scmp.lt.u32.totalorder %s7328_s29, %s8370_s26 }
 0x113   : > { %p6488_p2 = scmp.ne.s32.totalorder %s7328_s29, %s6487_s3  ;;  %p6493_p9 = scmp.lt.u32.totalorder %s6491_s0, %s6487_s3 }
 0x114   : > { %p6495_p0 = scmp.lt.u32.totalorder %s6487_s3, %s7328_s29 }
 0x115   : > { %p6489_p6 = pnand %p6488_p2, %p7085_p5  ;;  %p6494_p11 = por %p6493_p9, %p6492_p10 }
 0x117   : > { %p6490_p7 = pneg %p6489_p6  ;;  %p6496_p13 = por %p6495_p0, %p6494_p11 }
 0x119   : > { %p6497_p12 = pnand %p6496_p13, %p6490_p7 }
 0x11b   : > { %6500 = shalt.err (!%p6497_p12)
}
 0x11c   : > { %s6501_s18 = scalar_lea.vmem %s1229_s5, 16  ;;  %s6876_s10 = smov [#allocation26]  }
 0x11d   : > { %p6502_p3 = scmp.ne.s32.totalorder %s1229_s5, %s6501_s18  ;;  %s6505_s9 = sshll.u32 %s6876_s10, 4  ;;  %s6506_s9 = int_to_ptr.vmem [resolvable:$false] %s6505_s9 }
 0x11e   : > { %s6507_s4 = scalar_lea.vmem %s6506_s9, 32  ;;  %p6508_p4 = scmp.lt.s32.totalorder %s1229_s5, %s6506_s9 }
 0x11f   : > { %p6503_p1 = pnand %p6502_p3, %p7085_p5  ;;  %p6509_p2 = scmp.lt.s32.totalorder %s6507_s4, %s6501_s18 }
 0x121   : > { %p6504_p8 = pneg %p6503_p1  ;;  %p6510_p6 = por %p6509_p2, %p6508_p4 }
 0x123   : > { %p6511_p9 = pnand %p6510_p6, %p6504_p8 }
 0x125   : > { %6514 = shalt.err (!%p6511_p9)
}
 0x126   : > { %s8371_s3 = scalar_lea.sflag [#allocation27], %s7112_s11  ;;  %s8372_s30 = sld [smem:[#allocation57_spill]] }
 0x127   : > { %6094 = dma.hbm_to_vmem [thread:$0]  (%p7085_p5), %s7328_s29, 16, %s1229_s5, %s8371_s3  }
 0x128   : > { %s875_s9 = scalar_lea.vmem [#allocation3], %s7109_s7  ;;  %s8374_s19 = sld [smem:[#allocation61_spill]] }
 0x129   : > { %s882_s18 = sshll.u32 %s875_s9, 4  ;;  %s872_s23 = scalar_lea.sflag [#allocation4], %s7103_s12  ;;  %s7358_s18 = int_to_ptr.vmem [resolvable:$true] %s882_s18 }
 0x12c   : > { %s8373_s16 = smov %s8372_s30  ;;  %s7355_s10 = scalar_lea.hbm %s8372_s30, %s7106_s8 }
 0x12d   : > { %s6515_s29 = scalar_lea.hbm %s7355_s10, 64  ;;  %s6519_s28 = scalar_lea.hbm %s8373_s16, 128 }
 0x12e   : > { %s7364_s21 = scalar_lea.hbm %s8374_s19, %s7106_s8  ;;  %p6516_p7 = scmp.ne.s32.totalorder %s7355_s10, %s6515_s29 }
 0x12f   : > { %p6520_p0 = scmp.lt.u32.totalorder %s7355_s10, %s8373_s16  ;;  %p6521_p13 = scmp.lt.u32.totalorder %s6519_s28, %s6515_s29 }
 0x130   : > { %p6517_p10 = pnand %p6516_p7, %p7085_p5  ;;  %p6523_p3 = scmp.lt.u32.totalorder %s6515_s29, %s7355_s10 }
 0x131   : > { %p6522_p12 = por %p6521_p13, %p6520_p0 }
 0x132   : > { %p6518_p11 = pneg %p6517_p10 }
 0x133   : > { %p6524_p1 = por %p6523_p3, %p6522_p12 }
 0x135   : > { %p6525_p8 = pnand %p6524_p1, %p6518_p11 }
 0x137   : > { %6528 = shalt.err (!%p6525_p8)
}
 0x138   : > { %s6529_s15 = scalar_lea.vmem %s7358_s18, 64  ;;  %s6877_s9 = smov [#allocation3]  }
 0x139   : > { %p6530_p4 = scmp.ne.s32.totalorder %s7358_s18, %s6529_s15  ;;  %s6533_s4 = sshll.u32 %s6877_s9, 4  ;;  %s6534_s4 = int_to_ptr.vmem [resolvable:$false] %s6533_s4 }
 0x13a   : > { %s6535_s5 = scalar_lea.vmem %s6534_s4, 128  ;;  %p6536_p9 = scmp.lt.s32.totalorder %s7358_s18, %s6534_s4 }
 0x13b   : > { %p6531_p2 = pnand %p6530_p4, %p7085_p5  ;;  %p6537_p7 = scmp.lt.s32.totalorder %s6535_s5, %s6529_s15 }
 0x13d   : > { %p6532_p6 = pneg %p6531_p2  ;;  %p6538_p10 = por %p6537_p7, %p6536_p9 }
 0x13f   : > { %p6539_p0 = pnand %p6538_p10, %p6532_p6 }
 0x141   : > { %6542 = shalt.err (!%p6539_p0)
}
 0x142   : > { %6079 = dma.hbm_to_vmem [thread:$0]  (%p7085_p5), %s7355_s10, 64, %s7358_s18, %s872_s23, %s8363_s14, %s8363_s14, %s8362_s27  }
 0x143   : > { %s933_s29 = scalar_lea.vmem [#allocation7], %s7109_s7  ;;  %s8375_s30 = sld [smem:[#allocation64_spill]] }
 0x144   : > { %s940_s3 = sshll.u32 %s933_s29, 4  ;;  %s6543_s4 = scalar_lea.hbm %s7364_s21, 64  ;;  %s7394_s3 = int_to_ptr.vmem [resolvable:$true] %s940_s3 }
 0x145   : > { %p6544_p11 = scmp.ne.s32.totalorder %s7364_s21, %s6543_s4  ;;  %s6547_s24 = scalar_lea.hbm %s8374_s19, 128 }
 0x146   : > { %p6548_p3 = scmp.lt.u32.totalorder %s7364_s21, %s8374_s19  ;;  %p6549_p1 = scmp.lt.u32.totalorder %s6547_s24, %s6543_s4 }
 0x147   : > { %p6545_p13 = pnand %p6544_p11, %p7085_p5  ;;  %p6551_p4 = scmp.lt.u32.totalorder %s6543_s4, %s7364_s21 }
 0x148   : > { %p6550_p8 = por %p6549_p1, %p6548_p3 }
 0x149   : > { %s8376_s15 = smov %s8375_s30  ;;  %s7400_s9 = scalar_lea.hbm %s8375_s30, %s7151_s2 }
 0x14a   : > { %p6546_p12 = pneg %p6545_p13  ;;  %p6552_p2 = por %p6551_p4, %p6550_p8 }
 0x14c   : > { %p6553_p6 = pnand %p6552_p2, %p6546_p12 }
 0x14e   : > { %6556 = shalt.err (!%p6553_p6)
}
 0x14f   : > { %s6557_s10 = scalar_lea.vmem %s7394_s3, 64  ;;  %s6878_s16 = smov [#allocation7]  }
 0x150   : > { %p6558_p9 = scmp.ne.s32.totalorder %s7394_s3, %s6557_s10  ;;  %s6561_s18 = sshll.u32 %s6878_s16, 4  ;;  %s6562_s18 = int_to_ptr.vmem [resolvable:$false] %s6561_s18 }
 0x151   : > { %s6563_s26 = scalar_lea.vmem %s6562_s18, 128  ;;  %p6564_p0 = scmp.lt.s32.totalorder %s7394_s3, %s6562_s18 }
 0x152   : > { %p6559_p7 = pnand %p6558_p9, %p7085_p5  ;;  %p6565_p11 = scmp.lt.s32.totalorder %s6563_s26, %s6557_s10 }
 0x154   : > { %p6560_p10 = pneg %p6559_p7  ;;  %p6566_p13 = por %p6565_p11, %p6564_p0 }
 0x156   : > { %p6567_p3 = pnand %p6566_p13, %p6560_p10 }
 0x158   : > { %6570 = shalt.err (!%p6567_p3)
}
 0x159   : > { %s8377_s24 = scalar_lea.sflag [#allocation6], %s7112_s11  ;;  %s978_s29 = scalar_lea.vmem [#allocation10], %s7103_s12 }
 0x15a   : > { %6081 = dma.hbm_to_vmem [thread:$0]  (%p7085_p5), %s7364_s21, 64, %s7394_s3, %s8377_s24, %s8363_s14, %s8363_s14, %s8362_s27  }
 0x15b   : > { %s985_s28 = sshll.u32 %s978_s29, 4  ;;  %s8378_s13 = sld [smem:[#allocation67_spill]]  ;;  %s986_s28 = int_to_ptr.vmem [resolvable:$true] %s985_s28 }
 0x15c   : > { %s6571_s5 = scalar_lea.hbm %s7400_s9, 16  ;;  %s6575_s16 = scalar_lea.hbm %s8376_s15, 32 }
 0x15d   : > { %p6572_p12 = scmp.ne.s32.totalorder %s7400_s9, %s6571_s5  ;;  %p6576_p4 = scmp.lt.u32.totalorder %s7400_s9, %s8376_s15 }
 0x15e   : > { %p6577_p2 = scmp.lt.u32.totalorder %s6575_s16, %s6571_s5  ;;  %p6579_p9 = scmp.lt.u32.totalorder %s6571_s5, %s7400_s9 }
 0x15f   : > { %p6573_p1 = pnand %p6572_p12, %p7085_p5 }
 0x160   : > { %p6578_p6 = por %p6577_p2, %p6576_p4 }
 0x161   : > { %s7433_s4 = scalar_lea.hbm %s8378_s13, %s7106_s8  ;;  %p6574_p8 = pneg %p6573_p1 }
 0x162   : > { %p6580_p7 = por %p6579_p9, %p6578_p6 }
 0x164   : > { %p6581_p10 = pnand %p6580_p7, %p6574_p8 }
 0x166   : > { %6584 = shalt.err (!%p6581_p10)
}
 0x167   : > { %s6585_s21 = scalar_lea.vmem %s986_s28, 16  ;;  %s6879_s3 = smov [#allocation10]  }
 0x168   : > { %p6586_p0 = scmp.ne.s32.totalorder %s986_s28, %s6585_s21  ;;  %s6589_s24 = sshll.u32 %s6879_s3, 4  ;;  %s6590_s24 = int_to_ptr.vmem [resolvable:$false] %s6589_s24 }
 0x169   : > { %s6591_s29 = scalar_lea.vmem %s6590_s24, 32  ;;  %p6592_p3 = scmp.lt.s32.totalorder %s986_s28, %s6590_s24 }
 0x16a   : > { %p6587_p11 = pnand %p6586_p0, %p7085_p5  ;;  %p6593_p12 = scmp.lt.s32.totalorder %s6591_s29, %s6585_s21 }
 0x16c   : > { %p6588_p13 = pneg %p6587_p11  ;;  %p6594_p1 = por %p6593_p12, %p6592_p3 }
 0x16e   : > { %p6595_p2 = pnand %p6594_p1, %p6588_p13 }
 0x170   : > { %6598 = shalt.err (!%p6595_p2)
}
 0x171   : > { %s8379_s0 = scalar_lea.sflag [#allocation9], %s7112_s11  ;;  %s1021_s30 = scalar_lea.vmem [#allocation13], %s7109_s7 }
 0x172   : > { %6083 = dma.hbm_to_vmem [thread:$0]  (%p7085_p5), %s7400_s9, 16, %s986_s28, %s8379_s0  }
 0x173   : > { %s1028_s5 = sshll.u32 %s1021_s30, 4  ;;  %s8380_s17 = sld [smem:[#allocation71_spill]]  ;;  %s7455_s5 = int_to_ptr.vmem [resolvable:$true] %s1028_s5 }
 0x174   : > { %s6599_s18 = scalar_lea.hbm %s7433_s4, 64  ;;  %s6603_s3 = scalar_lea.hbm %s8378_s13, 128 }
 0x175   : > { %p6600_p8 = scmp.ne.s32.totalorder %s7433_s4, %s6599_s18  ;;  %p6604_p9 = scmp.lt.u32.totalorder %s7433_s4, %s8378_s13 }
 0x176   : > { %p6605_p7 = scmp.lt.u32.totalorder %s6603_s3, %s6599_s18  ;;  %p6607_p0 = scmp.lt.u32.totalorder %s6599_s18, %s7433_s4 }
 0x177   : > { %p6601_p4 = pnand %p6600_p8, %p7085_p5 }
 0x178   : > { %p6606_p10 = por %p6605_p7, %p6604_p9 }
 0x179   : > { %s7461_s16 = scalar_lea.hbm %s8380_s17, %s7106_s8  ;;  %p6602_p6 = pneg %p6601_p4 }
 0x17a   : > { %p6608_p11 = por %p6607_p0, %p6606_p10 }
 0x17c   : > { %p6609_p13 = pnand %p6608_p11, %p6602_p6 }
 0x17e   : > { %6612 = shalt.err (!%p6609_p13)
}
 0x17f   : > { %s6613_s8 = scalar_lea.vmem %s7455_s5, 64  ;;  %s6880_s28 = smov [#allocation13]  }
 0x180   : > { %p6614_p3 = scmp.ne.s32.totalorder %s7455_s5, %s6613_s8  ;;  %s6617_s29 = sshll.u32 %s6880_s28, 4  ;;  %s6618_s29 = int_to_ptr.vmem [resolvable:$false] %s6617_s29 }
 0x181   : > { %s6619_s0 = scalar_lea.vmem %s6618_s29, 128  ;;  %p6620_p2 = scmp.lt.s32.totalorder %s7455_s5, %s6618_s29 }
 0x182   : > { %p6615_p12 = pnand %p6614_p3, %p7085_p5  ;;  %p6621_p8 = scmp.lt.s32.totalorder %s6619_s0, %s6613_s8 }
 0x184   : > { %p6616_p1 = pneg %p6615_p12  ;;  %p6622_p4 = por %p6621_p8, %p6620_p2 }
 0x186   : > { %p6623_p9 = pnand %p6622_p4, %p6616_p1 }
 0x188   : > { %6626 = shalt.err (!%p6623_p9)
}
 0x189   : > { %s8381_s30 = scalar_lea.sflag [#allocation12], %s7112_s11  ;;  %s1079_s23 = scalar_lea.vmem [#allocation16], %s7109_s7 }
 0x18a   : > { %6085 = dma.hbm_to_vmem [thread:$0]  (%p7085_p5), %s7433_s4, 64, %s7455_s5, %s8381_s30, %s8363_s14, %s8363_s14, %s8362_s27  }
 0x18b   : > { %s1086_s10 = sshll.u32 %s1079_s23, 4  ;;  %s8382_s20 = sld [smem:[#allocation74_spill]]  ;;  %s7490_s10 = int_to_ptr.vmem [resolvable:$true] %s1086_s10 }
 0x18c   : > { %s6627_s3 = scalar_lea.hbm %s7461_s16, 64  ;;  %s6631_s8 = scalar_lea.hbm %s8380_s17, 128 }
 0x18d   : > { %p6628_p6 = scmp.ne.s32.totalorder %s7461_s16, %s6627_s3  ;;  %p6632_p0 = scmp.lt.u32.totalorder %s7461_s16, %s8380_s17 }
 0x18e   : > { %p6633_p11 = scmp.lt.u32.totalorder %s6631_s8, %s6627_s3  ;;  %p6635_p3 = scmp.lt.u32.totalorder %s6627_s3, %s7461_s16 }
 0x18f   : > { %p6629_p7 = pnand %p6628_p6, %p7085_p5 }
 0x190   : > { %p6634_p13 = por %p6633_p11, %p6632_p0 }
 0x191   : > { %s7496_s21 = scalar_lea.hbm %s8382_s20, %s7151_s2  ;;  %p6630_p10 = pneg %p6629_p7 }
 0x192   : > { %p6636_p12 = por %p6635_p3, %p6634_p13 }
 0x194   : > { %p6637_p1 = pnand %p6636_p12, %p6630_p10 }
 0x196   : > { %6640 = shalt.err (!%p6637_p1)
}
 0x197   : > { %s6641_s7 = scalar_lea.vmem %s7490_s10, 64  ;;  %s6881_s5 = smov [#allocation16]  }
 0x198   : > { %p6642_p2 = scmp.ne.s32.totalorder %s7490_s10, %s6641_s7  ;;  %s6645_s29 = sshll.u32 %s6881_s5, 4  ;;  %s6646_s29 = int_to_ptr.vmem [resolvable:$false] %s6645_s29 }
 0x199   : > { %s6647_s0 = scalar_lea.vmem %s6646_s29, 128  ;;  %p6648_p9 = scmp.lt.s32.totalorder %s7490_s10, %s6646_s29 }
 0x19a   : > { %p6643_p8 = pnand %p6642_p2, %p7085_p5  ;;  %p6649_p6 = scmp.lt.s32.totalorder %s6647_s0, %s6641_s7 }
 0x19c   : > { %p6644_p4 = pneg %p6643_p8  ;;  %p6650_p7 = por %p6649_p6, %p6648_p9 }
 0x19e   : > { %p6651_p0 = pnand %p6650_p7, %p6644_p4 }
 0x1a0   : > { %6654 = shalt.err (!%p6651_p0)
}
 0x1a1   : > { %s8383_s30 = scalar_lea.sflag [#allocation15], %s7112_s11  ;;  %s1124_s23 = scalar_lea.vmem [#allocation19], %s7103_s12 }
 0x1a2   : > { %6087 = dma.hbm_to_vmem [thread:$0]  (%p7085_p5), %s7461_s16, 64, %s7490_s10, %s8383_s30, %s8363_s14, %s8363_s14, %s8362_s27  }
 0x1a3   : > { %s1131_s18 = sshll.u32 %s1124_s23, 4  ;;  %s5361_s26 = sshll.u32 %s7103_s12, 4  ;;  %s1132_s18 = int_to_ptr.vmem [resolvable:$true] %s1131_s18 }
 0x1a4   : > { %s6655_s3 = scalar_lea.hbm %s7496_s21, 16  ;;  %s6659_s8 = scalar_lea.hbm %s8382_s20, 32 }
 0x1a5   : > { %p6656_p10 = scmp.ne.s32.totalorder %s7496_s21, %s6655_s3  ;;  %p6660_p3 = scmp.lt.u32.totalorder %s7496_s21, %s8382_s20 }
 0x1a6   : > { %p6661_p12 = scmp.lt.u32.totalorder %s6659_s8, %s6655_s3  ;;  %p6663_p2 = scmp.lt.u32.totalorder %s6655_s3, %s7496_s21 }
 0x1a7   : > { %p6657_p11 = pnand %p6656_p10, %p7085_p5 }
 0x1a8   : > { %p6662_p1 = por %p6661_p12, %p6660_p3 }
 0x1a9   : > { %p6658_p13 = pneg %p6657_p11 }
 0x1aa   : > { %p6664_p8 = por %p6663_p2, %p6662_p1 }
 0x1ac   : > { %p6665_p4 = pnand %p6664_p8, %p6658_p13 }
 0x1ae   : > { %6668 = shalt.err (!%p6665_p4)
}
 0x1af   : > { %s6669_s27 = scalar_lea.vmem %s1132_s18, 16  ;;  %s6882_s14 = smov [#allocation19]  }
 0x1b0   : > { %p6670_p9 = scmp.ne.s32.totalorder %s1132_s18, %s6669_s27  ;;  %s6673_s16 = sshll.u32 %s6882_s14, 4  ;;  %s6674_s16 = int_to_ptr.vmem [resolvable:$false] %s6673_s16 }
 0x1b1   : > { %s6675_s10 = scalar_lea.vmem %s6674_s16, 32  ;;  %p6676_p0 = scmp.lt.s32.totalorder %s1132_s18, %s6674_s16 }
 0x1b2   : > { %p6671_p6 = pnand %p6670_p9, %p7085_p5  ;;  %p6677_p10 = scmp.lt.s32.totalorder %s6675_s10, %s6669_s27 }
 0x1b4   : > { %p6672_p7 = pneg %p6671_p6  ;;  %p6678_p11 = por %p6677_p10, %p6676_p0 }
 0x1b6   : > { %p6679_p3 = pnand %p6678_p11, %p6672_p7 }
 0x1b8   : > { %6682 = shalt.err (!%p6679_p3)
}
 0x1b9   : > { %s8384_s7 = scalar_lea.sflag [#allocation18], %s7112_s11  ;;  %s5561_s5 = sshll.u32 %s6857_s6, 8 }
 0x1ba   : > { %6089 = dma.hbm_to_vmem [thread:$0]  (%p7085_p5), %s7496_s21, 16, %s1132_s18, %s8384_s7  }
 0x1bb   : > { %s1159_s29 = scalar_lea.vmem [#allocation22], %s5361_s26  ;;  %s8385_s22 = sld [smem:[#allocation76_spill]] }
 0x1bc   : > { %s1166_s0 = sshll.u32 %s1159_s29, 4  ;;  %s7553_s0 = int_to_ptr.vmem [resolvable:$true] %s1166_s0 }
 0x1c1   : > { %s7551_s3 = scalar_lea.hbm %s8385_s22, %s5561_s5  ;;  %s6687_s26 = scalar_lea.hbm %s8385_s22, 512 }
 0x1c2   : > { %s6683_s24 = scalar_lea.hbm %s7551_s3, 256  ;;  %p6688_p2 = scmp.lt.u32.totalorder %s7551_s3, %s8385_s22 }
 0x1c3   : > { %p6684_p13 = scmp.ne.s32.totalorder %s7551_s3, %s6683_s24  ;;  %p6689_p8 = scmp.lt.u32.totalorder %s6687_s26, %s6683_s24 }
 0x1c4   : > { %p6691_p9 = scmp.lt.u32.totalorder %s6683_s24, %s7551_s3 }
 0x1c5   : > { %p6685_p12 = pnand %p6684_p13, %p7085_p5  ;;  %p6690_p4 = por %p6689_p8, %p6688_p2 }
 0x1c7   : > { %p6686_p1 = pneg %p6685_p12  ;;  %p6692_p6 = por %p6691_p9, %p6690_p4 }
 0x1c9   : > { %p6693_p7 = pnand %p6692_p6, %p6686_p1 }
 0x1cb   : > { %6696 = shalt.err (!%p6693_p7)
}
 0x1cc   : > { %s6697_s28 = scalar_lea.vmem %s7553_s0, 256  ;;  %s6883_s4 = smov [#allocation22]  }
 0x1cd   : > { %p6698_p0 = scmp.ne.s32.totalorder %s7553_s0, %s6697_s28  ;;  %s6701_s27 = sshll.u32 %s6883_s4, 4  ;;  %s6702_s27 = int_to_ptr.vmem [resolvable:$false] %s6701_s27 }
 0x1ce   : > { %s6703_s14 = scalar_lea.vmem %s6702_s27, 512  ;;  %p6704_p3 = scmp.lt.s32.totalorder %s7553_s0, %s6702_s27 }
 0x1cf   : > { %p6699_p10 = pnand %p6698_p0, %p7085_p5  ;;  %p6705_p13 = scmp.lt.s32.totalorder %s6703_s14, %s6697_s28 }
 0x1d1   : > { %p6700_p11 = pneg %p6699_p10  ;;  %p6706_p12 = por %p6705_p13, %p6704_p3 }
 0x1d3   : > { %p6707_p2 = pnand %p6706_p12, %p6700_p11 }
 0x1d5   : > { %6710 = shalt.err (!%p6707_p2)
}
 0x1d6   : > { %s6884_s16 = smov 64   ;;  %s6885_s10 = smov 4  }
 0x1d7   : > { %s8386_s7 = scalar_lea.sflag [#allocation21], %s7112_s11  ;;  %s8387_s25 = sld [smem:[#allocation79_spill]] }
 0x1d8   : > { %6091 = dma.hbm_to_vmem [thread:$0]  (%p7085_p5), %s7551_s3, 256, %s7553_s0, %s8386_s7, %s6884_s16, %s6884_s16, %s6885_s10  }
 0x1d9   : > { %s1204_s23 = scalar_lea.vmem [#allocation25], %s7103_s12  ;;  %s8388_s26 = sld [smem:[#allocation81_spill]] }
 0x1da   : > { %s1211_s24 = sshll.u32 %s1204_s23, 4  ;;  %s1212_s24 = int_to_ptr.vmem [resolvable:$true] %s1211_s24 }
 0x1dd   : > { %s7582_s30 = scalar_lea.hbm %s8387_s25, %s7151_s2  ;;  %s6715_s28 = scalar_lea.hbm %s8387_s25, 32 }
 0x1de   : > { %s6711_s8 = scalar_lea.hbm %s7582_s30, 16  ;;  %p6716_p9 = scmp.lt.u32.totalorder %s7582_s30, %s8387_s25 }
 0x1df   : > { %s7589_s9 = scalar_lea.hbm %s8388_s26, %s7151_s2  ;;  %p6712_p1 = scmp.ne.s32.totalorder %s7582_s30, %s6711_s8 }
 0x1e0   : > { %p6717_p6 = scmp.lt.u32.totalorder %s6715_s28, %s6711_s8  ;;  %p6719_p0 = scmp.lt.u32.totalorder %s6711_s8, %s7582_s30 }
 0x1e1   : > { %p6713_p8 = pnand %p6712_p1, %p7085_p5 }
 0x1e2   : > { %p6718_p7 = por %p6717_p6, %p6716_p9 }
 0x1e3   : > { %p6714_p4 = pneg %p6713_p8 }
 0x1e4   : > { %p6720_p10 = por %p6719_p0, %p6718_p7 }
 0x1e6   : > { %p6721_p11 = pnand %p6720_p10, %p6714_p4 }
 0x1e8   : > { %6724 = shalt.err (!%p6721_p11)
}
 0x1e9   : > { %s6725_s2 = scalar_lea.vmem %s1212_s24, 16  ;;  %s6886_s14 = smov [#allocation25]  }
 0x1ea   : > { %p6726_p3 = scmp.ne.s32.totalorder %s1212_s24, %s6725_s2  ;;  %s6729_s16 = sshll.u32 %s6886_s14, 4  ;;  %s6730_s16 = int_to_ptr.vmem [resolvable:$false] %s6729_s16 }
 0x1eb   : > { %s6731_s10 = scalar_lea.vmem %s6730_s16, 32  ;;  %p6732_p2 = scmp.lt.s32.totalorder %s1212_s24, %s6730_s16 }
 0x1ec   : > { %p6727_p13 = pnand %p6726_p3, %p7085_p5  ;;  %p6733_p1 = scmp.lt.s32.totalorder %s6731_s10, %s6725_s2 }
 0x1ee   : > { %p6728_p12 = pneg %p6727_p13  ;;  %p6734_p8 = por %p6733_p1, %p6732_p2 }
 0x1f0   : > { %p6735_p6 = pnand %p6734_p8, %p6728_p12 }
 0x1f2   : > { %6738 = shalt.err (!%p6735_p6)
}
 0x1f3   : > { %s8389_s7 = scalar_lea.sflag [#allocation24], %s7112_s11  ;;  %s1238_s5 = scalar_lea.vmem [#allocation28], %s7103_s12 }
 0x1f4   : > { %6093 = dma.hbm_to_vmem [thread:$0]  (%p7085_p5), %s7582_s30, 16, %s1212_s24, %s8389_s7  }
 0x1f5   : > { %s1245_s29 = sshll.u32 %s1238_s5, 4  ;;  %s6739_s23 = scalar_lea.hbm %s7589_s9, 16  ;;  %s1246_s29 = int_to_ptr.vmem [resolvable:$true] %s1245_s29 }
 0x1f6   : > { %p6740_p4 = scmp.ne.s32.totalorder %s7589_s9, %s6739_s23  ;;  %s6743_s8 = scalar_lea.hbm %s8388_s26, 32 }
 0x1f7   : > { %p6744_p0 = scmp.lt.u32.totalorder %s7589_s9, %s8388_s26  ;;  %p6745_p10 = scmp.lt.u32.totalorder %s6743_s8, %s6739_s23 }
 0x1f8   : > { %p6741_p9 = pnand %p6740_p4, %p7085_p5  ;;  %p6747_p3 = scmp.lt.u32.totalorder %s6739_s23, %s7589_s9 }
 0x1f9   : > { %p6746_p11 = por %p6745_p10, %p6744_p0 }
 0x1fa   : > { %p6742_p7 = pneg %p6741_p9 }
 0x1fb   : > { %p6748_p13 = por %p6747_p3, %p6746_p11 }
 0x1fd   : > { %p6749_p12 = pnand %p6748_p13, %p6742_p7 }
 0x1ff   : > { %6752 = shalt.err (!%p6749_p12)
}
 0x200   : > { %s6753_s12 = scalar_lea.vmem %s1246_s29, 16  ;;  %s6887_s30 = smov [#allocation28]  }
 0x201   : > { %p6754_p2 = scmp.ne.s32.totalorder %s1246_s29, %s6753_s12  ;;  %s6757_s24 = sshll.u32 %s6887_s30, 4  ;;  %s6758_s24 = int_to_ptr.vmem [resolvable:$false] %s6757_s24 }
 0x202   : > { %s6759_s28 = scalar_lea.vmem %s6758_s24, 32  ;;  %p6760_p6 = scmp.lt.s32.totalorder %s1246_s29, %s6758_s24 }
 0x203   : > { %p6755_p1 = pnand %p6754_p2, %p7085_p5  ;;  %p6761_p4 = scmp.lt.s32.totalorder %s6759_s28, %s6753_s12 }
 0x205   : > { %p6756_p8 = pneg %p6755_p1  ;;  %p6762_p9 = por %p6761_p4, %p6760_p6 }
 0x207   : > { %p6763_p0 = pnand %p6762_p9, %p6756_p8 }
 0x209   : > { %6766 = shalt.err (!%p6763_p0)
}
 0x20a   : > { %s8390_s4 = scalar_lea.sflag [#allocation27], %s7112_s11 }
 0x20b   : > { %6095 = dma.hbm_to_vmem [thread:$0]  (%p7085_p5), %s7589_s9, 16, %s1246_s29, %s8390_s4  }
 0x20c PF: > { %s8391_s27 = sld [smem:[#allocation44_spill]] }
 0x212   : > { %p5368_p7 = scmp.ge.s32.totalorder %s8391_s27, 1  ;;  %p1250_p10 = scmp.lt.s32.totalorder %s8391_s27, 5 }
 0x214   : > { %p1251_p11 = pnand %p5368_p7, %p1250_p10 }
 0x216   : > { %1254 = sbr.rel (%p1251_p11) target bundleno = 4420 (0x1144), region = 132 }
 0x21d   : > { %s8392_s2 = sld [smem:[#allocation38_spill]]  ;;  %s8393_s14 = sld [smem:[#allocation48_spill]] }
 0x223   : > { %s7633_s16 = sand.u32 1, %s8392_s2   ;;  %p8394_p3 = scmp.ne.s32.totalorder %s8393_s14, 0 }
 0x224   : > { %s5369_s10 = sshll.u32 %s7633_s16, 2  ;;  %s1257_s7 = scalar_lea.sflag [#allocation4], %s7633_s16 }
 0x225   : > { %s7637_s1 = scalar_lea.vmem [#allocation3], %s5369_s10 }
 0x226   : > { %6800 = dma.done.wait (%p8394_p3), %s1257_s7, 64  }
 0x227   : > { %6802 = vsyncadd (%p8394_p3), %s1257_s7, 4294967232  ;;  %s8395_s11 = sld [smem:[#allocation44_spill]]  ;;  %s7648_s23 = scalar_lea.vmem [#allocation5], %s5369_s10 }
 0x22d   : > { %s8396_s9 = sadd.s32 4294967295, %s8395_s11  }
 0x22e   : > { %s7645_s5 = sand.u32 1, %s8396_s9  }
 0x22f   : > { %s1266_s29 = scalar_lea.sflag [#allocation6], %s7645_s5 }
 0x230   : > { %6804 = dma.done.wait (%p8394_p3), %s1266_s29, 128  }
 0x231   : > { %6806 = vsyncadd (%p8394_p3), %s1266_s29, 4294967168  ;;  %s7654_s21 = scalar_lea.vmem [#allocation7], %s5369_s10  ;;  %s1284_s18 = scalar_lea.sflag [#allocation9], %s7645_s5 }
 0x232   : > { %6808 = dma.done.wait (%p8394_p3), %s1284_s18, 32  }
 0x233   : > { %6810 = vsyncadd (%p8394_p3), %s1284_s18, 4294967264  ;;  %s1300_s3 = scalar_lea.sflag [#allocation12], %s7645_s5 }
 0x234   : > { %6812 = dma.done.wait (%p8394_p3), %s1300_s3, 80  }
 0x235   : > { %6814 = vsyncadd (%p8394_p3), %s1300_s3, 4294967216  ;;  %s7669_s30 = scalar_lea.vmem [#allocation13], %s5369_s10  ;;  %s1317_s24 = scalar_lea.sflag [#allocation15], %s7645_s5 }
 0x236   : > { %8397 = sst [smem:[#allocation49_spill]] %s7669_s30  ;;  %s7672_s28 = scalar_lea.vmem [#allocation14], %s5369_s10 }
 0x237   : > { %8398 = sst [smem:[#allocation50_spill]] %s7672_s28 }
 0x238   : > { %6816 = dma.done.wait (%p8394_p3), %s1317_s24, 128  }
 0x239   : > { %6818 = vsyncadd (%p8394_p3), %s1317_s24, 4294967168  ;;  %s7678_s4 = scalar_lea.vmem [#allocation16], %s5369_s10  ;;  %s1335_s27 = scalar_lea.sflag [#allocation18], %s7645_s5 }
 0x23a   : > { %8399 = sst [smem:[#allocation51_spill]] %s7678_s4 }
 0x23b   : > { %6820 = dma.done.wait (%p8394_p3), %s1335_s27, 32  }
 0x23c   : > { %6822 = vsyncadd (%p8394_p3), %s1335_s27, 4294967264  ;;  %s1351_s11 = scalar_lea.sflag [#allocation21], %s7645_s5 }
 0x23d   : > { %6824 = dma.done.wait (%p8394_p3), %s1351_s11, 272  }
 0x23e   : > { %6826 = vsyncadd (%p8394_p3), %s1351_s11, 4294967024  ;;  %s5375_s10 = sshll.u32 %s7633_s16, 4  ;;  %s1368_s18 = scalar_lea.sflag [#allocation24], %s7645_s5 }
 0x23f   : > { %s7694_s29 = scalar_lea.vmem [#allocation22], %s5375_s10 }
 0x240   : > { %8400 = sst [smem:[#allocation52_spill]] %s7694_s29 }
 0x241   : > { %6828 = dma.done.wait (%p8394_p3), %s1368_s18, 32  }
 0x242   : > { %6830 = vsyncadd (%p8394_p3), %s1368_s18, 4294967264  ;;  %s1384_s27 = scalar_lea.sflag [#allocation27], %s7645_s5 }
 0x243   : > { %6832 = dma.done.wait (%p8394_p3), %s1384_s27, 32  }
 0x244   : > { %6834 = vsyncadd (%p8394_p3), %s1384_s27, 4294967264  ;;  %s8401_s10 = sld [smem:[#allocation41_spill]]  ;;  %s8402_s9 = sld [smem:[#allocation40_spill]] }
 0x245   : > { %s8403_s11 = sld [smem:[#allocation54_spill]]  ;;  %s8405_s17 = sld [smem:[#allocation56_spill]] }
 0x246   : > { %s8406_s22 = sld [smem:[#allocation58_spill]]  ;;  %s8407_s26 = sld [smem:[#allocation60_spill]] }
 0x247   : > { %s8408_s2 = sld [smem:[#allocation62_spill]]  ;;  %s8409_s13 = sld [smem:[#allocation66_spill]] }
 0x248   : > { %s8411_s20 = sld [smem:[#allocation68_spill]]  ;;  %s8412_s24 = sld [smem:[#allocation70_spill]] }
 0x249   : > { %s8413_s6 = sld [smem:[#allocation72_spill]]  ;;  %s8414_s12 = sld [smem:[#allocation78_spill]] }
 0x24a   : > { %p1589_p5 = scmp.lt.s32.totalorder %s8401_s10, 1  ;;  %p1597_p13 = scmp.lt.s32.totalorder %s8402_s9, 1 }
 0x24b   : > { %s8415_s29 = sld [smem:[#allocation82_spill]]  ;;  %p5397_p12 = scmp.ne.s32.totalorder %s8402_s9, 0 }
 0x24c   : > { %s8449_s10 = smov (!%p1589_p5, %s8401_s10), 1  ;;  %vm1653_vm0 = vcmask (!%p5397_p12), 261120  }
 0x24d   : > { %s1598_s18 = scalar_select %p1597_p13, %s8402_s9, 1 }
 0x24e   : > { %s7713_s3 = sshll.u32 %s8449_s10, 2 }
 0x24f   : > { %s1592_s7 = scalar_lea.vmem %s8403_s11, %s7713_s3  ;;  %s5562_s0 = sshll.u32 %s1598_s18, 6 }
 0x250   : > { %s5570_s8 = sshll.u32 %s1598_s18, 5  ;;  %s7726_s19 = scalar_lea.vmem %s8405_s17, %s5562_s0  ;;  %v1651_v0 = vld [vmem:[%s1592_s7] sm:$0xf] (!%p5397_p12) }
 0x251   : > { %s7731_s25 = scalar_lea.vmem %s8406_s22, %s5562_s0  ;;  %s7736_s11 = scalar_lea.vmem %s8407_s26, %s5562_s0  ;;  %v1652_v1 = vunpack.c.l.bf16 (!%p5397_p12), %v1651_v0 }
 0x252   : > { %s7741_s27 = scalar_lea.vmem %s8408_s2, %s5562_s0  ;;  %s7746_s17 = scalar_lea.vmem %s8409_s13, %s5562_s0 }
 0x253   : > { %8410 = sst [smem:[#allocation53_spill]] %s7746_s17  ;;  %s7751_s22 = scalar_lea.vmem %s8411_s20, %s5562_s0  ;;  %1654 = vst.msk [vmem:[#allocation2] sm:$0xff] (!%p5397_p12), %vm1653_vm0, %v1652_v1 }
 0x254   : > { %s7756_s26 = scalar_lea.vmem %s8412_s24, %s5562_s0  ;;  %s7761_s14 = scalar_lea.vmem %s8413_s6, %s5562_s0 }
 0x255   : > { %s7766_s18 = scalar_lea.vmem %s8414_s12, %s5570_s8  ;;  %s1645_s15 = scalar_lea.vmem %s8415_s29, %s7713_s3 }
 0x256   : > { %s1394_s20 = scalar_lea.vmem [#allocation28], %s7633_s16  ;;  %1650 = sbr.rel (%p5397_p12) target bundleno = 605 (0x25d), region = 204 }
 0x25d PF: > { %v6183_v2 = vld [vmem:[%s7726_s19] sm:$0xff]   ;;  %v6888_v3 = vmov 0.0   ;;  %v6184_v4 = vld [vmem:[%s7726_s19 + $0x10] sm:$0xff]   ;;  %v6185_v5 = vld [vmem:[%s7726_s19 + $0x8] sm:$0xff]   ;;  %vm6889_vm1 = vmmov 0   ;;  %vm1771_vm2 = vcmask 261120  }
 0x25e   : > { %5707 = vmatprep.subr.bf16.mxu0 %v6888_v3  ;;  %5715 = vmatprep.subr.bf16.mxu1 %v6888_v3  ;;  %v6186_v6 = vld [vmem:[%s7726_s19 + $0x18] sm:$0xff]   ;;  %v7786_v7 = vld [vmem:[#allocation2] sm:$0xff]  ;;  %v6188_v10 = vld [vmem:[%s7726_s19 + $0x30] sm:$0xff]   ;;  %vm2694_vm3 = vcmask 1043456   ;;  %vm2638_vm5 = vcmask 64512   ;;  %s8420_s0 = sld [smem:[#allocation55_spill]] }
 0x25f   : > { %5708 = vmatpush3.bf16.msra.mxu0 %v6183_v2  ;;  %5711 = vmatprep.mubr.msk.bf16.mxu0 %vm6889_vm1, %v6888_v3  ;;  %v7790_v8 = vpack.c.bf16 %v7786_v7, %v7786_v7  ;;  %v6187_v9 = vld [vmem:[%s7726_s19 + $0x20] sm:$0xff]   ;;  %v6189_v11 = vld [vmem:[%s7726_s19 + $0x28] sm:$0xff]   ;;  %v6190_v12 = vld [vmem:[%s7726_s19 + $0x38] sm:$0xff]   ;;  %s8416_s19 = scalar_lea.vmem [#allocation8], %s7633_s16  ;;  %s8422_s28 = sld [smem:[#allocation50_spill]]  ;;  %vm4729_vm6 = vcmask 523264  }
 0x260   : > { %5716 = vmatpush3.bf16.msra.mxu1 %v6184_v4  ;;  %5709 = vmatprep.subr.bf16.mxu0 %v6888_v3  ;;  %v6191_v13 = vld [vmem:[%s7731_s25] sm:$0xff]   ;;  %v6192_v14 = vld [vmem:[%s7731_s25 + $0x10] sm:$0xff]   ;;  %v6193_v15 = vld [vmem:[%s7731_s25 + $0x8] sm:$0xff]   ;;  %s8423_s4 = sld [smem:[#allocation49_spill]]  ;;  %s8424_s7 = sld [smem:[#allocation51_spill]] }
 0x261   : > { %5717 = vmatprep.subr.bf16.mxu1 %v6888_v3  ;;  %5719 = vmatprep.mubr.msk.bf16.mxu1 %vm6889_vm1, %v6888_v3  ;;  %v6194_v16 = vld [vmem:[%s7731_s25 + $0x18] sm:$0xff]   ;;  %v6195_v17 = vld [vmem:[%s7731_s25 + $0x20] sm:$0xff]   ;;  %v6196_v18 = vld [vmem:[%s7731_s25 + $0x30] sm:$0xff]   ;;  %s8425_s9 = sld [smem:[#allocation52_spill]]  ;;  %s8428_s17 = scalar_lea.vmem [#allocation20], %s7633_s16 }
 0x262   : > { %v6197_v19 = vld [vmem:[%s7731_s25 + $0x28] sm:$0xff]   ;;  %v6198_v20 = vld [vmem:[%s7731_s25 + $0x38] sm:$0xff]   ;;  %v6199_v21 = vld [vmem:[%s7736_s11] sm:$0xff]   ;;  %s8417_s25 = sld [smem:[#allocation53_spill]]  ;;  %s8430_s10 = scalar_lea.vmem [#allocation25], %s7633_s16 }
 0x263   : > { %5710 = vmatpush3.bf16.msra.mxu0 %v6185_v5  ;;  %v6200_v22 = vld [vmem:[%s7736_s11 + $0x10] sm:$0xff]   ;;  %v6201_v23 = vld [vmem:[%s7736_s11 + $0x8] sm:$0xff]   ;;  %v6202_v24 = vld [vmem:[%s7736_s11 + $0x18] sm:$0xff]   ;;  %s8431_s24 = scalar_lea.vmem [#allocation26], %s7633_s16 }
 0x264   : > { %5718 = vmatpush3.bf16.msra.mxu1 %v6186_v6  ;;  %5723 = vmatprep.subr.bf16.mxu0 %v6888_v3  ;;  %v6203_v25 = vld [vmem:[%s7736_s11 + $0x20] sm:$0xff]   ;;  %v6204_v26 = vld [vmem:[%s7736_s11 + $0x30] sm:$0xff]   ;;  %v6205_v27 = vld [vmem:[%s7736_s11 + $0x28] sm:$0xff]   ;;  %s8421_s30 = scalar_lea.vmem %s8420_s0, %s7713_s3 }
 0x265   : > { %5731 = vmatprep.subr.bf16.mxu1 %v6888_v3  ;;  %v6206_v28 = vld [vmem:[%s7736_s11 + $0x38] sm:$0xff]   ;;  %v5414_v45 = vld [vmem:[%s7648_s23] ss:$0 sm:$0xff]  ;;  %v5415_v46 = vld [vmem:[%s7648_s23 + $0x1] ss:$0 sm:$0xff]  ;;  %s8426_s11 = scalar_lea.vmem [#allocation17], %s7633_s16 }
 0x266   : > { %5712 = vmatmul.mubr.msk.bf16.vlgmr.msra.gmra.mrb[0].mxu0 %vm1771_vm2, %v7790_v8  ;;  %v5398_v57 = vld [vmem:[%s7637_s1] ss:$0 sm:$0xff]  ;;  %v5399_v60 = vld [vmem:[%s7637_s1 + $0x1] ss:$0 sm:$0xff]  ;;  %v5416_v63 = vld [vmem:[%s7648_s23 + $0x2] ss:$0 sm:$0xff] }
 0x267   : > { %5720 = vmatmul.mubr.msk.bf16.vlgmr.msra.gmra.mrb[0].mxu1 %vm1771_vm2, %v7790_v8  ;;  %5724 = vmatpush3.bf16.msra.mxu0 %v6187_v9  ;;  %v5417_v1 = vld [vmem:[%s7648_s23 + $0x3] ss:$0 sm:$0xff]  ;;  %s8419_s23 = scalar_lea.vmem [#allocation11], %s7633_s16 }
 0x268   : > { %5732 = vmatpush3.bf16.msra.mxu1 %v6188_v10  ;;  %5725 = vmatprep.subr.bf16.mxu0 %v6888_v3 }
 0x269   : > { %5733 = vmatprep.subr.bf16.mxu1 %v6888_v3  ;;  %5727 = vmatprep.mubr.msk.bf16.mxu0 %vm6889_vm1, %v6888_v3 }
 0x26a   : > { %5735 = vmatprep.mubr.msk.bf16.mxu1 %vm6889_vm1, %v6888_v3 }
 0x26b   : > { %5726 = vmatpush3.bf16.msra.mxu0 %v6189_v11 }
 0x26c   : > { %5734 = vmatpush3.bf16.msra.mxu1 %v6190_v12  ;;  %5739 = vmatprep.subr.bf16.mxu0 %v6888_v3 }
 0x26d   : > { %5747 = vmatprep.subr.bf16.mxu1 %v6888_v3 }
 0x26e   : > { %5728 = vmatmul.mubr.msk.bf16.vlgmr.msra.gmra.mrb[4].mxu0 %vm1771_vm2, %v7790_v8 }
 0x26f   : > { %5736 = vmatmul.mubr.msk.bf16.vlgmr.msra.gmra.mrb[4].mxu1 %vm1771_vm2, %v7790_v8  ;;  %5740 = vmatpush3.bf16.msra.mxu0 %v6191_v13 }
 0x270   : > { %5748 = vmatpush3.bf16.msra.mxu1 %v6192_v14  ;;  %5741 = vmatprep.subr.bf16.mxu0 %v6888_v3 }
 0x271   : > { %5749 = vmatprep.subr.bf16.mxu1 %v6888_v3  ;;  %5743 = vmatprep.mubr.msk.bf16.mxu0 %vm6889_vm1, %v6888_v3 }
 0x272   : > { %5751 = vmatprep.mubr.msk.bf16.mxu1 %vm6889_vm1, %v6888_v3 }
 0x273   : > { %5742 = vmatpush3.bf16.msra.mxu0 %v6193_v15 }
 0x274   : > { %5750 = vmatpush3.bf16.msra.mxu1 %v6194_v16  ;;  %5755 = vmatprep.subr.bf16.mxu0 %v6888_v3 }
 0x275   : > { %5763 = vmatprep.subr.bf16.mxu1 %v6888_v3 }
 0x276   : > { %5744 = vmatmul.mubr.msk.bf16.vlgmr.msra.gmra.mrb[8].mxu0 %vm1771_vm2, %v7790_v8 }
 0x277   : > { %5752 = vmatmul.mubr.msk.bf16.vlgmr.msra.gmra.mrb[8].mxu1 %vm1771_vm2, %v7790_v8  ;;  %5756 = vmatpush3.bf16.msra.mxu0 %v6195_v17  ;;  %v5400_v17 = vld [vmem:[%s7637_s1 + $0x2] ss:$0 sm:$0xff] }
 0x278   : > { %5764 = vmatpush3.bf16.msra.mxu1 %v6196_v18  ;;  %5757 = vmatprep.subr.bf16.mxu0 %v6888_v3 }
 0x279   : > { %5765 = vmatprep.subr.bf16.mxu1 %v6888_v3  ;;  %5759 = vmatprep.mubr.msk.bf16.mxu0 %vm6889_vm1, %v6888_v3 }
 0x27a   : > { %5767 = vmatprep.mubr.msk.bf16.mxu1 %vm6889_vm1, %v6888_v3 }
 0x27b   : > { %5758 = vmatpush3.bf16.msra.mxu0 %v6197_v19 }
 0x27c   : > { %5766 = vmatpush3.bf16.msra.mxu1 %v6198_v20  ;;  %5771 = vmatprep.subr.bf16.mxu0 %v6888_v3  ;;  %v5401_v20 = vld [vmem:[%s7637_s1 + $0x3] ss:$0 sm:$0xff]  ;;  %s8418_s1 = scalar_lea.vmem [#allocation10], %s7633_s16 }
 0x27d   : > { %5779 = vmatprep.subr.bf16.mxu1 %v6888_v3 }
 0x27e   : > { %5760 = vmatmul.mubr.msk.bf16.vlgmr.msra.gmra.mrb[12].mxu0 %vm1771_vm2, %v7790_v8 }
 0x27f   : > { %5768 = vmatmul.mubr.msk.bf16.vlgmr.msra.gmra.mrb[12].mxu1 %vm1771_vm2, %v7790_v8  ;;  %5772 = vmatpush3.bf16.msra.mxu0 %v6199_v21 }
 0x280   : > { %5773 = vmatprep.subr.bf16.mxu0 %v6888_v3  ;;  %5775 = vmatprep.mubr.msk.bf16.mxu0 %vm6889_vm1, %v6888_v3 }
 0x281   : > { %5783 = vmatprep.mubr.msk.bf16.mxu1 %vm6889_vm1, %v6888_v3  ;;  %5780 = vmatpush3.bf16.msra.mxu1 %v6200_v22 }
 0x282   : > { %5781 = vmatprep.subr.bf16.mxu1 %v6888_v3 }
 0x283   : > { %5774 = vmatpush3.bf16.msra.mxu0 %v6201_v23 }
 0x284   : > { %5787 = vmatprep.subr.bf16.mxu0 %v6888_v3 }
 0x285   : > { %5782 = vmatpush3.bf16.msra.mxu1 %v6202_v24 }
 0x286   : > { %5776 = vmatmul.mubr.msk.bf16.vlgmr.msra.gmra.mrb[16].mxu0 %vm1771_vm2, %v7790_v8  ;;  %5795 = vmatprep.subr.bf16.mxu1 %v6888_v3 }
 0x287   : > { %5791 = vmatprep.mubr.msk.bf16.mxu0 %vm6889_vm1, %v6888_v3  ;;  %5788 = vmatpush3.bf16.msra.mxu0 %v6203_v25 }
 0x288   : > { %5784 = vmatmul.mubr.msk.bf16.vlgmr.msra.gmra.mrb[16].mxu1 %vm1771_vm2, %v7790_v8  ;;  %5789 = vmatprep.subr.bf16.mxu0 %v6888_v3 }
 0x289   : > { %5796 = vmatpush3.bf16.msra.mxu1 %v6204_v26  ;;  %5799 = vmatprep.mubr.msk.bf16.mxu1 %vm6889_vm1, %v6888_v3 }
 0x28a   : > { %5797 = vmatprep.subr.bf16.mxu1 %v6888_v3 }
 0x28b   : > { %5790 = vmatpush3.bf16.msra.mxu0 %v6205_v27  ;;  %v5430_v27 = vld [vmem:[%s7654_s21] ss:$0 sm:$0xff] }
 0x28c   : > { %5803 = vmatprep.subr.bf16.mxu0 %v6888_v3 }
 0x28d   : > { %5798 = vmatpush3.bf16.msra.mxu1 %v6206_v28 }
 0x28e   : > { %5809 = vmatprep.subr.bf16.mxu1 %v6888_v3  ;;  %5792 = vmatmul.mubr.msk.bf16.vlgmr.msra.gmra.mrb[20].mxu0 %vm1771_vm2, %v7790_v8 }
 0x28f   : > { %5805 = vmatprep.mubr.msk.bf16.mxu0 %vm6889_vm1, %v6888_v3 }
 0x290   : > { %5800 = vmatmul.mubr.msk.bf16.vlgmr.msra.gmra.mrb[20].mxu1 %vm1771_vm2, %v7790_v8 }
 0x291   : > { %5811 = vmatprep.mubr.msk.bf16.mxu1 %vm6889_vm1, %v6888_v3 }
 0x339   : > { %v1809_v29 = vpop.f32.mrb[0].mxu0 }
 0x33a   : > { %v5713_v30 = vpop.f32.mrb[1].mxu0  ;;  %v1861_v31 = vpop.f32.mrb[0].mxu1  ;;  %v1810_v0 = vadd.f32 %v5398_v57, %v1809_v29  ;;  %v5431_v29 = vld [vmem:[%s7654_s21 + $0x1] ss:$0 sm:$0xff] }
 0x33b   : > { %v1812_v32 = vpop.f32.mrb[2].mxu0  ;;  %v5721_v33 = vpop.f32.mrb[1].mxu1  ;;  %v1862_v2 = vadd.f32 %v5399_v60, %v1861_v31 }
 0x33c   : > { %v5714_v34 = vpop.f32.mrb[3].mxu0  ;;  %v1864_v35 = vpop.f32.mrb[2].mxu1  ;;  %v2435_v12 = vpack.c.bf16 %v1810_v0, %v1810_v0 }
 0x33d   : > { %v5722_v36 = vpop.f32.mrb[3].mxu1  ;;  %v2436_v16 = vpack.c.bf16 %v1862_v2, %v1862_v2 }
 0x341   : > { %v1913_v37 = vpop.f32.mrb[4].mxu0 }
 0x342   : > { %v5729_v38 = vpop.f32.mrb[5].mxu0  ;;  %v1965_v39 = vpop.f32.mrb[4].mxu1  ;;  %v1914_v23 = vadd.f32 %v5400_v17, %v1913_v37 }
 0x343   : > { %v1916_v40 = vpop.f32.mrb[6].mxu0  ;;  %v5737_v41 = vpop.f32.mrb[5].mxu1  ;;  %v1966_v24 = vadd.f32 %v5401_v20, %v1965_v39 }
 0x344   : > { %v5730_v42 = vpop.f32.mrb[7].mxu0  ;;  %v1968_v43 = vpop.f32.mrb[6].mxu1  ;;  %v2437_v25 = vpack.c.bf16 %v1914_v23, %v1914_v23 }
 0x345   : > { %v5738_v44 = vpop.f32.mrb[7].mxu1  ;;  %v2438_v26 = vpack.c.bf16 %v1966_v24, %v1966_v24 }
 0x349   : > { %v2041_v47 = vpop.f32.mrb[8].mxu0 }
 0x34a   : > { %v2042_v48 = vadd.f32 %v5414_v45, %v2041_v47  ;;  %v2093_v49 = vpop.f32.mrb[8].mxu1  ;;  %v5745_v50 = vpop.f32.mrb[9].mxu0 }
 0x34b   : > { %v2094_v51 = vadd.f32 %v5415_v46, %v2093_v49  ;;  %v2044_v52 = vpop.f32.mrb[10].mxu0  ;;  %v5753_v53 = vpop.f32.mrb[9].mxu1 }
 0x34c   : > { %v2439_v54 = vpack.c.bf16 %v2042_v48, %v2042_v48  ;;  %v5746_v55 = vpop.f32.mrb[11].mxu0  ;;  %v2096_v56 = vpop.f32.mrb[10].mxu1 }
 0x34d   : > { %v2440_v58 = vpack.c.bf16 %v2094_v51, %v2094_v51  ;;  %v5754_v59 = vpop.f32.mrb[11].mxu1  ;;  %v2627_v51 = vlaneseq }
 0x34e   : > { %v2447_v61 = vsel %vm1771_vm2, %v2439_v54, 0 }
 0x34f   : > { %v2493_v62 = vsel %vm1771_vm2, %v2440_v58, 0  ;;  %5804 = vmatpush3.bf16.xpose.msra.mxu0 %v2447_v61  ;;  %v2628_v52 = vshrl.u32 %v2627_v51, 7  ;;  %v2630_v53 = vand.u32 127, %v2627_v51 }
 0x350   : > { %5810 = vmatpush3.bf16.xpose.msra.mxu1 %v2493_v62  ;;  %5815 = vmatprep.subr.bf16.mxu0 %v6888_v3 }
 0x351   : > { %v2145_v4 = vpop.f32.mrb[12].mxu0  ;;  %5821 = vmatprep.subr.bf16.mxu1 %v6888_v3  ;;  %vm2631_vm4 = vcmp.ge.s32.totalorder %v2628_v52, %v2630_v53 }
 0x352   : > { %v2146_v5 = vadd.f32 %v5416_v63, %v2145_v4  ;;  %v2197_v6 = vpop.f32.mrb[12].mxu1  ;;  %v5761_v8 = vpop.f32.mrb[13].mxu0 }
 0x353   : > { %v2198_v9 = vadd.f32 %v5417_v1, %v2197_v6  ;;  %v2148_v10 = vpop.f32.mrb[14].mxu0  ;;  %v5769_v11 = vpop.f32.mrb[13].mxu1 }
 0x354   : > { %v2441_v13 = vpack.c.bf16 %v2146_v5, %v2146_v5  ;;  %v5762_v14 = vpop.f32.mrb[15].mxu0  ;;  %v2200_v15 = vpop.f32.mrb[14].mxu1 }
 0x355   : > { %v2442_v18 = vpack.c.bf16 %v2198_v9, %v2198_v9  ;;  %v5770_v19 = vpop.f32.mrb[15].mxu1 }
 0x356   : > { %v2539_v21 = vsel %vm1771_vm2, %v2441_v13, 0  ;;  %5806 = vmatmul.mubr.msk.bf16.vlgmr.msra.gmra.mrb[24].mxu0 %vm1771_vm2, %v2435_v12 }
 0x357   : > { %v2585_v22 = vsel %vm1771_vm2, %v2442_v18, 0  ;;  %5812 = vmatmul.mubr.msk.bf16.vlgmr.msra.gmra.mrb[24].mxu1 %vm1771_vm2, %v2436_v16  ;;  %5816 = vmatpush3.bf16.xpose.msra.mxu0 %v2539_v21 }
 0x358   : > { %5822 = vmatpush3.bf16.xpose.msra.mxu1 %v2585_v22  ;;  %5817 = vmatprep.mubr.msk.bf16.mxu0 %vm6889_vm1, %v6888_v3 }
 0x359   : > { %5823 = vmatprep.mubr.msk.bf16.mxu1 %vm6889_vm1, %v6888_v3  ;;  %5827 = vmatprep.subr.bf16.mxu0 %v6888_v3  ;;  %v2273_v28 = vpop.f32.mrb[16].mxu0 }
 0x35a   : > { %5833 = vmatprep.subr.bf16.mxu1 %v6888_v3  ;;  %v2274_v30 = vadd.f32 %v5430_v27, %v2273_v28  ;;  %v5777_v31 = vpop.f32.mrb[17].mxu0 }
 0x35b   : > { %v2276_v32 = vpop.f32.mrb[18].mxu0  ;;  %v2325_v33 = vpop.f32.mrb[16].mxu1 }
 0x35c   : > { %v2687_v34 = vpack.c.bf16 %v2274_v30, %v2274_v30  ;;  %v5778_v35 = vpop.f32.mrb[19].mxu0  ;;  %v2326_v36 = vadd.f32 %v5431_v29, %v2325_v33  ;;  %v5785_v37 = vpop.f32.mrb[17].mxu1 }
 0x35d   : > { %v2328_v38 = vpop.f32.mrb[18].mxu1 }
 0x35e   : > { %5818 = vmatmul.mubr.msk.bf16.vlgmr.msra.gmra.mrb[28].mxu0 %vm1771_vm2, %v2437_v25  ;;  %v2696_v39 = vsel %vm2694_vm3, %v2687_v34, 0  ;;  %v2688_v40 = vpack.c.bf16 %v2326_v36, %v2326_v36  ;;  %v5786_v41 = vpop.f32.mrb[19].mxu1  ;;  %v5432_v38 = vld [vmem:[%s7654_s21 + $0x2] ss:$0 sm:$0xff] }
 0x35f   : > { %5824 = vmatmul.mubr.msk.bf16.vlgmr.msra.gmra.mrb[28].mxu1 %vm1771_vm2, %v2438_v26  ;;  %5829 = vmatprep.mubr.msk.bf16.mxu0 %vm6889_vm1, %v6888_v3  ;;  %v5433_v41 = vld [vmem:[%s7654_s21 + $0x3] ss:$0 sm:$0xff] }
 0x360   : > { %5835 = vmatprep.mubr.msk.bf16.mxu1 %vm6889_vm1, %v6888_v3  ;;  %5828 = vmatpush3.bf16.msra.mxu0 %v2696_v39  ;;  %v2742_v42 = vsel %vm2694_vm3, %v2688_v40, 0 }
 0x361   : > { %5839 = vmatprep.subr.bf16.mxu0 %v6888_v3  ;;  %5834 = vmatpush3.bf16.msra.mxu1 %v2742_v42  ;;  %v7916_v43 = vpop.f32.mrb[20].mxu0 }
 0x362   : > { %5845 = vmatprep.subr.bf16.mxu1 %v6888_v3  ;;  %v5793_v45 = vpop.f32.mrb[21].mxu0  ;;  %v2378_v39 = vadd.f32 %v5432_v38, %v7916_v43 }
 0x363   : > { %v7918_v44 = vpop.f32.mrb[20].mxu1  ;;  %v2380_v47 = vpop.f32.mrb[22].mxu0 }
 0x364   : > { %v5801_v46 = vpop.f32.mrb[21].mxu1  ;;  %v5794_v49 = vpop.f32.mrb[23].mxu0  ;;  %v2689_v45 = vpack.c.bf16 %v2378_v39, %v2378_v39 }
 0x365   : > { %v2432_v48 = vpop.f32.mrb[22].mxu1  ;;  %v2430_v46 = vadd.f32 %v5433_v41, %v7918_v44 }
 0x366   : > { %v5802_v50 = vpop.f32.mrb[23].mxu1  ;;  %v2788_v51 = vsel %vm2694_vm3, %v2689_v45, 0 }
 0x367   : > { %v2690_v52 = vpack.c.bf16 %v2430_v46, %v2430_v46  ;;  %v5466_v46 = vld [vmem:[%s8416_s19] ss:$0 sm:$0xff] }
 0x429   : > { %v2483_v54 = vpop.f32.mrb[24].mxu0 }
 0x42a   : > { %v2634_v55 = vsel %vm2631_vm4, %v2483_v54, -1e+30  ;;  %v2529_v56 = vpop.f32.mrb[24].mxu1  ;;  %v5807_v57 = vpop.f32.mrb[25].mxu0  ;;  %v2834_v54 = vsel %vm2694_vm3, %v2690_v52, 0 }
 0x42b   : > { %v5813_v58 = vpop.f32.mrb[25].mxu1  ;;  %v2486_v59 = vpop.f32.mrb[26].mxu0  ;;  %v2639_v60 = vsel %vm2638_vm5, %v2634_v55, -inf  ;;  %v2635_v61 = vsel %vm2631_vm4, %v2529_v56, -1e+30  ;;  %v6207_v56 = vld [vmem:[%s7741_s27] sm:$0xff]  }
 0x42c   : > { %v2532_v62 = vpop.f32.mrb[26].mxu1  ;;  %2640 = vmax.xlane.f32.xlu0 %v2639_v60  ;;  %v5808_v63 = vpop.f32.mrb[27].mxu0  ;;  %v2642_v1 = vsel %vm2638_vm5, %v2635_v61, -inf }
 0x42d   : > { %v5814_v0 = vpop.f32.mrb[27].mxu1  ;;  %v6209_v62 = vld [vmem:[%s7741_s27 + $0x10] sm:$0xff]   ;;  %v6210_v63 = vld [vmem:[%s7741_s27 + $0x18] sm:$0xff]  }
 0x430   : > { %2643 = vmax.xlane.f32.xlu0 %v2642_v1  ;;  %v6211_v1 = vld [vmem:[%s7741_s27 + $0x20] sm:$0xff]  }
 0x431   : > { %v2575_v2 = vpop.f32.mrb[28].mxu0 }
 0x432   : > { %v2636_v4 = vsel %vm2631_vm4, %v2575_v2, -1e+30  ;;  %v2621_v5 = vpop.f32.mrb[28].mxu1  ;;  %v5819_v6 = vpop.f32.mrb[29].mxu0 }
 0x433   : > { %v5825_v8 = vpop.f32.mrb[29].mxu1  ;;  %v2578_v9 = vpop.f32.mrb[30].mxu0  ;;  %v2645_v10 = vsel %vm2638_vm5, %v2636_v4, -inf  ;;  %v2637_v11 = vsel %vm2631_vm4, %v2621_v5, -1e+30 }
 0x434   : > { %v2624_v12 = vpop.f32.mrb[30].mxu1  ;;  %2646 = vmax.xlane.f32.xlu1 %v2645_v10  ;;  %v5820_v13 = vpop.f32.mrb[31].mxu0  ;;  %v2648_v15 = vsel %vm2638_vm5, %v2637_v11, -inf  ;;  %v6212_v9 = vld [vmem:[%s7741_s27 + $0x28] sm:$0xff]   ;;  %v6213_v10 = vld [vmem:[%s7741_s27 + $0x30] sm:$0xff]  }
 0x435   : > { %v5826_v14 = vpop.f32.mrb[31].mxu1 }
 0x438   : > { %2649 = vmax.xlane.f32.xlu1 %v2648_v15 }
 0x4b9   : > { %v2641_v16 = vpop.xlane.xlu0 %2640 }
 0x4ba   : > { %v2651_v17 = vsub.f32 %v2634_v55, %v2641_v16  ;;  %v6214_v16 = vld [vmem:[%s7741_s27 + $0x38] sm:$0xff]  }
 0x4bc   : > { %v2655_v18 = vmul.f32 1.442695, %v2651_v17 }
 0x4bd   : > { %v2644_v19 = vpop.xlane.xlu0 %2643 }
 0x4be   : > { %6253 = vpow2.f32 %v2655_v18  ;;  %v2652_v20 = vsub.f32 %v2635_v61, %v2644_v19  ;;  %v6208_v61 = vld [vmem:[%s7741_s27 + $0x8] sm:$0xff]   ;;  %s8427_s27 = scalar_lea.vmem [#allocation19], %s7633_s16 }
 0x4c0   : > { %v2657_v21 = vmul.f32 1.442695, %v2652_v20 }
 0x4c1   : > { %v2647_v22 = vpop.xlane.xlu1 %2646 }
 0x4c2   : > { %6255 = vpow2.f32 %v2657_v21  ;;  %v2653_v23 = vsub.f32 %v2636_v4, %v2647_v22 }
 0x4c4   : > { %v2659_v24 = vmul.f32 1.442695, %v2653_v23 }
 0x4c5   : > { %v2650_v25 = vpop.xlane.xlu1 %2649 }
 0x4c6   : > { %6257 = vpow2.f32 %v2659_v24  ;;  %v2654_v26 = vsub.f32 %v2637_v11, %v2650_v25 }
 0x4c8   : > { %v6254_v27 = vpop.eup %6253  ;;  %v2661_v28 = vmul.f32 1.442695, %v2654_v26 }
 0x4c9   : > { %v2663_v29 = vsel %vm2638_vm5, %v6254_v27, 0.0 }
 0x4ca   : > { %6259 = vpow2.f32 %v2661_v28  ;;  %2664 = vadd.xlane.f32.xlu0 %v2663_v29 }
 0x4cc   : > { %v6256_v30 = vpop.eup %6255 }
 0x4cd   : > { %v2666_v31 = vsel %vm2638_vm5, %v6256_v30, 0.0 }
 0x4ce   : > { %2667 = vadd.xlane.f32.xlu1 %v2666_v31 }
 0x4d0   : > { %v6258_v32 = vpop.eup %6257 }
 0x4d1   : > { %v2669_v33 = vsel %vm2638_vm5, %v6258_v32, 0.0 }
 0x4d2   : > { %2670 = vadd.xlane.f32.xlu0 %v2669_v33 }
 0x4d4   : > { %v6260_v34 = vpop.eup %6259 }
 0x4d5   : > { %v2672_v35 = vsel %vm2638_vm5, %v6260_v34, 0.0 }
 0x4d6   : > { %2673 = vadd.xlane.f32.xlu1 %v2672_v35 }
 0x557   : > { %v2665_v36 = vpop.xlane.xlu0 %2664 }
 0x558   : > { %6261 = vrcp.f32 %v2665_v36 }
 0x55b   : > { %v2668_v37 = vpop.xlane.xlu1 %2667 }
 0x55c   : > { %6263 = vrcp.f32 %v2668_v37 }
 0x55f   : > { %v2671_v40 = vpop.xlane.xlu0 %2670 }
 0x560   : > { %6265 = vrcp.f32 %v2671_v40 }
 0x562   : > { %v6262_v42 = vpop.eup %6261 }
 0x563   : > { %v2679_v47 = vmul.f32 %v6262_v42, %v6254_v27  ;;  %v2674_v48 = vpop.xlane.xlu1 %2673 }
 0x564   : > { %6267 = vrcp.f32 %v2674_v48 }
 0x565   : > { %v2683_v49 = vpack.c.bf16 %v2679_v47, %v2679_v47 }
 0x566   : > { %v6264_v50 = vpop.eup %6263 }
 0x567   : > { %v2680_v53 = vmul.f32 %v6264_v50, %v6256_v30  ;;  %5830 = vmatmul.mubr.msk.bf16.vlgmr.msra.gmra.mrb[32].mxu0 %vm2638_vm5, %v2683_v49 }
 0x568   : > { %5840 = vmatpush3.bf16.msra.mxu0 %v2788_v51  ;;  %5841 = vmatprep.mubr.msk.bf16.mxu0 %vm6889_vm1, %v6888_v3 }
 0x569   : > { %v2684_v43 = vpack.c.bf16 %v2680_v53, %v2680_v53  ;;  %5851 = vmatprep.subr.bf16.mxu0 %v6888_v3 }
 0x56a   : > { %v6266_v44 = vpop.eup %6265 }
 0x56b   : > { %v2681_v55 = vmul.f32 %v6266_v44, %v6258_v32  ;;  %5836 = vmatmul.mubr.msk.bf16.vlgmr.msra.gmra.mrb[32].mxu1 %vm2638_vm5, %v2684_v43 }
 0x56c   : > { %5846 = vmatpush3.bf16.msra.mxu1 %v2834_v54  ;;  %5847 = vmatprep.mubr.msk.bf16.mxu1 %vm6889_vm1, %v6888_v3 }
 0x56d   : > { %v2685_v57 = vpack.c.bf16 %v2681_v55, %v2681_v55  ;;  %5859 = vmatprep.subr.bf16.mxu1 %v6888_v3 }
 0x56e   : > { %v6268_v58 = vpop.eup %6267 }
 0x56f   : > { %v2682_v59 = vmul.f32 %v6268_v58, %v6260_v34  ;;  %5842 = vmatmul.mubr.msk.bf16.vlgmr.msra.gmra.mrb[36].mxu0 %vm2638_vm5, %v2685_v57  ;;  %v6215_v58 = vld [vmem:[%s8417_s25] sm:$0xff]  }
 0x570   : > { %5852 = vmatpush3.bf16.msra.mxu0 %v6207_v56  ;;  %5855 = vmatprep.mubr.msk.bf16.mxu0 %vm6889_vm1, %v6888_v3 }
 0x571   : > { %v2686_v60 = vpack.c.bf16 %v2682_v59, %v2682_v59  ;;  %5853 = vmatprep.subr.bf16.mxu0 %v6888_v3  ;;  %v6216_v59 = vld [vmem:[%s8417_s25 + $0x10] sm:$0xff]  }
 0x573   : > { %5848 = vmatmul.mubr.msk.bf16.vlgmr.msra.gmra.mrb[36].mxu1 %vm2638_vm5, %v2686_v60  ;;  %v6217_v60 = vld [vmem:[%s8417_s25 + $0x8] sm:$0xff]  }
 0x574   : > { %5863 = vmatprep.mubr.msk.bf16.mxu1 %vm6889_vm1, %v6888_v3  ;;  %5854 = vmatpush3.bf16.msra.mxu0 %v6208_v61  ;;  %v6218_v61 = vld [vmem:[%s8417_s25 + $0x18] sm:$0xff]  }
 0x575   : > { %5860 = vmatpush3.bf16.msra.mxu1 %v6209_v62  ;;  %5867 = vmatprep.subr.bf16.mxu0 %v6888_v3 }
 0x576   : > { %5861 = vmatprep.subr.bf16.mxu1 %v6888_v3 }
 0x579   : > { %5862 = vmatpush3.bf16.msra.mxu1 %v6210_v63 }
 0x57a   : > { %5875 = vmatprep.subr.bf16.mxu1 %v6888_v3 }
 0x63a   : > { %v2732_v0 = vpop.f32.mrb[32].mxu0 }
 0x63b   : > { %v2876_v2 = vpack.c.bf16 %v2732_v0, %v2732_v0  ;;  %v5831_v4 = vpop.f32.mrb[33].mxu0 }
 0x63c   : > { %v2735_v5 = vpop.f32.mrb[34].mxu0  ;;  %v5468_v4 = vld [vmem:[%s8419_s23] ss:$0 sm:$0xff] }
 0x63d   : > { %v5832_v6 = vpop.f32.mrb[35].mxu0  ;;  %5856 = vmatmul.mubr.msk.bf16.vlgmr.msra.gmra.mrb[40].mxu0 %vm1771_vm2, %v2876_v2 }
 0x63e   : > { %v2778_v8 = vpop.f32.mrb[32].mxu1  ;;  %5868 = vmatpush3.bf16.msra.mxu0 %v6211_v1  ;;  %5871 = vmatprep.mubr.msk.bf16.mxu0 %vm6889_vm1, %v6888_v3  ;;  %v5467_v1 = vld [vmem:[%s8418_s1] ss:$0 sm:$0xff] }
 0x63f   : > { %v2877_v11 = vpack.c.bf16 %v2778_v8, %v2778_v8  ;;  %v5837_v12 = vpop.f32.mrb[33].mxu1  ;;  %5869 = vmatprep.subr.bf16.mxu0 %v6888_v3  ;;  %v6219_v8 = vld [vmem:[%s8417_s25 + $0x20] sm:$0xff]  }
 0x640   : > { %v2781_v13 = vpop.f32.mrb[34].mxu1  ;;  %v6222_v12 = vld [vmem:[%s8417_s25 + $0x38] sm:$0xff]  }
 0x641   : > { %v5838_v14 = vpop.f32.mrb[35].mxu1  ;;  %5864 = vmatmul.mubr.msk.bf16.vlgmr.msra.gmra.mrb[40].mxu1 %vm1771_vm2, %v2877_v11  ;;  %v6221_v11 = vld [vmem:[%s8417_s25 + $0x28] sm:$0xff]   ;;  %v6223_v13 = vld [vmem:[%s7751_s22] sm:$0xff]  }
 0x642   : > { %v2824_v15 = vpop.f32.mrb[36].mxu0  ;;  %5870 = vmatpush3.bf16.msra.mxu0 %v6212_v9  ;;  %5876 = vmatpush3.bf16.msra.mxu1 %v6213_v10  ;;  %v6220_v9 = vld [vmem:[%s8417_s25 + $0x30] sm:$0xff]  }
 0x643   : > { %v2878_v17 = vpack.c.bf16 %v2824_v15, %v2824_v15  ;;  %v5843_v18 = vpop.f32.mrb[37].mxu0  ;;  %5877 = vmatprep.subr.bf16.mxu1 %v6888_v3  ;;  %5879 = vmatprep.mubr.msk.bf16.mxu1 %vm6889_vm1, %v6888_v3  ;;  %v6224_v14 = vld [vmem:[%s7751_s22 + $0x10] sm:$0xff]   ;;  %v6225_v15 = vld [vmem:[%s7751_s22 + $0x8] sm:$0xff]  }
 0x644   : > { %v2827_v19 = vpop.f32.mrb[38].mxu0  ;;  %5883 = vmatprep.subr.bf16.mxu0 %v6888_v3  ;;  %v6227_v18 = vld [vmem:[%s7751_s22 + $0x20] sm:$0xff]  }
 0x645   : > { %v5844_v20 = vpop.f32.mrb[39].mxu0  ;;  %5872 = vmatmul.mubr.msk.bf16.vlgmr.msra.gmra.mrb[44].mxu0 %vm1771_vm2, %v2878_v17  ;;  %v1656_v17 = vld [vmem:[%s8421_s30] sm:$0xf]  ;;  %v6228_v19 = vld [vmem:[%s7751_s22 + $0x30] sm:$0xff]  }
 0x646   : > { %v2870_v21 = vpop.f32.mrb[36].mxu1  ;;  %5878 = vmatpush3.bf16.msra.mxu1 %v6214_v16  ;;  %5887 = vmatprep.mubr.msk.bf16.mxu0 %vm6889_vm1, %v6888_v3  ;;  %v6226_v16 = vld [vmem:[%s7751_s22 + $0x18] sm:$0xff]   ;;  %v6229_v20 = vld [vmem:[%s7751_s22 + $0x28] sm:$0xff]  }
 0x647   : > { %v2879_v22 = vpack.c.bf16 %v2870_v21, %v2870_v21  ;;  %v5849_v23 = vpop.f32.mrb[37].mxu1  ;;  %5891 = vmatprep.subr.bf16.mxu1 %v6888_v3  ;;  %5884 = vmatpush3.bf16.msra.mxu0 %v6215_v58  ;;  %v6230_v21 = vld [vmem:[%s7751_s22 + $0x38] sm:$0xff]   ;;  %s8429_s22 = scalar_lea.vmem [#allocation23], %s7633_s16 }
 0x648   : > { %v2873_v24 = vpop.f32.mrb[38].mxu1  ;;  %5885 = vmatprep.subr.bf16.mxu0 %v6888_v3  ;;  %v6232_v23 = vld [vmem:[%s7756_s26 + $0x10] sm:$0xff]  }
 0x649   : > { %v5850_v25 = vpop.f32.mrb[39].mxu1  ;;  %5880 = vmatmul.mubr.msk.bf16.vlgmr.msra.gmra.mrb[44].mxu1 %vm1771_vm2, %v2879_v22  ;;  %v6231_v22 = vld [vmem:[%s7756_s26] sm:$0xff]   ;;  %v6233_v24 = vld [vmem:[%s7756_s26 + $0x8] sm:$0xff]  }
 0x64a   : > { %5895 = vmatprep.mubr.msk.bf16.mxu1 %vm6889_vm1, %v6888_v3  ;;  %5892 = vmatpush3.bf16.msra.mxu1 %v6216_v59  ;;  %v6234_v25 = vld [vmem:[%s7756_s26 + $0x18] sm:$0xff]  }
 0x64b   : > { %5893 = vmatprep.subr.bf16.mxu1 %v6888_v3  ;;  %5886 = vmatpush3.bf16.msra.mxu0 %v6217_v60  ;;  %v5469_v60 = vld [vmem:[%s8423_s4] ss:$0 sm:$0xff] }
 0x64c   : > { %5899 = vmatprep.subr.bf16.mxu0 %v6888_v3 }
 0x64e   : > { %5894 = vmatpush3.bf16.msra.mxu1 %v6218_v61  ;;  %v5470_v61 = vld [vmem:[%s8423_s4 + $0x1] ss:$0 sm:$0xff] }
 0x64f   : > { %5907 = vmatprep.subr.bf16.mxu1 %v6888_v3 }
 0x710   : > { %v2929_v26 = vpop.f32.mrb[40].mxu0 }
 0x711   : > { %v5857_v27 = vpop.f32.mrb[41].mxu0  ;;  %v3100_v31 = vsel %vm1771_vm2, %v2929_v26, 0.0  ;;  %v6235_v26 = vld [vmem:[%s7756_s26 + $0x20] sm:$0xff]  }
 0x712   : > { %v2932_v28 = vpop.f32.mrb[42].mxu0  ;;  %v6236_v27 = vld [vmem:[%s7756_s26 + $0x30] sm:$0xff]  }
 0x713   : > { %v5858_v29 = vpop.f32.mrb[43].mxu0  ;;  %v6237_v28 = vld [vmem:[%s7756_s26 + $0x28] sm:$0xff]  }
 0x714   : > { %v2984_v30 = vpop.f32.mrb[40].mxu1  ;;  %v6238_v29 = vld [vmem:[%s7756_s26 + $0x38] sm:$0xff]   ;;  %s8432_s26 = sld [smem:[#allocation40_spill]] }
 0x715   : > { %v3101_v32 = vsel %vm1771_vm2, %v2984_v30, 0.0  ;;  %v5865_v33 = vpop.f32.mrb[41].mxu1 }
 0x716   : > { %v3102_v34 = vadd.f32 %v3101_v32, %v3100_v31  ;;  %v2987_v35 = vpop.f32.mrb[42].mxu1 }
 0x717   : > { %v5866_v36 = vpop.f32.mrb[43].mxu1 }
 0x718   : > { %v3039_v37 = vpop.f32.mrb[44].mxu0 }
 0x719   : > { %v3103_v38 = vsel %vm1771_vm2, %v3039_v37, 0.0  ;;  %v5873_v39 = vpop.f32.mrb[45].mxu0 }
 0x71a   : > { %v3104_v40 = vadd.f32 %v3103_v38, %v3102_v34  ;;  %v3042_v41 = vpop.f32.mrb[46].mxu0  ;;  %p5552_p2 = scmp.ne.s32.totalorder %s8432_s26, 1 }
 0x71b   : > { %v5874_v42 = vpop.f32.mrb[47].mxu0  ;;  %vm4809_vm7 = vcmask (!%p5552_p2), 257024  }
 0x71c   : > { %v3094_v45 = vpop.f32.mrb[44].mxu1 }
 0x71d   : > { %v3105_v47 = vsel %vm1771_vm2, %v3094_v45, 0.0  ;;  %v5881_v48 = vpop.f32.mrb[45].mxu1 }
 0x71e   : > { %v3106_v49 = vadd.f32 %v3105_v47, %v3104_v40  ;;  %v3097_v50 = vpop.f32.mrb[46].mxu1  ;;  %v5485_v48 = vld [vmem:[%s8422_s28] ss:$0 sm:$0xff] }
 0x71f   : > { %v5882_v51 = vpop.f32.mrb[47].mxu1 }
 0x720   : > { %v3113_v52 = vadd.f32 %v5466_v46, %v3106_v49  ;;  %v5486_v49 = vld [vmem:[%s8422_s28 + $0x1] ss:$0 sm:$0xff] }
 0x722   : > { %v3114_v53 = vadd.f32 %v3113_v52, %v7786_v7 }
 0x724   : > { %v3117_v43 = vsel %vm1771_vm2, %v3114_v53, 0.0 }
 0x725   : > { %3118 = vadd.xlane.f32.xlu0 %v3117_v43 }
 0x7b2   : > { %v3119_v44 = vpop.xlane.xlu0 %3118 }
 0x7b3   : > { %v3121_v54 = vmul.f32 0.03125, %v3119_v44 }
 0x7b5   : > { %v3122_v55 = vsub.f32 %v3114_v53, %v3121_v54 }
 0x7b7   : > { %v3123_v56 = vmul.f32 %v3122_v55, %v3122_v55 }
 0x7b9   : > { %v3124_v57 = vsel %vm1771_vm2, %v3123_v56, 0.0 }
 0x7ba   : > { %3125 = vadd.xlane.f32.xlu1 %v3124_v57 }
 0x847   : > { %v3126_v7 = vpop.xlane.xlu1 %3125 }
 0x848   : > { %v3127_v62 = vmul.f32 0.03125, %v3126_v7 }
 0x84a   : > { %v3128_v63 = vadd.f32 1e-05, %v3127_v62 }
 0x84c   : > { %6269 = vrsqrt.f32 %v3128_v63  ;;  %v5487_v63 = vld [vmem:[%s8422_s28 + $0x2] ss:$0 sm:$0xff] }
 0x856   : > { %v6270_v0 = vpop.eup %6269 }
 0x857   : > { %v3130_v2 = vmul.f32 %v6270_v0, %v3122_v55  ;;  %v5488_v0 = vld [vmem:[%s8422_s28 + $0x3] ss:$0 sm:$0xff] }
 0x859   : > { %v3137_v5 = vmul.f32 %v5467_v1, %v3130_v2 }
 0x85b   : > { %v8001_v6 = vadd.f32 %v5468_v4, %v3137_v5 }
 0x85d   : > { %v3222_v10 = vpack.c.bf16 %v8001_v6, %v8001_v6 }
 0x85f   : > { %5888 = vmatmul.mubr.msk.bf16.vlgmr.msra.gmra.mrb[48].mxu0 %vm1771_vm2, %v3222_v10  ;;  %5896 = vmatmul.mubr.msk.bf16.vlgmr.msra.gmra.mrb[48].mxu1 %vm1771_vm2, %v3222_v10 }
 0x860   : > { %5900 = vmatpush3.bf16.msra.mxu0 %v6219_v8  ;;  %5908 = vmatpush3.bf16.msra.mxu1 %v6220_v9 }
 0x861   : > { %5901 = vmatprep.subr.bf16.mxu0 %v6888_v3  ;;  %5909 = vmatprep.subr.bf16.mxu1 %v6888_v3 }
 0x862   : > { %5903 = vmatprep.mubr.msk.bf16.mxu0 %vm6889_vm1, %v6888_v3  ;;  %5911 = vmatprep.mubr.msk.bf16.mxu1 %vm6889_vm1, %v6888_v3 }
 0x864   : > { %5902 = vmatpush3.bf16.msra.mxu0 %v6221_v11  ;;  %5910 = vmatpush3.bf16.msra.mxu1 %v6222_v12 }
 0x865   : > { %5915 = vmatprep.subr.bf16.mxu0 %v6888_v3  ;;  %5923 = vmatprep.subr.bf16.mxu1 %v6888_v3 }
 0x867   : > { %5904 = vmatmul.mubr.msk.bf16.vlgmr.msra.gmra.mrb[52].mxu0 %vm1771_vm2, %v3222_v10  ;;  %5912 = vmatmul.mubr.msk.bf16.vlgmr.msra.gmra.mrb[52].mxu1 %vm1771_vm2, %v3222_v10 }
 0x868   : > { %5916 = vmatpush3.bf16.msra.mxu0 %v6223_v13  ;;  %5924 = vmatpush3.bf16.msra.mxu1 %v6224_v14 }
 0x869   : > { %5917 = vmatprep.subr.bf16.mxu0 %v6888_v3  ;;  %5925 = vmatprep.subr.bf16.mxu1 %v6888_v3 }
 0x86a   : > { %5919 = vmatprep.mubr.msk.bf16.mxu0 %vm6889_vm1, %v6888_v3  ;;  %5927 = vmatprep.mubr.msk.bf16.mxu1 %vm6889_vm1, %v6888_v3 }
 0x86c   : > { %5918 = vmatpush3.bf16.msra.mxu0 %v6225_v15  ;;  %5926 = vmatpush3.bf16.msra.mxu1 %v6226_v16 }
 0x86d   : > { %5931 = vmatprep.subr.bf16.mxu0 %v6888_v3  ;;  %5939 = vmatprep.subr.bf16.mxu1 %v6888_v3 }
 0x86f   : > { %5920 = vmatmul.mubr.msk.bf16.vlgmr.msra.gmra.mrb[56].mxu0 %vm1771_vm2, %v1656_v17  ;;  %5928 = vmatmul.mubr.msk.bf16.vlgmr.msra.gmra.mrb[56].mxu1 %vm1771_vm2, %v1656_v17 }
 0x870   : > { %5932 = vmatpush3.bf16.msra.mxu0 %v6227_v18  ;;  %5940 = vmatpush3.bf16.msra.mxu1 %v6228_v19 }
 0x871   : > { %5933 = vmatprep.subr.bf16.mxu0 %v6888_v3  ;;  %5941 = vmatprep.subr.bf16.mxu1 %v6888_v3 }
 0x872   : > { %5935 = vmatprep.mubr.msk.bf16.mxu0 %vm6889_vm1, %v6888_v3  ;;  %5943 = vmatprep.mubr.msk.bf16.mxu1 %vm6889_vm1, %v6888_v3 }
 0x874   : > { %5934 = vmatpush3.bf16.msra.mxu0 %v6229_v20  ;;  %5942 = vmatpush3.bf16.msra.mxu1 %v6230_v21  ;;  %v5471_v20 = vld [vmem:[%s8423_s4 + $0x2] ss:$0 sm:$0xff]  ;;  %v5472_v21 = vld [vmem:[%s8423_s4 + $0x3] ss:$0 sm:$0xff] }
 0x875   : > { %5947 = vmatprep.subr.bf16.mxu0 %v6888_v3  ;;  %5955 = vmatprep.subr.bf16.mxu1 %v6888_v3 }
 0x877   : > { %5936 = vmatmul.mubr.msk.bf16.vlgmr.msra.gmra.mrb[60].mxu0 %vm1771_vm2, %v1656_v17  ;;  %5944 = vmatmul.mubr.msk.bf16.vlgmr.msra.gmra.mrb[60].mxu1 %vm1771_vm2, %v1656_v17 }
 0x878   : > { %5948 = vmatpush3.bf16.msra.mxu0 %v6231_v22  ;;  %5951 = vmatprep.mubr.msk.bf16.mxu0 %vm6889_vm1, %v6888_v3 }
 0x879   : > { %5949 = vmatprep.subr.bf16.mxu0 %v6888_v3  ;;  %5959 = vmatprep.mubr.msk.bf16.mxu1 %vm6889_vm1, %v6888_v3 }
 0x87a   : > { %5956 = vmatpush3.bf16.msra.mxu1 %v6232_v23 }
 0x87b   : > { %5957 = vmatprep.subr.bf16.mxu1 %v6888_v3 }
 0x87c   : > { %5950 = vmatpush3.bf16.msra.mxu0 %v6233_v24 }
 0x87d   : > { %5963 = vmatprep.subr.bf16.mxu0 %v6888_v3 }
 0x87e   : > { %5958 = vmatpush3.bf16.msra.mxu1 %v6234_v25 }
 0x87f   : > { %5952 = vmatmul.mubr.msk.bf16.vlgmr.msra.gmra.mrb[64].mxu0 %vm1771_vm2, %v1656_v17  ;;  %5971 = vmatprep.subr.bf16.mxu1 %v6888_v3 }
 0x880   : > { %5967 = vmatprep.mubr.msk.bf16.mxu0 %vm6889_vm1, %v6888_v3  ;;  %5964 = vmatpush3.bf16.msra.mxu0 %v6235_v26 }
 0x881   : > { %5960 = vmatmul.mubr.msk.bf16.vlgmr.msra.gmra.mrb[64].mxu1 %vm1771_vm2, %v1656_v17  ;;  %5965 = vmatprep.subr.bf16.mxu0 %v6888_v3 }
 0x882   : > { %5972 = vmatpush3.bf16.msra.mxu1 %v6236_v27  ;;  %5975 = vmatprep.mubr.msk.bf16.mxu1 %vm6889_vm1, %v6888_v3 }
 0x883   : > { %5973 = vmatprep.subr.bf16.mxu1 %v6888_v3 }
 0x884   : > { %5966 = vmatpush3.bf16.msra.mxu0 %v6237_v28  ;;  %v5501_v28 = vld [vmem:[%s8424_s7] ss:$0 sm:$0xff] }
 0x885   : > { %5979 = vmatprep.subr.bf16.mxu0 %v6888_v3 }
 0x886   : > { %5974 = vmatpush3.bf16.msra.mxu1 %v6238_v29 }
 0x887   : > { %5985 = vmatprep.subr.bf16.mxu1 %v6888_v3  ;;  %5968 = vmatmul.mubr.msk.bf16.vlgmr.msra.gmra.mrb[68].mxu0 %vm1771_vm2, %v1656_v17 }
 0x888   : > { %5981 = vmatprep.mubr.msk.bf16.mxu0 %vm6889_vm1, %v6888_v3 }
 0x889   : > { %5976 = vmatmul.mubr.msk.bf16.vlgmr.msra.gmra.mrb[68].mxu1 %vm1771_vm2, %v1656_v17 }
 0x88a   : > { %5987 = vmatprep.mubr.msk.bf16.mxu1 %vm6889_vm1, %v6888_v3 }
 0x932   : > { %v3296_v30 = vpop.f32.mrb[48].mxu0  ;;  %v3348_v31 = vpop.f32.mrb[48].mxu1 }
 0x933   : > { %v5889_v32 = vpop.f32.mrb[49].mxu0  ;;  %v5897_v33 = vpop.f32.mrb[49].mxu1  ;;  %v3297_v1 = vadd.f32 %v5469_v60, %v3296_v30  ;;  %v3349_v2 = vadd.f32 %v5470_v61, %v3348_v31  ;;  %v5502_v30 = vld [vmem:[%s8424_s7 + $0x1] ss:$0 sm:$0xff] }
 0x934   : > { %v3299_v34 = vpop.f32.mrb[50].mxu0  ;;  %v3351_v35 = vpop.f32.mrb[50].mxu1 }
 0x935   : > { %v5890_v36 = vpop.f32.mrb[51].mxu0  ;;  %v5898_v37 = vpop.f32.mrb[51].mxu1  ;;  %v3925_v14 = vpack.c.bf16 %v3297_v1, %v3297_v1  ;;  %v3926_v15 = vpack.c.bf16 %v3349_v2, %v3349_v2 }
 0x93a   : > { %v3400_v38 = vpop.f32.mrb[52].mxu0  ;;  %v3452_v39 = vpop.f32.mrb[52].mxu1 }
 0x93b   : > { %v5905_v40 = vpop.f32.mrb[53].mxu0  ;;  %v5913_v41 = vpop.f32.mrb[53].mxu1  ;;  %v3401_v24 = vadd.f32 %v5471_v20, %v3400_v38  ;;  %v3453_v25 = vadd.f32 %v5472_v21, %v3452_v39 }
 0x93c   : > { %v3403_v42 = vpop.f32.mrb[54].mxu0  ;;  %v3455_v45 = vpop.f32.mrb[54].mxu1 }
 0x93d   : > { %v5906_v46 = vpop.f32.mrb[55].mxu0  ;;  %v5914_v47 = vpop.f32.mrb[55].mxu1  ;;  %v3927_v26 = vpack.c.bf16 %v3401_v24, %v3401_v24  ;;  %v3928_v27 = vpack.c.bf16 %v3453_v25, %v3453_v25 }
 0x942   : > { %v3531_v50 = vpop.f32.mrb[56].mxu0  ;;  %v3583_v51 = vpop.f32.mrb[56].mxu1 }
 0x943   : > { %v3532_v52 = vadd.f32 %v5485_v48, %v3531_v50  ;;  %v3584_v53 = vadd.f32 %v5486_v49, %v3583_v51  ;;  %v5921_v43 = vpop.f32.mrb[57].mxu0  ;;  %v5929_v44 = vpop.f32.mrb[57].mxu1 }
 0x944   : > { %v3534_v54 = vpop.f32.mrb[58].mxu0  ;;  %v3586_v55 = vpop.f32.mrb[58].mxu1 }
 0x945   : > { %v3929_v56 = vpack.c.bf16 %v3532_v52, %v3532_v52  ;;  %v3930_v57 = vpack.c.bf16 %v3584_v53, %v3584_v53  ;;  %v5922_v58 = vpop.f32.mrb[59].mxu0  ;;  %v5930_v59 = vpop.f32.mrb[59].mxu1 }
 0x947   : > { %v3937_v7 = vsel %vm1771_vm2, %v3929_v56, 0  ;;  %v3983_v62 = vsel %vm1771_vm2, %v3930_v57, 0 }
 0x948   : > { %5980 = vmatpush3.bf16.xpose.msra.mxu0 %v3937_v7  ;;  %5986 = vmatpush3.bf16.xpose.msra.mxu1 %v3983_v62 }
 0x949   : > { %5991 = vmatprep.subr.bf16.mxu0 %v6888_v3  ;;  %5997 = vmatprep.subr.bf16.mxu1 %v6888_v3 }
 0x94a   : > { %v3635_v4 = vpop.f32.mrb[60].mxu0  ;;  %v3687_v5 = vpop.f32.mrb[60].mxu1 }
 0x94b   : > { %v3636_v8 = vadd.f32 %v5487_v63, %v3635_v4  ;;  %v3688_v9 = vadd.f32 %v5488_v0, %v3687_v5  ;;  %v5937_v10 = vpop.f32.mrb[61].mxu0  ;;  %v5945_v11 = vpop.f32.mrb[61].mxu1 }
 0x94c   : > { %v3638_v12 = vpop.f32.mrb[62].mxu0  ;;  %v3690_v13 = vpop.f32.mrb[62].mxu1 }
 0x94d   : > { %v3931_v16 = vpack.c.bf16 %v3636_v8, %v3636_v8  ;;  %v3932_v17 = vpack.c.bf16 %v3688_v9, %v3688_v9  ;;  %v5938_v18 = vpop.f32.mrb[63].mxu0  ;;  %v5946_v19 = vpop.f32.mrb[63].mxu1 }
 0x94f   : > { %v4029_v22 = vsel %vm1771_vm2, %v3931_v16, 0  ;;  %v4075_v23 = vsel %vm1771_vm2, %v3932_v17, 0  ;;  %5982 = vmatmul.mubr.msk.bf16.vlgmr.msra.gmra.mrb[72].mxu0 %vm1771_vm2, %v3925_v14  ;;  %5988 = vmatmul.mubr.msk.bf16.vlgmr.msra.gmra.mrb[72].mxu1 %vm1771_vm2, %v3926_v15 }
 0x950   : > { %5992 = vmatpush3.bf16.xpose.msra.mxu0 %v4029_v22  ;;  %5998 = vmatpush3.bf16.xpose.msra.mxu1 %v4075_v23 }
 0x951   : > { %5993 = vmatprep.mubr.msk.bf16.mxu0 %vm6889_vm1, %v6888_v3  ;;  %5999 = vmatprep.mubr.msk.bf16.mxu1 %vm6889_vm1, %v6888_v3 }
 0x952   : > { %6003 = vmatprep.subr.bf16.mxu0 %v6888_v3  ;;  %6009 = vmatprep.subr.bf16.mxu1 %v6888_v3  ;;  %v3763_v29 = vpop.f32.mrb[64].mxu0 }
 0x953   : > { %v3764_v31 = vadd.f32 %v5501_v28, %v3763_v29  ;;  %v5953_v32 = vpop.f32.mrb[65].mxu0 }
 0x954   : > { %v3766_v33 = vpop.f32.mrb[66].mxu0  ;;  %v3815_v34 = vpop.f32.mrb[64].mxu1  ;;  %v5504_v32 = vld [vmem:[%s8424_s7 + $0x3] ss:$0 sm:$0xff] }
 0x955   : > { %v4165_v35 = vpack.c.bf16 %v3764_v31, %v3764_v31  ;;  %v3816_v36 = vadd.f32 %v5502_v30, %v3815_v34  ;;  %v5954_v37 = vpop.f32.mrb[67].mxu0  ;;  %v5961_v38 = vpop.f32.mrb[65].mxu1  ;;  %v5503_v33 = vld [vmem:[%s8424_s7 + $0x2] ss:$0 sm:$0xff] }
 0x956   : > { %v3818_v39 = vpop.f32.mrb[66].mxu1 }
 0x957   : > { %5994 = vmatmul.mubr.msk.bf16.vlgmr.msra.gmra.mrb[76].mxu0 %vm1771_vm2, %v3927_v26  ;;  %6000 = vmatmul.mubr.msk.bf16.vlgmr.msra.gmra.mrb[76].mxu1 %vm1771_vm2, %v3928_v27  ;;  %v4173_v40 = vsel %vm2694_vm3, %v4165_v35, 0  ;;  %v4166_v41 = vpack.c.bf16 %v3816_v36, %v3816_v36  ;;  %v5962_v42 = vpop.f32.mrb[67].mxu1 }
 0x958   : > { %6005 = vmatprep.mubr.msk.bf16.mxu0 %vm6889_vm1, %v6888_v3  ;;  %6011 = vmatprep.mubr.msk.bf16.mxu1 %vm6889_vm1, %v6888_v3 }
 0x959   : > { %6004 = vmatpush3.bf16.msra.mxu0 %v4173_v40  ;;  %v4219_v45 = vsel %vm2694_vm3, %v4166_v41, 0 }
 0x95a   : > { %6015 = vmatprep.subr.bf16.mxu0 %v6888_v3  ;;  %6010 = vmatpush3.bf16.msra.mxu1 %v4219_v45  ;;  %v8120_v46 = vpop.f32.mrb[68].mxu0 }
 0x95b   : > { %6021 = vmatprep.subr.bf16.mxu1 %v6888_v3  ;;  %v5969_v48 = vpop.f32.mrb[69].mxu0  ;;  %v3868_v36 = vadd.f32 %v5503_v33, %v8120_v46 }
 0x95c   : > { %v8122_v47 = vpop.f32.mrb[68].mxu1  ;;  %v3870_v50 = vpop.f32.mrb[70].mxu0 }
 0x95d   : > { %v5977_v49 = vpop.f32.mrb[69].mxu1  ;;  %v5970_v52 = vpop.f32.mrb[71].mxu0  ;;  %v3920_v34 = vadd.f32 %v5504_v32, %v8122_v47  ;;  %v4167_v42 = vpack.c.bf16 %v3868_v36, %v3868_v36 }
 0x95e   : > { %v3922_v51 = vpop.f32.mrb[70].mxu1 }
 0x95f   : > { %v5978_v53 = vpop.f32.mrb[71].mxu1  ;;  %v4168_v40 = vpack.c.bf16 %v3920_v34, %v3920_v34  ;;  %v4265_v47 = vsel %vm2694_vm3, %v4167_v42, 0 }
 0x961   : > { %v4311_v50 = vsel %vm2694_vm3, %v4168_v40, 0  ;;  %v5537_v40 = vld [vmem:[%s8426_s11] ss:$0 sm:$0xff] }
 0xa22   : > { %v3973_v43 = vpop.f32.mrb[72].mxu0  ;;  %v4019_v44 = vpop.f32.mrb[72].mxu1 }
 0xa23   : > { %v5983_v54 = vpop.f32.mrb[73].mxu0  ;;  %v5989_v55 = vpop.f32.mrb[73].mxu1  ;;  %v4120_v56 = vsel %vm2638_vm5, %v4019_v44, -inf  ;;  %v4117_v57 = vsel %vm2638_vm5, %v3973_v43, -inf }
 0xa24   : > { %4121 = vmax.xlane.f32.xlu1 %v4120_v56  ;;  %v4022_v58 = vpop.f32.mrb[74].mxu1  ;;  %4118 = vmax.xlane.f32.xlu0 %v4117_v57  ;;  %v3976_v59 = vpop.f32.mrb[74].mxu0  ;;  %v6239_v54 = vld [vmem:[%s7761_s14] sm:$0xff]   ;;  %v6241_v56 = vld [vmem:[%s7761_s14 + $0x8] sm:$0xff]   ;;  %v6242_v57 = vld [vmem:[%s7761_s14 + $0x18] sm:$0xff]  }
 0xa25   : > { %v5984_v60 = vpop.f32.mrb[75].mxu0  ;;  %v5990_v61 = vpop.f32.mrb[75].mxu1  ;;  %v6244_v59 = vld [vmem:[%s7761_s14 + $0x30] sm:$0xff]  }
 0xa2a   : > { %v4065_v7 = vpop.f32.mrb[76].mxu0  ;;  %v4111_v62 = vpop.f32.mrb[76].mxu1 }
 0xa2b   : > { %v5995_v63 = vpop.f32.mrb[77].mxu0  ;;  %v6001_v0 = vpop.f32.mrb[77].mxu1  ;;  %v4126_v1 = vsel %vm2638_vm5, %v4111_v62, -inf  ;;  %v4123_v2 = vsel %vm2638_vm5, %v4065_v7, -inf }
 0xa2c   : > { %4127 = vmax.xlane.f32.xlu1 %v4126_v1  ;;  %v4114_v4 = vpop.f32.mrb[78].mxu1  ;;  %4124 = vmax.xlane.f32.xlu0 %v4123_v2  ;;  %v4068_v5 = vpop.f32.mrb[78].mxu0 }
 0xa2d   : > { %v5996_v8 = vpop.f32.mrb[79].mxu0  ;;  %v6002_v9 = vpop.f32.mrb[79].mxu1 }
 0xa2e   : > { %v6246_v8 = vld [vmem:[%s7761_s14 + $0x38] sm:$0xff]   ;;  %v6245_v9 = vld [vmem:[%s7761_s14 + $0x28] sm:$0xff]  }
 0xab1   : > { %v4122_v10 = vpop.xlane.xlu1 %4121  ;;  %v4119_v11 = vpop.xlane.xlu0 %4118 }
 0xab2   : > { %v4130_v12 = vsub.f32 %v4019_v44, %v4122_v10  ;;  %v4129_v13 = vsub.f32 %v3973_v43, %v4119_v11  ;;  %v6240_v43 = vld [vmem:[%s7761_s14 + $0x10] sm:$0xff]  }
 0xab4   : > { %v4135_v14 = vmul.f32 1.442695, %v4130_v12  ;;  %v4133_v15 = vmul.f32 1.442695, %v4129_v13 }
 0xab6   : > { %6271 = vpow2.f32 %v4135_v14 }
 0xab7   : > { %6273 = vpow2.f32 %v4133_v15 }
 0xab9   : > { %v4128_v16 = vpop.xlane.xlu1 %4127  ;;  %v4125_v17 = vpop.xlane.xlu0 %4124 }
 0xaba   : > { %v4132_v18 = vsub.f32 %v4111_v62, %v4128_v16  ;;  %v4131_v19 = vsub.f32 %v4065_v7, %v4125_v17  ;;  %v6243_v62 = vld [vmem:[%s7761_s14 + $0x20] sm:$0xff]  }
 0xabc   : > { %v4139_v20 = vmul.f32 1.442695, %v4132_v18  ;;  %v4137_v21 = vmul.f32 1.442695, %v4131_v19 }
 0xabe   : > { %6275 = vpow2.f32 %v4139_v20 }
 0xabf   : > { %6277 = vpow2.f32 %v4137_v21 }
 0xac0   : > { %v6272_v22 = vpop.eup %6271 }
 0xac1   : > { %v6274_v23 = vpop.eup %6273  ;;  %v4144_v24 = vsel %vm2638_vm5, %v6272_v22, 0.0 }
 0xac2   : > { %4145 = vadd.xlane.f32.xlu1 %v4144_v24  ;;  %v4141_v25 = vsel %vm2638_vm5, %v6274_v23, 0.0 }
 0xac3   : > { %4142 = vadd.xlane.f32.xlu0 %v4141_v25 }
 0xac8   : > { %v6276_v26 = vpop.eup %6275 }
 0xac9   : > { %v6278_v27 = vpop.eup %6277  ;;  %v4150_v28 = vsel %vm2638_vm5, %v6276_v26, 0.0 }
 0xaca   : > { %4151 = vadd.xlane.f32.xlu1 %v4150_v28  ;;  %v4147_v29 = vsel %vm2638_vm5, %v6278_v27, 0.0 }
 0xacb   : > { %4148 = vadd.xlane.f32.xlu0 %v4147_v29 }
 0xb4f   : > { %v4146_v30 = vpop.xlane.xlu1 %4145 }
 0xb50   : > { %6279 = vrcp.f32 %v4146_v30  ;;  %v4143_v31 = vpop.xlane.xlu0 %4142 }
 0xb51   : > { %6281 = vrcp.f32 %v4143_v31 }
 0xb57   : > { %v4152_v35 = vpop.xlane.xlu1 %4151 }
 0xb58   : > { %6283 = vrcp.f32 %v4152_v35  ;;  %v4149_v37 = vpop.xlane.xlu0 %4148 }
 0xb59   : > { %6285 = vrcp.f32 %v4149_v37 }
 0xb5a   : > { %v6280_v38 = vpop.eup %6279 }
 0xb5b   : > { %v6282_v39 = vpop.eup %6281  ;;  %v4158_v41 = vmul.f32 %v6280_v38, %v6272_v22 }
 0xb5c   : > { %v4157_v45 = vmul.f32 %v6282_v39, %v6274_v23 }
 0xb5d   : > { %v4162_v48 = vpack.c.bf16 %v4158_v41, %v4158_v41 }
 0xb5e   : > { %v4161_v49 = vpack.c.bf16 %v4157_v45, %v4157_v45 }
 0xb5f   : > { %6012 = vmatmul.mubr.msk.bf16.vlgmr.msra.gmra.mrb[80].mxu1 %vm2638_vm5, %v4162_v48 }
 0xb60   : > { %6006 = vmatmul.mubr.msk.bf16.vlgmr.msra.gmra.mrb[80].mxu0 %vm2638_vm5, %v4161_v49  ;;  %6022 = vmatpush3.bf16.msra.mxu1 %v4311_v50 }
 0xb61   : > { %6016 = vmatpush3.bf16.msra.mxu0 %v4265_v47  ;;  %6017 = vmatprep.mubr.msk.bf16.mxu0 %vm6889_vm1, %v6888_v3 }
 0xb62   : > { %v6284_v46 = vpop.eup %6283  ;;  %6023 = vmatprep.mubr.msk.bf16.mxu1 %vm6889_vm1, %v6888_v3  ;;  %6027 = vmatprep.subr.bf16.mxu0 %v6888_v3 }
 0xb63   : > { %v6286_v51 = vpop.eup %6285  ;;  %v4160_v52 = vmul.f32 %v6284_v46, %v6276_v26  ;;  %6035 = vmatprep.subr.bf16.mxu1 %v6888_v3 }
 0xb64   : > { %v4159_v53 = vmul.f32 %v6286_v51, %v6278_v27 }
 0xb65   : > { %v4164_v44 = vpack.c.bf16 %v4160_v52, %v4160_v52 }
 0xb66   : > { %v4163_v55 = vpack.c.bf16 %v4159_v53, %v4159_v53 }
 0xb67   : > { %6024 = vmatmul.mubr.msk.bf16.vlgmr.msra.gmra.mrb[84].mxu1 %vm2638_vm5, %v4164_v44  ;;  %v6248_v44 = vld [vmem:[%s8425_s9 + $0x8] sm:$0xff]  }
 0xb68   : > { %6018 = vmatmul.mubr.msk.bf16.vlgmr.msra.gmra.mrb[84].mxu0 %vm2638_vm5, %v4163_v55  ;;  %6036 = vmatpush3.bf16.msra.mxu1 %v6240_v43  ;;  %v6247_v43 = vld [vmem:[%s8425_s9] sm:$0xff]  }
 0xb69   : > { %6028 = vmatpush3.bf16.msra.mxu0 %v6239_v54  ;;  %6037 = vmatprep.subr.bf16.mxu1 %v6888_v3  ;;  %v6250_v54 = vld [vmem:[%s7766_s18 + $0x8] sm:$0xff]  }
 0xb6a   : > { %6029 = vmatprep.subr.bf16.mxu0 %v6888_v3  ;;  %6031 = vmatprep.mubr.msk.bf16.mxu0 %vm6889_vm1, %v6888_v3 }
 0xb6b   : > { %6039 = vmatprep.mubr.msk.bf16.mxu1 %vm6889_vm1, %v6888_v3 }
 0xb6c   : > { %6038 = vmatpush3.bf16.msra.mxu1 %v6242_v57 }
 0xb6d   : > { %6030 = vmatpush3.bf16.msra.mxu0 %v6241_v56  ;;  %6051 = vmatprep.subr.bf16.mxu1 %v6888_v3 }
 0xb6e   : > { %6043 = vmatprep.subr.bf16.mxu0 %v6888_v3 }
 0xc32   : > { %v4255_v58 = vpop.f32.mrb[80].mxu1 }
 0xc33   : > { %v4209_v60 = vpop.f32.mrb[80].mxu0  ;;  %v4354_v61 = vpack.c.bf16 %v4255_v58, %v4255_v58  ;;  %v6013_v7 = vpop.f32.mrb[81].mxu1 }
 0xc34   : > { %v4353_v63 = vpack.c.bf16 %v4209_v60, %v4209_v60  ;;  %v6007_v0 = vpop.f32.mrb[81].mxu0  ;;  %v4258_v1 = vpop.f32.mrb[82].mxu1 }
 0xc35   : > { %v4212_v2 = vpop.f32.mrb[82].mxu0  ;;  %v6014_v4 = vpop.f32.mrb[83].mxu1  ;;  %6040 = vmatmul.mubr.msk.bf16.vlgmr.msra.gmra.mrb[88].mxu1 %vm1771_vm2, %v4354_v61  ;;  %v5539_v61 = vld [vmem:[%s8428_s17] ss:$0 sm:$0xff]  ;;  %v6251_v0 = vld [vmem:[%s7766_s18 + $0x10] sm:$0xff]   ;;  %v6252_v1 = vld [vmem:[%s7766_s18 + $0x18] sm:$0xff]  }
 0xc36   : > { %v6008_v5 = vpop.f32.mrb[83].mxu0  ;;  %6032 = vmatmul.mubr.msk.bf16.vlgmr.msra.gmra.mrb[88].mxu0 %vm1771_vm2, %v4353_v63  ;;  %6052 = vmatpush3.bf16.msra.mxu1 %v6244_v59  ;;  %v5538_v59 = vld [vmem:[%s8427_s27] ss:$0 sm:$0xff] }
 0xc37   : > { %6044 = vmatpush3.bf16.msra.mxu0 %v6243_v62  ;;  %6053 = vmatprep.subr.bf16.mxu1 %v6888_v3  ;;  %v5540_v2 = vld [vmem:[%s8429_s22] ss:$0 sm:$0xff] }
 0xc38   : > { %6045 = vmatprep.subr.bf16.mxu0 %v6888_v3  ;;  %6047 = vmatprep.mubr.msk.bf16.mxu0 %vm6889_vm1, %v6888_v3 }
 0xc39   : > { %6055 = vmatprep.mubr.msk.bf16.mxu1 %vm6889_vm1, %v6888_v3 }
 0xc3a   : > { %v4347_v10 = vpop.f32.mrb[84].mxu1  ;;  %6054 = vmatpush3.bf16.msra.mxu1 %v6246_v8 }
 0xc3b   : > { %v4301_v11 = vpop.f32.mrb[84].mxu0  ;;  %v4356_v12 = vpack.c.bf16 %v4347_v10, %v4347_v10  ;;  %6046 = vmatpush3.bf16.msra.mxu0 %v6245_v9  ;;  %v6025_v13 = vpop.f32.mrb[85].mxu1  ;;  %6067 = vmatprep.subr.bf16.mxu1 %v6888_v3 }
 0xc3c   : > { %v4355_v14 = vpack.c.bf16 %v4301_v11, %v4301_v11  ;;  %v6019_v15 = vpop.f32.mrb[85].mxu0  ;;  %v4350_v16 = vpop.f32.mrb[86].mxu1  ;;  %6059 = vmatprep.subr.bf16.mxu0 %v6888_v3  ;;  %v5544_v13 = vld [vmem:[%s8430_s10] ss:$0 sm:$0xff] }
 0xc3d   : > { %v4304_v17 = vpop.f32.mrb[86].mxu0  ;;  %v6026_v18 = vpop.f32.mrb[87].mxu1  ;;  %6056 = vmatmul.mubr.msk.bf16.vlgmr.msra.gmra.mrb[92].mxu1 %vm1771_vm2, %v4356_v12 }
 0xc3e   : > { %v6020_v19 = vpop.f32.mrb[87].mxu0  ;;  %6048 = vmatmul.mubr.msk.bf16.vlgmr.msra.gmra.mrb[92].mxu0 %vm1771_vm2, %v4355_v14  ;;  %6075 = vmatprep.mubr.msk.bf16.mxu1 %vm6889_vm1, %v6888_v3 }
 0xc3f   : > { %6063 = vmatprep.mubr.msk.bf16.mxu0 %vm6889_vm1, %v6888_v3  ;;  %6060 = vmatpush3.bf16.msra.mxu0 %v6247_v43 }
 0xc40   : > { %6061 = vmatprep.subr.bf16.mxu0 %v6888_v3 }
 0xc43   : > { %6062 = vmatpush3.bf16.msra.mxu0 %v6248_v44 }
 0xd08   : > { %v4461_v20 = vpop.f32.mrb[88].mxu1 }
 0xd09   : > { %v4406_v21 = vpop.f32.mrb[88].mxu0  ;;  %v4578_v22 = vsel %vm1771_vm2, %v4461_v20, 0.0  ;;  %v6041_v23 = vpop.f32.mrb[89].mxu1 }
 0xd0a   : > { %v4577_v24 = vsel %vm1771_vm2, %v4406_v21, 0.0  ;;  %v6033_v25 = vpop.f32.mrb[89].mxu0  ;;  %v4464_v26 = vpop.f32.mrb[90].mxu1 }
 0xd0b   : > { %v4579_v27 = vadd.f32 %v4578_v22, %v4577_v24  ;;  %v4409_v28 = vpop.f32.mrb[90].mxu0  ;;  %v6042_v29 = vpop.f32.mrb[91].mxu1 }
 0xd0c   : > { %v6034_v30 = vpop.f32.mrb[91].mxu0  ;;  %v5550_v29 = vld [vmem:[%s8431_s24] ss:$0 sm:$0xff] }
 0xd10   : > { %v4571_v31 = vpop.f32.mrb[92].mxu1 }
 0xd11   : > { %v4516_v32 = vpop.f32.mrb[92].mxu0  ;;  %v6057_v33 = vpop.f32.mrb[93].mxu1  ;;  %v4582_v41 = vsel %vm1771_vm2, %v4571_v31, 0.0  ;;  %v5551_v31 = vld [vmem:[%s1394_s20] ss:$0 sm:$0xff] }
 0xd12   : > { %v4580_v34 = vsel %vm1771_vm2, %v4516_v32, 0.0  ;;  %v6049_v35 = vpop.f32.mrb[93].mxu0  ;;  %v4574_v36 = vpop.f32.mrb[94].mxu1 }
 0xd13   : > { %v4581_v37 = vadd.f32 %v4580_v34, %v4579_v27  ;;  %v4519_v38 = vpop.f32.mrb[94].mxu0  ;;  %v6058_v39 = vpop.f32.mrb[95].mxu1 }
 0xd14   : > { %v6050_v42 = vpop.f32.mrb[95].mxu0 }
 0xd15   : > { %v4583_v45 = vadd.f32 %v4582_v41, %v4581_v37 }
 0xd17   : > { %v4590_v48 = vadd.f32 %v5537_v40, %v4583_v45 }
 0xd19   : > { %v4591_v49 = vadd.f32 %v4590_v48, %v8001_v6  ;;  %v6249_v6 = vld [vmem:[%s7766_s18] sm:$0xff]  }
 0xd1a   : > { %6068 = vmatpush3.bf16.msra.mxu1 %v6249_v6 }
 0xd1b   : > { %v4594_v50 = vsel %vm1771_vm2, %v4591_v49, 0.0  ;;  %6069 = vmatprep.subr.bf16.mxu1 %v6888_v3 }
 0xd1c   : > { %4595 = vadd.xlane.f32.xlu0 %v4594_v50 }
 0xd1e   : > { %6070 = vmatpush3.bf16.msra.mxu1 %v6250_v54 }
 0xd1f   : > { %6071 = vmatprep.subr.bf16.mxu1 %v6888_v3 }
 0xd22   : > { %6072 = vmatpush3.bf16.msra.mxu1 %v6251_v0 }
 0xd23   : > { %6073 = vmatprep.subr.bf16.mxu1 %v6888_v3 }
 0xd26   : > { %6074 = vmatpush3.bf16.msra.mxu1 %v6252_v1 }
 0xda9   : > { %v4596_v47 = vpop.xlane.xlu0 %4595 }
 0xdaa   : > { %v4597_v46 = vmul.f32 0.03125, %v4596_v47 }
 0xdac   : > { %v4598_v51 = vsub.f32 %v4591_v49, %v4597_v46 }
 0xdae   : > { %v4599_v52 = vmul.f32 %v4598_v51, %v4598_v51 }
 0xdb0   : > { %v4600_v53 = vsel %vm1771_vm2, %v4599_v52, 0.0 }
 0xdb1   : > { %4601 = vadd.xlane.f32.xlu1 %v4600_v53 }
 0xe3e   : > { %v4602_v55 = vpop.xlane.xlu1 %4601 }
 0xe3f   : > { %v4603_v56 = vmul.f32 0.03125, %v4602_v55 }
 0xe41   : > { %v4604_v57 = vadd.f32 1e-05, %v4603_v56 }
 0xe43   : > { %6287 = vrsqrt.f32 %v4604_v57 }
 0xe4d   : > { %v6288_v58 = vpop.eup %6287 }
 0xe4e   : > { %v4606_v60 = vmul.f32 %v6288_v58, %v4598_v51 }
 0xe50   : > { %v4613_v7 = vmul.f32 %v5538_v59, %v4606_v60 }
 0xe52   : > { %v4620_v62 = vadd.f32 %v5539_v61, %v4613_v7 }
 0xe54   : > { %v4635_v63 = vpack.c.bf16 %v4620_v62, %v4620_v62 }
 0xe56   : > { %6064 = vmatmul.mubr.msk.bf16.vlgmr.msra.gmra.mrb[96].mxu0 %vm1771_vm2, %v4635_v63 }
 0xf29   : > { %v4691_v4 = vpop.f32.mrb[96].mxu0 }
 0xf2a   : > { %v4692_v5 = vadd.f32 %v5540_v2, %v4691_v4  ;;  %v6065_v8 = vpop.f32.mrb[97].mxu0 }
 0xf2b   : > { %v4694_v9 = vpop.f32.mrb[98].mxu0 }
 0xf2c   : > { %v4697_v10 = vmax.f32 %v4692_v5, 0.0  ;;  %v6066_v11 = vpop.f32.mrb[99].mxu0 }
 0xf2e   : > { %v4698_v12 = vpack.c.bf16 %v4697_v10, %v4697_v10 }
 0xf30   : > { %6076 = vmatmul.mubr.msk.bf16.vlgmr.msra.gmra.mrb[96].mxu1 %vm4729_vm6, %v4698_v12 }
0x1003   : > { %v4767_v14 = vpop.f32.mrb[96].mxu1 }
0x1004   : > { %v4768_v15 = vadd.f32 %v5544_v13, %v4767_v14  ;;  %v6077_v16 = vpop.f32.mrb[97].mxu1 }
0x1005   : > { %v4770_v17 = vpop.f32.mrb[98].mxu1 }
0x1006   : > { %v6078_v3 = vpop.f32.mrb[99].mxu1  ;;  %v4773_v18 = vadd.f32 %v4768_v15, %v4620_v62 }
0x1008   : > { %v4776_v19 = vsel %vm1771_vm2, %v4773_v18, 0.0 }
0x1009   : > { %4777 = vadd.xlane.f32.xlu0 %v4776_v19 }
0x1096   : > { %v4778_v20 = vpop.xlane.xlu0 %4777 }
0x1097   : > { %v4779_v21 = vmul.f32 0.03125, %v4778_v20 }
0x1099   : > { %v4780_v22 = vsub.f32 %v4773_v18, %v4779_v21 }
0x109b   : > { %v4781_v23 = vmul.f32 %v4780_v22, %v4780_v22 }
0x109d   : > { %v4782_v24 = vsel %vm1771_vm2, %v4781_v23, 0.0 }
0x109e   : > { %4783 = vadd.xlane.f32.xlu1 %v4782_v24 }
0x112b   : > { %v4784_v25 = vpop.xlane.xlu1 %4783 }
0x112c   : > { %v4785_v26 = vmul.f32 0.03125, %v4784_v25 }
0x112e   : > { %v4786_v27 = vadd.f32 1e-05, %v4785_v26 }
0x1130   : > { %6289 = vrsqrt.f32 %v4786_v27 }
0x113a   : > { %v6290_v28 = vpop.eup %6289 }
0x113b   : > { %v4788_v30 = vmul.f32 %v6290_v28, %v4780_v22  ;;  %4807 = sbr.rel (%p5552_p2) target bundleno = 4420 (0x1144), region = 208 }
0x113d   : > { %v4795_v32 = vmul.f32 %v5550_v29, %v4788_v30 }
0x113f   : > { %v4802_v33 = vadd.f32 %v5551_v31, %v4795_v32 }
0x1141   : > { %4803 = vst.msk [vmem:[#allocation2] sm:$0xff] %vm1771_vm2, %v4802_v33  ;;  %v4808_v34 = vpack.c.bf16 (!%p5552_p2), %v4802_v33, %v4802_v33 }
0x1143   : > { %4810 = vst.msk [vmem:[%s1645_s15] sm:$0xf] %vm4809_vm7, %v4808_v34 }
0x1144 PF: > { %s8434_s2 = sld [smem:[#allocation44_spill]]  ;;  %s8435_s8 = sld [smem:[#allocation38_spill]] }
0x1145   : > { %s8436_s5 = sld [smem:[#allocation39_spill]]  ;;  %s8437_s9 = sld [smem:[#allocation47_spill]] }
0x1146   : > { %s8438_s30 = sld [smem:[#allocation42_spill]]  ;;  %s8439_s3 = sld [smem:[#allocation43_spill]] }
0x1147   : > { %s8440_s6 = sld [smem:[#allocation45_spill]]  ;;  %s8441_s10 = sld [smem:[#allocation46_spill]] }
0x114a   : > { %s65_s0 = sadd.s32 1, %s8434_s2  }
0x114b   : > { %p62_p1 = scmp.ge.s32.totalorder %s65_s0, 6  }
0x114d   :  { %64 = sbr.rel (!%p62_p1) target bundleno = 51 (0x33), region = 405 }
0x1154   :  { %4830 = vsyncpa [#allocation4], 1 }
0x1155   :  { %4832 = vsyncpa [#allocation4 + $0x1], 1 }
0x1156   :  { %4833 = vsyncpa [#allocation6], 1 }
0x1157   :  { %4835 = vsyncpa [#allocation6 + $0x1], 1 }
0x1158   :  { %4836 = vsyncpa [#allocation9], 1 }
0x1159   :  { %4838 = vsyncpa [#allocation9 + $0x1], 1 }
0x115a   :  { %4839 = vsyncpa [#allocation12], 1 }
0x115b   :  { %4841 = vsyncpa [#allocation12 + $0x1], 1 }
0x115c   :  { %4842 = vsyncpa [#allocation15], 1 }
0x115d   :  { %4844 = vsyncpa [#allocation15 + $0x1], 1 }
0x115e   :  { %4845 = vsyncpa [#allocation18], 1 }
0x115f   :  { %4847 = vsyncpa [#allocation18 + $0x1], 1 }
0x1160   :  { %4848 = vsyncpa [#allocation21], 1 }
0x1161   :  { %4850 = vsyncpa [#allocation21 + $0x1], 1 }
0x1162   :  { %4851 = vsyncpa [#allocation24], 1 }
0x1163   :  { %4853 = vsyncpa [#allocation24 + $0x1], 1 }
0x1164   :  { %4854 = vsyncpa [#allocation27], 1 }
0x1165   :  { %4856 = vsyncpa [#allocation27 + $0x1], 1 }

</bundles_post_ra>
